<compile_context>
chip_gen: v7x
topology: tpu7x:2x2x1
jax: 0.10.0
libtpu: 0.0.40
codegen_flags: <defaults>
</compile_context>

<pallas_src>
import functools
import math

import jax
import jax.numpy as jnp
from jax import lax
from jax.experimental import pallas as pl
from jax.experimental.pallas import tpu as pltpu


# ---------------------------- fused Pallas kernel ----------------------------

def _fused_block_kernel(x_ref, w_qkv_ref, b_qkv_ref, w_out_ref, b_out_ref,
                        w_proj_ref, b_proj_ref, w_final_ref, b_final_ref, o_ref,
                        *, num_heads, d, eps_gn, eps_ln):
    # One grid step == one batch element.  Everything is channels-first: x is (C, N).
    x = x_ref[0].astype(jnp.float32)                         # (C, N)
    C, N = x.shape
    hid = num_heads * d

    # ---- GroupNorm (num_groups == C here -> per-channel stats over N).  Affine folded into w_qkv. ----
    mu = jnp.mean(x, axis=1, keepdims=True)                  # (C, 1)
    xc = x - mu
    var = jnp.mean(xc * xc, axis=1, keepdims=True)           # biased variance (matches PyTorch)
    xn_bf = (xc * lax.rsqrt(var + eps_gn)).astype(jnp.bfloat16)          # (C, N)

    # ---- fused q/k/v projection, channels-first, single MXU pass (GN affine + q scale pre-folded) ----
    qkv = jnp.dot(w_qkv_ref[...], xn_bf,
                  preferred_element_type=jnp.float32) + b_qkv_ref[...]   # (3*hid, N) f32

    # ---- per-head attention; to_out fused into one (C, hid) x (hid, N) matmul afterwards ----
    QN = 128 if (N % 128 == 0 and N > 128) else N            # query chunk: keeps softmax live range small
    o_heads = []
    for h in range(num_heads):
        q_h = qkv[h * d:(h + 1) * d, :].astype(jnp.bfloat16)                       # (d, N)   sublane slice
        k_h = qkv[hid + h * d: hid + (h + 1) * d, :]                               # (d, N)   f32
        v_h = qkv[2 * hid + h * d: 2 * hid + (h + 1) * d, :].astype(jnp.bfloat16)  # (d, N)
        k_t = k_h.T.astype(jnp.bfloat16)                                           # (N, d)   tiny XLU transpose

        o_chunks = []
        for c0 in range(0, N, QN):
            q_c = q_h[:, c0:c0 + QN]                                               # (d, QN)  lane-aligned slice
            # t[j, i] = sum_d k[d, j] * q[d, i]   (key axis j on sublanes)
            t = jnp.dot(k_t, q_c, preferred_element_type=jnp.float32)              # (N, QN) f32
            m = jnp.max(t, axis=0, keepdims=True)                                  # (1, QN)
            p = jnp.exp(t - m)                                                     # (N, QN)
            l = jnp.sum(p, axis=0, keepdims=True)                                  # (1, QN)
            # o[d, i] = sum_j v[d, j] * p[j, i]   -> standard matmul, lane-dense output
            o_c = jnp.dot(v_h, p.astype(jnp.bfloat16),
                          preferred_element_type=jnp.float32)                      # (d, QN) f32
            o_chunks.append(o_c * (1.0 / l))                                       # deferred softmax normalization
        o_heads.append(jnp.concatenate(o_chunks, axis=1) if len(o_chunks) > 1 else o_chunks[0])

    o_all = (jnp.concatenate(o_heads, axis=0) if num_heads > 1 else o_heads[0]).astype(jnp.bfloat16)  # (hid, N)

    # ---- to_out (1x1 conv, K = hid) + residual with the ORIGINAL input ----
    x1 = x + jnp.dot(w_out_ref[...], o_all,
                     preferred_element_type=jnp.float32) + b_out_ref[...]          # (C, N)

    # ---- GEGLU feed-forward: LayerNorm over channels (affine folded into w_proj) + Linear(C -> 8C) ----
    mu2 = jnp.mean(x1, axis=0, keepdims=True)                # (1, N)
    xc2 = x1 - mu2
    var2 = jnp.mean(xc2 * xc2, axis=0, keepdims=True)
    xln_bf = (xc2 * lax.rsqrt(var2 + eps_ln)).astype(jnp.bfloat16)                 # (C, N)

    hp = jnp.dot(w_proj_ref[...], xln_bf,
                 preferred_element_type=jnp.float32) + b_proj_ref[...]             # (8C, N)
    four_c = 4 * C
    a = hp[:four_c, :]                                        # value half  (4C, N)
    gate = hp[four_c:, :]                                     # gate half   (4C, N)
    # TODO(synk): PyTorch F.gelu default is exact erf; Mosaic has no erf lowering, so the tanh
    #             approximation is used (EUP-friendly, ~1e-3-level deviation).
    gelu_gate = 0.5 * gate * (1.0 + jnp.tanh(
        0.7978845608028654 * (gate + 0.044715 * gate * gate * gate)))
    g = (a * gelu_gate).astype(jnp.bfloat16)                  # (4C, N)

    # ---- final 1x1 conv (4C -> C) + residual ----
    y = jnp.dot(w_final_ref[...], g,
                preferred_element_type=jnp.float32) + b_final_ref[...] + x1        # (C, N)

    o_ref[0] = y.astype(o_ref.dtype)                          # lane-dense (C, N) store


# ---------------------------- pallas_call wrapper ----------------------------

def basic_transformer_block(x_nchw, params, *, num_heads, ch_per_head, num_groups=32, eps=1e-5):
    B, C, H, W = x_nchw.shape
    N = H * W
    assert C % num_groups == 0
    # TODO(synk): generalize GroupNorm to channels-per-group > 1 (this module config has cg == 1).
    assert C // num_groups == 1, "fused kernel assumes num_groups == channels (cg == 1)"

    x = x_nchw.reshape(B, C, N)                               # free reshape (no transpose)

    kernel = functools.partial(_fused_block_kernel, num_heads=num_heads, d=ch_per_head,
                               eps_gn=eps, eps_ln=eps)

    weight_order = ['w_qkv', 'b_qkv', 'w_out', 'b_out',
                    'w_proj', 'b_proj', 'w_final', 'b_final']
    weights = [params[k] for k in weight_order]               # all 2-D, constant across the grid

    def w_spec(arr):
        return pl.BlockSpec(arr.shape, lambda b: (0, 0))

    out = pl.pallas_call(
        kernel,
        out_shape=jax.ShapeDtypeStruct((B, C, N), x.dtype),
        grid=(B,),
        in_specs=[pl.BlockSpec((1, C, N), lambda b: (b, 0, 0))] + [w_spec(w) for w in weights],
        out_specs=pl.BlockSpec((1, C, N), lambda b: (b, 0, 0)),
        compiler_params=pltpu.CompilerParams(dimension_semantics=("parallel",)),
    )(x, *weights)

    return out.reshape(B, C, H, W)                            # free reshape back to NCHW


# -------------------- deterministic parameter init (+ host-side constant folding) --------------------

def init_params(key, C, num_heads, ch_per_head):
    hid = num_heads * ch_per_head
    bf = jnp.bfloat16
    ks = jax.random.split(key, 16)

    def nrm(k, shape, s=0.1):
        return (s * jax.random.normal(k, shape)).astype(jnp.float32)

    # Raw module parameters (PyTorch layouts: conv/linear weight = (out, in)).
    gn_g = 1.0 + nrm(ks[0], (C,)); gn_b = nrm(ks[1], (C,))                 # GroupNorm affine
    wq = nrm(ks[2], (hid, C)); bq = nrm(ks[3], (hid,))                     # to_q
    wk = nrm(ks[4], (hid, C)); bk = nrm(ks[5], (hid,))                     # to_k
    wv = nrm(ks[6], (hid, C)); bv = nrm(ks[7], (hid,))                     # to_v
    # to_out: zero_module() in the reference; small random here so the attention path is exercised.
    w_out = nrm(ks[8], (C, hid)); b_out = nrm(ks[9], (C,))
    ln_g = 1.0 + nrm(ks[10], (C,)); ln_b = nrm(ks[11], (C,))               # LayerNorm affine (GEGLU)
    w_proj = nrm(ks[12], (8 * C, C)); b_proj = nrm(ks[13], (8 * C,))       # GEGLU Linear(C -> 8C)
    w_final = nrm(ks[14], (C, 4 * C)); b_final = nrm(ks[15], (C,))         # final 1x1 conv (4C -> C)

    # ---- constant folding (host side, f32) ----
    # GroupNorm affine folds into the q/k/v projections; the attention scale (d^-0.25 on q and on k)
    # folds as a single d^-0.5 onto the q rows.
    scale = float(ch_per_head) ** (-0.5)
    wq_f = scale * (wq * gn_g[None, :]); bq_f = scale * (wq @ gn_b + bq)
    wk_f = wk * gn_g[None, :];           bk_f = wk @ gn_b + bk
    wv_f = wv * gn_g[None, :];           bv_f = wv @ gn_b + bv
    w_qkv = jnp.concatenate([wq_f, wk_f, wv_f], axis=0)                    # (3*hid, C)
    b_qkv = jnp.concatenate([bq_f, bk_f, bv_f], axis=0)[:, None]           # (3*hid, 1)

    # LayerNorm affine folds into the GEGLU projection.
    w_proj_f = w_proj * ln_g[None, :]
    b_proj_f = (w_proj @ ln_b + b_proj)[:, None]                           # (8C, 1)

    return {
        'w_qkv': w_qkv.astype(bf),   'b_qkv': b_qkv,                       # (3*hid, C) bf16 / (3*hid, 1) f32
        'w_out': w_out.astype(bf),   'b_out': b_out[:, None],              # (C, hid) bf16 / (C, 1) f32
        'w_proj': w_proj_f.astype(bf), 'b_proj': b_proj_f,                 # (8C, C) bf16 / (8C, 1) f32
        'w_final': w_final.astype(bf), 'b_final': b_final[:, None],        # (C, 4C) bf16 / (C, 1) f32
    }


if __name__ == "__main__":
    B, C, H, W = 2, 32, 16, 16
    num_heads, ch_per_head, num_groups = 2, 32, 32

    key = jax.random.PRNGKey(0)
    kx, kp = jax.random.split(key)
    x = jax.random.normal(kx, (B, C, H, W), dtype=jnp.float32)
    params = init_params(kp, C, num_heads, ch_per_head)

    fwd = jax.jit(functools.partial(
        basic_transformer_block,
        num_heads=num_heads, ch_per_head=ch_per_head, num_groups=num_groups))
    out = fwd(x, params)
    jax.block_until_ready(out)
    assert out.shape == (B, C, H, W), out.shape
    assert bool(jnp.all(jnp.isfinite(out)))
    print("KERNEL_OK")
</pallas_src>

<mosaic_0001>
module attributes {stable_mosaic.version = 11 : i64} {
  func.func @_fused_block_kernel(%arg0: i32, %arg1: memref<1x32x256xf32, #tpu.memory_space<vmem>>, %arg2: memref<192x32xbf16, #tpu.memory_space<vmem>>, %arg3: memref<192x1xf32, #tpu.memory_space<vmem>>, %arg4: memref<32x64xbf16, #tpu.memory_space<vmem>>, %arg5: memref<32x1xf32, #tpu.memory_space<vmem>>, %arg6: memref<256x32xbf16, #tpu.memory_space<vmem>>, %arg7: memref<256x1xf32, #tpu.memory_space<vmem>>, %arg8: memref<32x128xbf16, #tpu.memory_space<vmem>>, %arg9: memref<32x1xf32, #tpu.memory_space<vmem>>, %arg10: memref<1x32x256xf32, #tpu.memory_space<vmem>>) attributes {dimension_semantics = [#tpu.dimension_semantics<parallel>], iteration_bounds = array<i64: 2>, scalar_prefetch = 0 : i64, scratch_operands = 0 : i64, tpu.core_type = #tpu.core_type<tc>, window_params = [{transform_indices = @transform_0, window_bounds = array<i64: 1, 32, 256>}, {pipeline_mode = #tpu.pipeline_mode<synchronous>, transform_indices = @transform_1, window_bounds = array<i64: 192, 32>}, {pipeline_mode = #tpu.pipeline_mode<synchronous>, transform_indices = @transform_2, window_bounds = array<i64: 192, 1>}, {pipeline_mode = #tpu.pipeline_mode<synchronous>, transform_indices = @transform_3, window_bounds = array<i64: 32, 64>}, {pipeline_mode = #tpu.pipeline_mode<synchronous>, transform_indices = @transform_4, window_bounds = array<i64: 32, 1>}, {pipeline_mode = #tpu.pipeline_mode<synchronous>, transform_indices = @transform_5, window_bounds = array<i64: 256, 32>}, {pipeline_mode = #tpu.pipeline_mode<synchronous>, transform_indices = @transform_6, window_bounds = array<i64: 256, 1>}, {pipeline_mode = #tpu.pipeline_mode<synchronous>, transform_indices = @transform_7, window_bounds = array<i64: 32, 128>}, {pipeline_mode = #tpu.pipeline_mode<synchronous>, transform_indices = @transform_8, window_bounds = array<i64: 32, 1>}, {transform_indices = @transform_9, window_bounds = array<i64: 1, 32, 256>}]} {
    %c0 = arith.constant 0 : index
    %c0_0 = arith.constant 0 : index
    %c0_1 = arith.constant 0 : index
    %0 = vector.load %arg1[%c0, %c0_0, %c0_1] : memref<1x32x256xf32, #tpu.memory_space<vmem>>, vector<1x32x256xf32>
    %1 = vector.shape_cast %0 : vector<1x32x256xf32> to vector<32x256xf32>
    %cst = arith.constant dense<0.000000e+00> : vector<32xf32>
    %2 = vector.multi_reduction <add>, %1, %cst [1] : vector<32x256xf32> to vector<32xf32>
    %3 = vector.shape_cast %2 : vector<32xf32> to vector<32x1xf32>
    %cst_2 = arith.constant 2.560000e+02 : f32
    %4 = vector.broadcast %cst_2 : f32 to vector<32x1xf32>
    %5 = arith.divf %3, %4 : vector<32x1xf32>
    %6 = vector.broadcast %5 : vector<32x1xf32> to vector<32x256xf32>
    %7 = arith.subf %1, %6 : vector<32x256xf32>
    %8 = arith.mulf %7, %7 : vector<32x256xf32>
    %cst_3 = arith.constant dense<0.000000e+00> : vector<32xf32>
    %9 = vector.multi_reduction <add>, %8, %cst_3 [1] : vector<32x256xf32> to vector<32xf32>
    %10 = vector.shape_cast %9 : vector<32xf32> to vector<32x1xf32>
    %cst_4 = arith.constant 2.560000e+02 : f32
    %11 = vector.broadcast %cst_4 : f32 to vector<32x1xf32>
    %12 = arith.divf %10, %11 : vector<32x1xf32>
    %cst_5 = arith.constant 9.99999974E-6 : f32
    %13 = vector.broadcast %cst_5 : f32 to vector<32x1xf32>
    %14 = arith.addf %12, %13 : vector<32x1xf32>
    %15 = math.rsqrt %14 : vector<32x1xf32>
    %16 = vector.broadcast %15 : vector<32x1xf32> to vector<32x256xf32>
    %17 = arith.mulf %7, %16 : vector<32x256xf32>
    %18 = arith.truncf %17 : vector<32x256xf32> to vector<32x256xbf16>
    %c0_6 = arith.constant 0 : index
    %c0_7 = arith.constant 0 : index
    %19 = vector.load %arg2[%c0_6, %c0_7] : memref<192x32xbf16, #tpu.memory_space<vmem>>, vector<192x32xbf16>
    %cst_8 = arith.constant dense<0.000000e+00> : vector<192x256xf32>
    %20 = tpu.matmul %19, %18, %cst_8 {dimension_numbers = #tpu.dot_dimension_numbers<[1], [0], [0], [1], [0, 0, 1, 1], [], []>} : vector<192x32xbf16>, vector<32x256xbf16>, vector<192x256xf32> -> vector<192x256xf32>
    %c0_9 = arith.constant 0 : index
    %c0_10 = arith.constant 0 : index
    %21 = vector.load %arg3[%c0_9, %c0_10] : memref<192x1xf32, #tpu.memory_space<vmem>>, vector<192x1xf32>
    %22 = vector.broadcast %21 : vector<192x1xf32> to vector<192x256xf32>
    %23 = arith.addf %20, %22 : vector<192x256xf32>
    %24 = vector.extract_strided_slice %23 {offsets = [0, 0], sizes = [32, 256], strides = [1, 1]} : vector<192x256xf32> to vector<32x256xf32>
    %25 = arith.truncf %24 : vector<32x256xf32> to vector<32x256xbf16>
    %26 = vector.extract_strided_slice %23 {offsets = [64, 0], sizes = [32, 256], strides = [1, 1]} : vector<192x256xf32> to vector<32x256xf32>
    %27 = vector.extract_strided_slice %23 {offsets = [128, 0], sizes = [32, 256], strides = [1, 1]} : vector<192x256xf32> to vector<32x256xf32>
    %28 = arith.truncf %27 : vector<32x256xf32> to vector<32x256xbf16>
    %29 = tpu.transpose %26, [1, 0] : vector<32x256xf32> -> vector<256x32xf32>
    %30 = arith.truncf %29 : vector<256x32xf32> to vector<256x32xbf16>
    %31 = vector.extract_strided_slice %25 {offsets = [0, 0], sizes = [32, 128], strides = [1, 1]} : vector<32x256xbf16> to vector<32x128xbf16>
    %cst_11 = arith.constant dense<0.000000e+00> : vector<256x128xf32>
    %32 = tpu.matmul %30, %31, %cst_11 {dimension_numbers = #tpu.dot_dimension_numbers<[1], [0], [0], [1], [0, 0, 1, 1], [], []>} : vector<256x32xbf16>, vector<32x128xbf16>, vector<256x128xf32> -> vector<256x128xf32>
    %cst_12 = arith.constant dense<0xFF800000> : vector<128xf32>
    %33 = vector.multi_reduction <maximumf>, %32, %cst_12 [0] : vector<256x128xf32> to vector<128xf32>
    %34 = vector.shape_cast %33 : vector<128xf32> to vector<1x128xf32>
    %35 = vector.broadcast %34 : vector<1x128xf32> to vector<256x128xf32>
    %36 = arith.subf %32, %35 : vector<256x128xf32>
    %37 = math.exp %36 : vector<256x128xf32>
    %cst_13 = arith.constant dense<0.000000e+00> : vector<128xf32>
    %38 = vector.multi_reduction <add>, %37, %cst_13 [0] : vector<256x128xf32> to vector<128xf32>
    %39 = vector.shape_cast %38 : vector<128xf32> to vector<1x128xf32>
    %40 = arith.truncf %37 : vector<256x128xf32> to vector<256x128xbf16>
    %cst_14 = arith.constant dense<0.000000e+00> : vector<32x128xf32>
    %41 = tpu.matmul %28, %40, %cst_14 {dimension_numbers = #tpu.dot_dimension_numbers<[1], [0], [0], [1], [0, 0, 1, 1], [], []>} : vector<32x256xbf16>, vector<256x128xbf16>, vector<32x128xf32> -> vector<32x128xf32>
    %cst_15 = arith.constant 1.000000e+00 : f32
    %42 = vector.broadcast %cst_15 : f32 to vector<1x128xf32>
    %43 = arith.divf %42, %39 : vector<1x128xf32>
    %44 = vector.broadcast %43 : vector<1x128xf32> to vector<32x128xf32>
    %45 = arith.mulf %41, %44 : vector<32x128xf32>
    %46 = vector.extract_strided_slice %25 {offsets = [0, 128], sizes = [32, 128], strides = [1, 1]} : vector<32x256xbf16> to vector<32x128xbf16>
    %cst_16 = arith.constant dense<0.000000e+00> : vector<256x128xf32>
    %47 = tpu.matmul %30, %46, %cst_16 {dimension_numbers = #tpu.dot_dimension_numbers<[1], [0], [0], [1], [0, 0, 1, 1], [], []>} : vector<256x32xbf16>, vector<32x128xbf16>, vector<256x128xf32> -> vector<256x128xf32>
    %cst_17 = arith.constant dense<0xFF800000> : vector<128xf32>
    %48 = vector.multi_reduction <maximumf>, %47, %cst_17 [0] : vector<256x128xf32> to vector<128xf32>
    %49 = vector.shape_cast %48 : vector<128xf32> to vector<1x128xf32>
    %50 = vector.broadcast %49 : vector<1x128xf32> to vector<256x128xf32>
    %51 = arith.subf %47, %50 : vector<256x128xf32>
    %52 = math.exp %51 : vector<256x128xf32>
    %cst_18 = arith.constant dense<0.000000e+00> : vector<128xf32>
    %53 = vector.multi_reduction <add>, %52, %cst_18 [0] : vector<256x128xf32> to vector<128xf32>
    %54 = vector.shape_cast %53 : vector<128xf32> to vector<1x128xf32>
    %55 = arith.truncf %52 : vector<256x128xf32> to vector<256x128xbf16>
    %cst_19 = arith.constant dense<0.000000e+00> : vector<32x128xf32>
    %56 = tpu.matmul %28, %55, %cst_19 {dimension_numbers = #tpu.dot_dimension_numbers<[1], [0], [0], [1], [0, 0, 1, 1], [], []>} : vector<32x256xbf16>, vector<256x128xbf16>, vector<32x128xf32> -> vector<32x128xf32>
    %cst_20 = arith.constant 1.000000e+00 : f32
    %57 = vector.broadcast %cst_20 : f32 to vector<1x128xf32>
    %58 = arith.divf %57, %54 : vector<1x128xf32>
    %59 = vector.broadcast %58 : vector<1x128xf32> to vector<32x128xf32>
    %60 = arith.mulf %56, %59 : vector<32x128xf32>
    %61 = tpu.concatenate %45, %60 in 1 : vector<32x128xf32>, vector<32x128xf32> -> vector<32x256xf32>
    %62 = vector.extract_strided_slice %23 {offsets = [32, 0], sizes = [32, 256], strides = [1, 1]} : vector<192x256xf32> to vector<32x256xf32>
    %63 = arith.truncf %62 : vector<32x256xf32> to vector<32x256xbf16>
    %64 = vector.extract_strided_slice %23 {offsets = [96, 0], sizes = [32, 256], strides = [1, 1]} : vector<192x256xf32> to vector<32x256xf32>
    %65 = vector.extract_strided_slice %23 {offsets = [160, 0], sizes = [32, 256], strides = [1, 1]} : vector<192x256xf32> to vector<32x256xf32>
    %66 = arith.truncf %65 : vector<32x256xf32> to vector<32x256xbf16>
    %67 = tpu.transpose %64, [1, 0] : vector<32x256xf32> -> vector<256x32xf32>
    %68 = arith.truncf %67 : vector<256x32xf32> to vector<256x32xbf16>
    %69 = vector.extract_strided_slice %63 {offsets = [0, 0], sizes = [32, 128], strides = [1, 1]} : vector<32x256xbf16> to vector<32x128xbf16>
    %cst_21 = arith.constant dense<0.000000e+00> : vector<256x128xf32>
    %70 = tpu.matmul %68, %69, %cst_21 {dimension_numbers = #tpu.dot_dimension_numbers<[1], [0], [0], [1], [0, 0, 1, 1], [], []>} : vector<256x32xbf16>, vector<32x128xbf16>, vector<256x128xf32> -> vector<256x128xf32>
    %cst_22 = arith.constant dense<0xFF800000> : vector<128xf32>
    %71 = vector.multi_reduction <maximumf>, %70, %cst_22 [0] : vector<256x128xf32> to vector<128xf32>
    %72 = vector.shape_cast %71 : vector<128xf32> to vector<1x128xf32>
    %73 = vector.broadcast %72 : vector<1x128xf32> to vector<256x128xf32>
    %74 = arith.subf %70, %73 : vector<256x128xf32>
    %75 = math.exp %74 : vector<256x128xf32>
    %cst_23 = arith.constant dense<0.000000e+00> : vector<128xf32>
    %76 = vector.multi_reduction <add>, %75, %cst_23 [0] : vector<256x128xf32> to vector<128xf32>
    %77 = vector.shape_cast %76 : vector<128xf32> to vector<1x128xf32>
    %78 = arith.truncf %75 : vector<256x128xf32> to vector<256x128xbf16>
    %cst_24 = arith.constant dense<0.000000e+00> : vector<32x128xf32>
    %79 = tpu.matmul %66, %78, %cst_24 {dimension_numbers = #tpu.dot_dimension_numbers<[1], [0], [0], [1], [0, 0, 1, 1], [], []>} : vector<32x256xbf16>, vector<256x128xbf16>, vector<32x128xf32> -> vector<32x128xf32>
    %cst_25 = arith.constant 1.000000e+00 : f32
    %80 = vector.broadcast %cst_25 : f32 to vector<1x128xf32>
    %81 = arith.divf %80, %77 : vector<1x128xf32>
    %82 = vector.broadcast %81 : vector<1x128xf32> to vector<32x128xf32>
    %83 = arith.mulf %79, %82 : vector<32x128xf32>
    %84 = vector.extract_strided_slice %63 {offsets = [0, 128], sizes = [32, 128], strides = [1, 1]} : vector<32x256xbf16> to vector<32x128xbf16>
    %cst_26 = arith.constant dense<0.000000e+00> : vector<256x128xf32>
    %85 = tpu.matmul %68, %84, %cst_26 {dimension_numbers = #tpu.dot_dimension_numbers<[1], [0], [0], [1], [0, 0, 1, 1], [], []>} : vector<256x32xbf16>, vector<32x128xbf16>, vector<256x128xf32> -> vector<256x128xf32>
    %cst_27 = arith.constant dense<0xFF800000> : vector<128xf32>
    %86 = vector.multi_reduction <maximumf>, %85, %cst_27 [0] : vector<256x128xf32> to vector<128xf32>
    %87 = vector.shape_cast %86 : vector<128xf32> to vector<1x128xf32>
    %88 = vector.broadcast %87 : vector<1x128xf32> to vector<256x128xf32>
    %89 = arith.subf %85, %88 : vector<256x128xf32>
    %90 = math.exp %89 : vector<256x128xf32>
    %cst_28 = arith.constant dense<0.000000e+00> : vector<128xf32>
    %91 = vector.multi_reduction <add>, %90, %cst_28 [0] : vector<256x128xf32> to vector<128xf32>
    %92 = vector.shape_cast %91 : vector<128xf32> to vector<1x128xf32>
    %93 = arith.truncf %90 : vector<256x128xf32> to vector<256x128xbf16>
    %cst_29 = arith.constant dense<0.000000e+00> : vector<32x128xf32>
    %94 = tpu.matmul %66, %93, %cst_29 {dimension_numbers = #tpu.dot_dimension_numbers<[1], [0], [0], [1], [0, 0, 1, 1], [], []>} : vector<32x256xbf16>, vector<256x128xbf16>, vector<32x128xf32> -> vector<32x128xf32>
    %cst_30 = arith.constant 1.000000e+00 : f32
    %95 = vector.broadcast %cst_30 : f32 to vector<1x128xf32>
    %96 = arith.divf %95, %92 : vector<1x128xf32>
    %97 = vector.broadcast %96 : vector<1x128xf32> to vector<32x128xf32>
    %98 = arith.mulf %94, %97 : vector<32x128xf32>
    %99 = tpu.concatenate %83, %98 in 1 : vector<32x128xf32>, vector<32x128xf32> -> vector<32x256xf32>
    %100 = tpu.concatenate %61, %99 in 0 : vector<32x256xf32>, vector<32x256xf32> -> vector<64x256xf32>
    %101 = arith.truncf %100 : vector<64x256xf32> to vector<64x256xbf16>
    %c0_31 = arith.constant 0 : index
    %c0_32 = arith.constant 0 : index
    %102 = vector.load %arg4[%c0_31, %c0_32] : memref<32x64xbf16, #tpu.memory_space<vmem>>, vector<32x64xbf16>
    %cst_33 = arith.constant dense<0.000000e+00> : vector<32x256xf32>
    %103 = tpu.matmul %102, %101, %cst_33 {dimension_numbers = #tpu.dot_dimension_numbers<[1], [0], [0], [1], [0, 0, 1, 1], [], []>} : vector<32x64xbf16>, vector<64x256xbf16>, vector<32x256xf32> -> vector<32x256xf32>
    %104 = arith.addf %1, %103 : vector<32x256xf32>
    %c0_34 = arith.constant 0 : index
    %c0_35 = arith.constant 0 : index
    %105 = vector.load %arg5[%c0_34, %c0_35] : memref<32x1xf32, #tpu.memory_space<vmem>>, vector<32x1xf32>
    %106 = vector.broadcast %105 : vector<32x1xf32> to vector<32x256xf32>
    %107 = arith.addf %104, %106 : vector<32x256xf32>
    %cst_36 = arith.constant dense<0.000000e+00> : vector<256xf32>
    %108 = vector.multi_reduction <add>, %107, %cst_36 [0] : vector<32x256xf32> to vector<256xf32>
    %109 = vector.shape_cast %108 : vector<256xf32> to vector<1x256xf32>
    %cst_37 = arith.constant 3.200000e+01 : f32
    %110 = vector.broadcast %cst_37 : f32 to vector<1x256xf32>
    %111 = arith.divf %109, %110 : vector<1x256xf32>
    %112 = vector.broadcast %111 : vector<1x256xf32> to vector<32x256xf32>
    %113 = arith.subf %107, %112 : vector<32x256xf32>
    %114 = arith.mulf %113, %113 : vector<32x256xf32>
    %cst_38 = arith.constant dense<0.000000e+00> : vector<256xf32>
    %115 = vector.multi_reduction <add>, %114, %cst_38 [0] : vector<32x256xf32> to vector<256xf32>
    %116 = vector.shape_cast %115 : vector<256xf32> to vector<1x256xf32>
    %cst_39 = arith.constant 3.200000e+01 : f32
    %117 = vector.broadcast %cst_39 : f32 to vector<1x256xf32>
    %118 = arith.divf %116, %117 : vector<1x256xf32>
    %cst_40 = arith.constant 9.99999974E-6 : f32
    %119 = vector.broadcast %cst_40 : f32 to vector<1x256xf32>
    %120 = arith.addf %118, %119 : vector<1x256xf32>
    %121 = math.rsqrt %120 : vector<1x256xf32>
    %122 = vector.broadcast %121 : vector<1x256xf32> to vector<32x256xf32>
    %123 = arith.mulf %113, %122 : vector<32x256xf32>
    %124 = arith.truncf %123 : vector<32x256xf32> to vector<32x256xbf16>
    %c0_41 = arith.constant 0 : index
    %c0_42 = arith.constant 0 : index
    %125 = vector.load %arg6[%c0_41, %c0_42] : memref<256x32xbf16, #tpu.memory_space<vmem>>, vector<256x32xbf16>
    %cst_43 = arith.constant dense<0.000000e+00> : vector<256x256xf32>
    %126 = tpu.matmul %125, %124, %cst_43 {dimension_numbers = #tpu.dot_dimension_numbers<[1], [0], [0], [1], [0, 0, 1, 1], [], []>} : vector<256x32xbf16>, vector<32x256xbf16>, vector<256x256xf32> -> vector<256x256xf32>
    %c0_44 = arith.constant 0 : index
    %c0_45 = arith.constant 0 : index
    %127 = vector.load %arg7[%c0_44, %c0_45] : memref<256x1xf32, #tpu.memory_space<vmem>>, vector<256x1xf32>
    %128 = vector.broadcast %127 : vector<256x1xf32> to vector<256x256xf32>
    %129 = arith.addf %126, %128 : vector<256x256xf32>
    %130 = vector.extract_strided_slice %129 {offsets = [0, 0], sizes = [128, 256], strides = [1, 1]} : vector<256x256xf32> to vector<128x256xf32>
    %131 = vector.extract_strided_slice %129 {offsets = [128, 0], sizes = [128, 256], strides = [1, 1]} : vector<256x256xf32> to vector<128x256xf32>
    %cst_46 = arith.constant 5.000000e-01 : f32
    %132 = vector.broadcast %cst_46 : f32 to vector<128x256xf32>
    %133 = arith.mulf %132, %131 : vector<128x256xf32>
    %cst_47 = arith.constant 4.471500e-02 : f32
    %134 = vector.broadcast %cst_47 : f32 to vector<128x256xf32>
    %135 = arith.mulf %134, %131 : vector<128x256xf32>
    %136 = arith.mulf %135, %131 : vector<128x256xf32>
    %137 = arith.mulf %136, %131 : vector<128x256xf32>
    %138 = arith.addf %131, %137 : vector<128x256xf32>
    %cst_48 = arith.constant 0.797884583 : f32
    %139 = vector.broadcast %cst_48 : f32 to vector<128x256xf32>
    %140 = arith.mulf %139, %138 : vector<128x256xf32>
    %141 = math.tanh %140 : vector<128x256xf32>
    %cst_49 = arith.constant 1.000000e+00 : f32
    %142 = vector.broadcast %cst_49 : f32 to vector<128x256xf32>
    %143 = arith.addf %142, %141 : vector<128x256xf32>
    %144 = arith.mulf %133, %143 : vector<128x256xf32>
    %145 = arith.mulf %130, %144 : vector<128x256xf32>
    %146 = arith.truncf %145 : vector<128x256xf32> to vector<128x256xbf16>
    %c0_50 = arith.constant 0 : index
    %c0_51 = arith.constant 0 : index
    %147 = vector.load %arg8[%c0_50, %c0_51] : memref<32x128xbf16, #tpu.memory_space<vmem>>, vector<32x128xbf16>
    %cst_52 = arith.constant dense<0.000000e+00> : vector<32x256xf32>
    %148 = tpu.matmul %147, %146, %cst_52 {dimension_numbers = #tpu.dot_dimension_numbers<[1], [0], [0], [1], [0, 0, 1, 1], [], []>} : vector<32x128xbf16>, vector<128x256xbf16>, vector<32x256xf32> -> vector<32x256xf32>
    %c0_53 = arith.constant 0 : index
    %c0_54 = arith.constant 0 : index
    %149 = vector.load %arg9[%c0_53, %c0_54] : memref<32x1xf32, #tpu.memory_space<vmem>>, vector<32x1xf32>
    %150 = vector.broadcast %149 : vector<32x1xf32> to vector<32x256xf32>
    %151 = arith.addf %148, %150 : vector<32x256xf32>
    %152 = arith.addf %151, %107 : vector<32x256xf32>
    %c0_55 = arith.constant 0 : index
    %c0_56 = arith.constant 0 : index
    %c0_57 = arith.constant 0 : index
    %153 = vector.load %arg10[%c0_55, %c0_56, %c0_57] : memref<1x32x256xf32, #tpu.memory_space<vmem>>, vector<1x32x256xf32>
    %154 = vector.shape_cast %153 : vector<1x32x256xf32> to vector<32x256xf32>
    %155 = vector.shape_cast %152 : vector<32x256xf32> to vector<1x32x256xf32>
    tpu.vector_store %arg10[%c0_55, %c0_56, %c0_57], %155 {strides = array<i32>} : memref<1x32x256xf32, #tpu.memory_space<vmem>>, vector<1x32x256xf32>,
    return
  }
  func.func @transform_0(%arg0: i32) -> (i32, i32, i32) {
    %c0_i32 = arith.constant 0 : i32
    %c0_i32_0 = arith.constant 0 : i32
    %c0_i32_1 = arith.constant 0 : i32
    return %arg0, %c0_i32, %c0_i32_0 : i32, i32, i32
  }
  func.func @transform_1(%arg0: i32) -> (i32, i32) {
    %c0_i32 = arith.constant 0 : i32
    %c0_i32_0 = arith.constant 0 : i32
    %c0_i32_1 = arith.constant 0 : i32
    return %c0_i32, %c0_i32_0 : i32, i32
  }
  func.func @transform_2(%arg0: i32) -> (i32, i32) {
    %c0_i32 = arith.constant 0 : i32
    %c0_i32_0 = arith.constant 0 : i32
    %c0_i32_1 = arith.constant 0 : i32
    return %c0_i32, %c0_i32_0 : i32, i32
  }
  func.func @transform_3(%arg0: i32) -> (i32, i32) {
    %c0_i32 = arith.constant 0 : i32
    %c0_i32_0 = arith.constant 0 : i32
    %c0_i32_1 = arith.constant 0 : i32
    return %c0_i32, %c0_i32_0 : i32, i32
  }
  func.func @transform_4(%arg0: i32) -> (i32, i32) {
    %c0_i32 = arith.constant 0 : i32
    %c0_i32_0 = arith.constant 0 : i32
    %c0_i32_1 = arith.constant 0 : i32
    return %c0_i32, %c0_i32_0 : i32, i32
  }
  func.func @transform_5(%arg0: i32) -> (i32, i32) {
    %c0_i32 = arith.constant 0 : i32
    %c0_i32_0 = arith.constant 0 : i32
    %c0_i32_1 = arith.constant 0 : i32
    return %c0_i32, %c0_i32_0 : i32, i32
  }
  func.func @transform_6(%arg0: i32) -> (i32, i32) {
    %c0_i32 = arith.constant 0 : i32
    %c0_i32_0 = arith.constant 0 : i32
    %c0_i32_1 = arith.constant 0 : i32
    return %c0_i32, %c0_i32_0 : i32, i32
  }
  func.func @transform_7(%arg0: i32) -> (i32, i32) {
    %c0_i32 = arith.constant 0 : i32
    %c0_i32_0 = arith.constant 0 : i32
    %c0_i32_1 = arith.constant 0 : i32
    return %c0_i32, %c0_i32_0 : i32, i32
  }
  func.func @transform_8(%arg0: i32) -> (i32, i32) {
    %c0_i32 = arith.constant 0 : i32
    %c0_i32_0 = arith.constant 0 : i32
    %c0_i32_1 = arith.constant 0 : i32
    return %c0_i32, %c0_i32_0 : i32, i32
  }
  func.func @transform_9(%arg0: i32) -> (i32, i32, i32) {
    %c0_i32 = arith.constant 0 : i32
    %c0_i32_0 = arith.constant 0 : i32
    %c0_i32_1 = arith.constant 0 : i32
    return %arg0, %c0_i32, %c0_i32_0 : i32, i32, i32
  }
}

</mosaic_0001>

<bundles_post_ra>
// kernel: basic_transformer_block.1
= control target key start
LH: loop header
LB: loop body
LE: loop exit
PB: predicated region body
PF: predicated region fallthrough
CT: control target
= control target key end

     0   :  { %s4871_s30 = smov 0   ;;  %s7302_s0 = inlined_call_operand.vmem [shape: f32[2,32,256], index: 0, kind: input, shape index: {}]   ;;  %s7303_s1 = inlined_call_operand.vmem [shape: bf16[192,32], index: 1, kind: input, shape index: {}]   ;;  %s7304_s2 = inlined_call_operand.vmem [shape: f32[192,1], index: 2, kind: input, shape index: {}]   ;;  %s7305_s3 = inlined_call_operand.vmem [shape: bf16[32,64], index: 3, kind: input, shape index: {}]   ;;  %s7306_s4 = inlined_call_operand.vmem [shape: f32[32,1], index: 4, kind: input, shape index: {}]   ;;  %s7307_s5 = inlined_call_operand.vmem [shape: bf16[256,32], index: 5, kind: input, shape index: {}]   ;;  %s7308_s6 = inlined_call_operand.vmem [shape: f32[256,1], index: 6, kind: input, shape index: {}]   ;;  %s7309_s7 = inlined_call_operand.vmem [shape: bf16[32,128], index: 7, kind: input, shape index: {}]   ;;  %s7310_s8 = inlined_call_operand.vmem [shape: f32[32,1], index: 8, kind: input, shape index: {}]   ;;  %s7311_s9 = inlined_call_operand.vmem [shape: f32[2,32,256], index: 9, kind: output, shape index: {}]  }
   0x1 LB: > { %s3949_s10 = sadd.s32 4294967295, %s4818_s30   ;;  %p3953_p0 = scmp.ge.s32.totalorder %s4818_s30, 1  ;;  %s4818_s30 = sphi %s4871_s30, %s19_s30  }
   0x2   : > { %p287_p1 = scmp.lt.s32.totalorder %s4818_s30, 3 }
   0x4   : > { %p288_p2 = pnand %p3953_p0, %p287_p1 }
   0x6   : > { %291 = sbr.rel (%p288_p2) target bundleno = 3381 (0xd35), region = 56 }
   0xd   : > { %p323_p3 = scmp.lt.s32.totalorder %s3949_s10, 1  ;;  %v7312_v40 = vmov 0   ;;  %v444_v41 = vld [vmem:[%s7304_s2 + $0x48] sm:$0xff]  ;;  %v445_v42 = vld [vmem:[%s7304_s2 + $0x50] sm:$0xff]  ;;  %v443_v43 = vld [vmem:[%s7304_s2 + $0x40] sm:$0xff]  ;;  %vm639_vm0 = vcmask 261120  }
   0xe   : > { %708 = vmatprep.mubr.bf16.mxu0 %v7312_v40  ;;  %4431 = vset.pattern.permute.xlu1 %v7312_v40  ;;  %v446_v44 = vld [vmem:[%s7304_s2 + $0x58] sm:$0xff]  ;;  %v435_v45 = vld [vmem:[%s7304_s2] sm:$0xff]  ;;  %v436_v46 = vld [vmem:[%s7304_s2 + $0x8] sm:$0xff]  ;;  %vm2731_vm1 = vcmask 523264  }
   0xf   : > { %s7559_s10 = smov (!%p323_p3, %s3949_s10), 1  ;;  %4430 = vset.pattern.permute.xlu0 %v7312_v40  ;;  %768 = vmatprep.mubr.bf16.mxu1 %v7312_v40  ;;  %v437_v47 = vld [vmem:[%s7304_s2 + $0x10] sm:$0xff]  ;;  %v438_v48 = vld [vmem:[%s7304_s2 + $0x18] sm:$0xff] }
  0x10   : > { %s4086_s11 = sshll.u32 %s7559_s10, 6 }
  0x11   : > { %s4887_s14 = scalar_lea.vmem %s7302_s0, %s4086_s11  ;;  %s7281_s19 = scalar_lea.vmem %s7311_s9, %s4086_s11 }
  0x12   : > { %v334_v0 = vld [vmem:[%s4887_s14] sm:$0xff]  ;;  %v335_v1 = vld [vmem:[%s4887_s14 + $0x8] sm:$0xff]  ;;  %v336_v5 = vld [vmem:[%s4887_s14 + $0x10] sm:$0xff] }
  0x13   : > { %v338_v2 = vld [vmem:[%s4887_s14 + $0x20] sm:$0xff]  ;;  %v342_v3 = vadd.f32 %v335_v1, %v334_v0  ;;  %v339_v4 = vld [vmem:[%s4887_s14 + $0x28] sm:$0xff]  ;;  %v337_v6 = vld [vmem:[%s4887_s14 + $0x18] sm:$0xff] }
  0x14   : > { %v348_v7 = vadd.f32 %v339_v4, %v338_v2  ;;  %v340_v8 = vld [vmem:[%s4887_s14 + $0x30] sm:$0xff]  ;;  %v341_v9 = vld [vmem:[%s4887_s14 + $0x38] sm:$0xff]  ;;  %v345_v10 = vadd.f32 %v337_v6, %v336_v5 }
  0x15   : > { %343 = vadd.xlane.f32.xlu0 %v342_v3  ;;  %v351_v11 = vadd.f32 %v341_v9, %v340_v8 }
  0x16   : > { %349 = vadd.xlane.f32.xlu1 %v348_v7 }
  0x19   : > { %346 = vadd.xlane.f32.xlu0 %v345_v10 }
  0x1a   : > { %352 = vadd.xlane.f32.xlu1 %v351_v11 }
  0xa2   : > { %v344_v12 = vpop.xlane.xlu0 %343 }
  0xa3   : > { %v355_v13 = vmul.f32 0.00390625, %v344_v12  ;;  %v350_v14 = vpop.xlane.xlu1 %349 }
  0xa4   : > { %v357_v15 = vmul.f32 0.00390625, %v350_v14  ;;  %v4433_v14 = vld [vmem:[%s7303_s1 + $0x8] sm:$0xff]  }
  0xa5   : > { %v4897_v16 = vsub.f32 %v334_v0, %v355_v13  ;;  %v4899_v17 = vsub.f32 %v335_v1, %v355_v13  ;;  %v4432_v13 = vld [vmem:[%s7303_s1] sm:$0xff]  }
  0xa6   : > { %v4901_v18 = vsub.f32 %v338_v2, %v357_v15  ;;  %v4903_v19 = vsub.f32 %v339_v4, %v357_v15  ;;  %v347_v20 = vpop.xlane.xlu0 %346  ;;  %v4434_v15 = vld [vmem:[%s7303_s1 + $0x10] sm:$0xff]  }
  0xa7   : > { %v356_v21 = vmul.f32 0.00390625, %v347_v20  ;;  %v353_v22 = vpop.xlane.xlu1 %352  ;;  %v367_v23 = vmul.f32 %v4897_v16, %v4897_v16  ;;  %v368_v24 = vmul.f32 %v4899_v17, %v4899_v17  ;;  %v4439_v20 = vld [vmem:[%s7303_s1 + $0x38] sm:$0xff]  }
  0xa8   : > { %v358_v25 = vmul.f32 0.00390625, %v353_v22  ;;  %v371_v26 = vmul.f32 %v4901_v18, %v4901_v18  ;;  %v372_v27 = vmul.f32 %v4903_v19, %v4903_v19  ;;  %v4441_v22 = vld [vmem:[%s7303_s1 + $0x48] sm:$0xff]  }
  0xa9   : > { %v361_v28 = vsub.f32 %v336_v5, %v356_v21  ;;  %v362_v29 = vsub.f32 %v337_v6, %v356_v21  ;;  %v375_v30 = vadd.f32 %v368_v24, %v367_v23  ;;  %v4440_v21 = vld [vmem:[%s7303_s1 + $0x40] sm:$0xff]  }
  0xaa   : > { %v4913_v31 = vsub.f32 %v340_v8, %v358_v25  ;;  %v366_v32 = vsub.f32 %v341_v9, %v358_v25  ;;  %v381_v33 = vadd.f32 %v372_v27, %v371_v26 }
  0xab   : > { %376 = vadd.xlane.f32.xlu0 %v375_v30  ;;  %v369_v34 = vmul.f32 %v361_v28, %v361_v28  ;;  %v370_v35 = vmul.f32 %v362_v29, %v362_v29 }
  0xac   : > { %v373_v36 = vmul.f32 %v4913_v31, %v4913_v31  ;;  %v374_v37 = vmul.f32 %v366_v32, %v366_v32 }
  0xad   : > { %v378_v38 = vadd.f32 %v370_v35, %v369_v34 }
  0xae   : > { %v384_v39 = vadd.f32 %v374_v37, %v373_v36 }
  0xaf   : > { %382 = vadd.xlane.f32.xlu0 %v381_v33  ;;  %379 = vadd.xlane.f32.xlu1 %v378_v38 }
  0xb3   : > { %385 = vadd.xlane.f32.xlu1 %v384_v39 }
  0xc4   : > { %506 = vperm.xlu1 %4431, %v444_v41  }
  0xc5   : > { %501 = vperm.xlu0 %4430, %v443_v43  }
  0xc8   : > { %511 = vperm.xlu1 %4431, %v445_v42  }
  0xcc   : > { %516 = vperm.xlu1 %4431, %v446_v44  }
  0xd0   : > { %461 = vperm.xlu1 %4431, %v435_v45  }
  0xd4   : > { %466 = vperm.xlu1 %4431, %v436_v46  }
  0xd8   : > { %471 = vperm.xlu1 %4431, %v437_v47  }
  0xdc   : > { %476 = vperm.xlu1 %4431, %v438_v48  }
 0x138   : > { %v377_v49 = vpop.xlane.xlu0 %376 }
 0x139   : > { %v387_v50 = vmul.f32 0.00390625, %v377_v49 }
 0x13b   : > { %v391_v51 = vadd.f32 1e-05, %v387_v50 }
 0x13c   : > { %v380_v52 = vpop.xlane.xlu1 %379  ;;  %v383_v53 = vpop.xlane.xlu0 %382 }
 0x13d   : > { %v388_v54 = vmul.f32 0.00390625, %v380_v52  ;;  %v389_v55 = vmul.f32 0.00390625, %v383_v53  ;;  %4464 = vrsqrt.f32 %v391_v51 }
 0x13f   : > { %v392_v56 = vadd.f32 1e-05, %v388_v54  ;;  %v393_v57 = vadd.f32 1e-05, %v389_v55 }
 0x140   : > { %v386_v58 = vpop.xlane.xlu1 %385 }
 0x141   : > { %4466 = vrsqrt.f32 %v392_v56  ;;  %v390_v59 = vmul.f32 0.00390625, %v386_v58 }
 0x142   : > { %4468 = vrsqrt.f32 %v393_v57 }
 0x143   : > { %v394_v60 = vadd.f32 1e-05, %v390_v59  ;;  %v4442_v59 = vld [vmem:[%s7303_s1 + $0x50] sm:$0xff]  }
 0x144   : > { %v507_v23 = vpop.permute.xlu1 %506 }
 0x145   : > { %4470 = vrsqrt.f32 %v394_v60  ;;  %v502_v60 = vpop.permute.xlu0 %501 }
 0x147   : > { %v4465_v61 = vpop.eup %4464 }
 0x148   : > { %v400_v0 = vmul.f32 %v4465_v61, %v4899_v17  ;;  %v399_v2 = vmul.f32 %v4465_v61, %v4897_v16  ;;  %v4435_v16 = vld [vmem:[%s7303_s1 + $0x18] sm:$0xff]   ;;  %v4436_v17 = vld [vmem:[%s7303_s1 + $0x20] sm:$0xff]   ;;  %v512_v24 = vpop.permute.xlu1 %511 }
 0x14b   : > { %v4467_v62 = vpop.eup %4466 }
 0x14c   : > { %v4469_v63 = vpop.eup %4468  ;;  %v402_v1 = vmul.f32 %v4467_v62, %v362_v29  ;;  %v401_v3 = vmul.f32 %v4467_v62, %v361_v28  ;;  %v4999_v25 = vpop.permute.xlu1 %516 }
 0x14d   : > { %v404_v7 = vmul.f32 %v4469_v63, %v4903_v19  ;;  %v403_v9 = vmul.f32 %v4469_v63, %v4901_v18  ;;  %v4437_v18 = vld [vmem:[%s7303_s1 + $0x28] sm:$0xff]   ;;  %v4438_v19 = vld [vmem:[%s7303_s1 + $0x30] sm:$0xff]  }
 0x14e   : > { %v408_v4 = vpack.c.bf16 %v402_v1, %v400_v0  ;;  %v407_v5 = vpack.c.bf16 %v401_v3, %v399_v2 }
 0x14f   : > { %v4471_v6 = vpop.eup %4470 }
 0x150   : > { %676 = vmatprep.subr.bf16.mxu0 %v408_v4  ;;  %4416 = vmatprep.subr.bf16.mxu1 %v408_v4  ;;  %v406_v8 = vmul.f32 %v4471_v6, %v366_v32  ;;  %v405_v10 = vmul.f32 %v4471_v6, %v4913_v31  ;;  %v462_v26 = vpop.permute.xlu1 %461  ;;  %v4443_v6 = vld [vmem:[%s7303_s1 + $0x58] sm:$0xff]  }
 0x151   : > { %677 = vmatpush1.bf16.msra.mxu0 %v407_v5  ;;  %4418 = vmatpush1.bf16.msra.mxu1 %v407_v5 }
 0x152   : > { %v410_v11 = vpack.c.bf16 %v406_v8, %v404_v7  ;;  %v409_v12 = vpack.c.bf16 %v405_v10, %v403_v9 }
 0x154   : > { %678 = vmatprep.subr.bf16.mxu0 %v410_v11  ;;  %4417 = vmatprep.subr.bf16.mxu1 %v410_v11  ;;  %v467_v27 = vpop.permute.xlu1 %466 }
 0x155   : > { %679 = vmatpush1.bf16.msra.mxu0 %v409_v12  ;;  %4419 = vmatpush1.bf16.msra.mxu1 %v409_v12 }
 0x158   : > { %3970 = vmatmul.mubr.msk.bf16.vlgmr.msra.gmra.mrb[0].mxu0 %vm639_vm0, %v4432_v13  ;;  %3976 = vmatmul.mubr.msk.bf16.vlgmr.msra.gmra.mrb[0].mxu1 %vm639_vm0, %v4438_v19  ;;  %v472_v31 = vpop.permute.xlu1 %471 }
 0x159   : > { %718 = vmatprep.mubr.bf16.mxu0 %v7312_v40  ;;  %778 = vmatprep.mubr.bf16.mxu1 %v7312_v40 }
 0x15c   : > { %v477_v41 = vpop.permute.xlu1 %476 }
 0x160   : > { %3971 = vmatmul.mubr.msk.bf16.gmra.mrb[4].mxu0 %vm639_vm0, %v4433_v14  ;;  %3977 = vmatmul.mubr.msk.bf16.gmra.mrb[4].mxu1 %vm639_vm0, %v4439_v20 }
 0x161   : > { %728 = vmatprep.mubr.bf16.mxu0 %v7312_v40  ;;  %788 = vmatprep.mubr.bf16.mxu1 %v7312_v40 }
 0x168   : > { %3972 = vmatmul.mubr.msk.bf16.gmra.mrb[8].mxu0 %vm639_vm0, %v4434_v15  ;;  %3978 = vmatmul.mubr.msk.bf16.gmra.mrb[8].mxu1 %vm639_vm0, %v4440_v21 }
 0x169   : > { %738 = vmatprep.mubr.bf16.mxu0 %v7312_v40  ;;  %798 = vmatprep.mubr.bf16.mxu1 %v7312_v40 }
 0x170   : > { %3973 = vmatmul.mubr.msk.bf16.gmra.mrb[12].mxu0 %vm639_vm0, %v4435_v16  ;;  %3979 = vmatmul.mubr.msk.bf16.gmra.mrb[12].mxu1 %vm639_vm0, %v4441_v22 }
 0x171   : > { %748 = vmatprep.mubr.bf16.mxu0 %v7312_v40  ;;  %808 = vmatprep.mubr.bf16.mxu1 %v7312_v40 }
 0x178   : > { %3974 = vmatmul.mubr.msk.bf16.gmra.mrb[16].mxu0 %vm639_vm0, %v4436_v17  ;;  %3980 = vmatmul.mubr.msk.bf16.gmra.mrb[16].mxu1 %vm639_vm0, %v4442_v59 }
 0x179   : > { %758 = vmatprep.mubr.bf16.mxu0 %v7312_v40  ;;  %818 = vmatprep.mubr.bf16.mxu1 %v7312_v40 }
 0x180   : > { %3975 = vmatmul.mubr.msk.bf16.gmra.mrb[20].mxu0 %vm639_vm0, %v4437_v18  ;;  %3981 = vmatmul.mubr.msk.bf16.gmra.mrb[20].mxu1 %vm639_vm0, %v4443_v6 }
 0x22b   : > { %v710_v28 = vpop.f32.mrb[0].mxu0  ;;  %v5032_v14 = vpop.f32.mrb[0].mxu1 }
 0x22c   : > { %v712_v29 = vpop.f32.mrb[1].mxu0  ;;  %v711_v32 = vadd.f32 %v710_v28, %v462_v26  ;;  %v5034_v15 = vpop.f32.mrb[1].mxu1 }
 0x22d   : > { %v714_v30 = vpop.f32.mrb[2].mxu0  ;;  %v713_v35 = vadd.f32 %v712_v29, %v462_v26  ;;  %v5036_v16 = vpop.f32.mrb[2].mxu1 }
 0x22e   : > { %v715_v33 = vadd.f32 %v714_v30, %v467_v27  ;;  %v716_v34 = vpop.f32.mrb[3].mxu0  ;;  %v5038_v17 = vpop.f32.mrb[3].mxu1  ;;  %v447_v30 = vld [vmem:[%s7304_s2 + $0x60] sm:$0xff] }
 0x22f   : > { %v717_v36 = vadd.f32 %v716_v34, %v467_v27  ;;  %v453_v27 = vld [vmem:[%s7304_s2 + $0x90] sm:$0xff]  ;;  %v439_v34 = vld [vmem:[%s7304_s2 + $0x20] sm:$0xff] }
 0x230   : > { %v829_v37 = vpack.c.bf16 %v715_v33, %v711_v32  ;;  %v449_v32 = vld [vmem:[%s7304_s2 + $0x70] sm:$0xff]  ;;  %v454_v33 = vld [vmem:[%s7304_s2 + $0x98] sm:$0xff] }
 0x231   : > { %v5001_v38 = vpack.c.bf16 %v717_v36, %v713_v35 }
 0x232   : > { %4272 = vmatprep.subr.bf16.mxu1 %v829_v37 }
 0x233   : > { %v720_v39 = vpop.f32.mrb[4].mxu0  ;;  %4273 = vmatpush3.bf16.msra.mxu1 %v829_v37  ;;  %v5040_v18 = vpop.f32.mrb[4].mxu1  ;;  %v448_v37 = vld [vmem:[%s7304_s2 + $0x68] sm:$0xff] }
 0x234   : > { %v722_v42 = vpop.f32.mrb[5].mxu0  ;;  %v721_v44 = vadd.f32 %v720_v39, %v472_v31  ;;  %v5042_v19 = vpop.f32.mrb[5].mxu1  ;;  %v441_v39 = vld [vmem:[%s7304_s2 + $0x30] sm:$0xff] }
 0x235   : > { %v724_v43 = vpop.f32.mrb[6].mxu0  ;;  %v723_v47 = vadd.f32 %v722_v42, %v472_v31  ;;  %v5044_v20 = vpop.f32.mrb[6].mxu1  ;;  %v451_v31 = vld [vmem:[%s7304_s2 + $0x80] sm:$0xff]  ;;  %v440_v42 = vld [vmem:[%s7304_s2 + $0x28] sm:$0xff] }
 0x236   : > { %v725_v45 = vadd.f32 %v724_v43, %v477_v41  ;;  %v726_v46 = vpop.f32.mrb[7].mxu0  ;;  %v5046_v21 = vpop.f32.mrb[7].mxu1  ;;  %v442_v43 = vld [vmem:[%s7304_s2 + $0x38] sm:$0xff] }
 0x237   : > { %v727_v48 = vadd.f32 %v726_v46, %v477_v41  ;;  %v450_v41 = vld [vmem:[%s7304_s2 + $0x78] sm:$0xff] }
 0x238   : > { %v831_v49 = vpack.c.bf16 %v725_v45, %v721_v44 }
 0x239   : > { %v5003_v50 = vpack.c.bf16 %v727_v48, %v723_v47 }
 0x23a   : > { %4274 = vmatprep.subr.bf16.mxu1 %v831_v49 }
 0x23b   : > { %v5005_v51 = vpop.f32.mrb[8].mxu0  ;;  %4275 = vmatpush3.bf16.msra.mxu1 %v831_v49  ;;  %v5048_v22 = vpop.f32.mrb[8].mxu1 }
 0x23c   : > { %v5007_v52 = vpop.f32.mrb[9].mxu0 }
 0x23d   : > { %v5009_v53 = vpop.f32.mrb[10].mxu0 }
 0x23e   : > { %v5011_v54 = vpop.f32.mrb[11].mxu0 }
 0x243   : > { %v5013_v55 = vpop.f32.mrb[12].mxu0 }
 0x244   : > { %v5015_v56 = vpop.f32.mrb[13].mxu0 }
 0x245   : > { %v5017_v57 = vpop.f32.mrb[14].mxu0 }
 0x246   : > { %v5019_v58 = vpop.f32.mrb[15].mxu0 }
 0x24b   : > { %v750_v61 = vpop.f32.mrb[16].mxu0 }
 0x24c   : > { %v751_v62 = vadd.f32 %v750_v61, %v502_v60  ;;  %v752_v63 = vpop.f32.mrb[17].mxu0 }
 0x24d   : > { %v753_v0 = vadd.f32 %v752_v63, %v502_v60  ;;  %v754_v1 = vpop.f32.mrb[18].mxu0 }
 0x24e   : > { %v756_v2 = vpop.f32.mrb[19].mxu0  ;;  %837 = vxpose.xlu1.b32.start [1/4] (short) %v751_v62, 128  ;;  %v755_v3 = vadd.f32 %v754_v1, %v507_v23 }
 0x24f   : > { %869 = vxpose.xlu0.b32.start [1/4] (short) %v753_v0, 128  ;;  %v757_v4 = vadd.f32 %v756_v2, %v507_v23  ;;  %v5050_v23 = vpop.f32.mrb[9].mxu1 }
 0x252   : > { %838 = vxpose.xlu1.b32.cont [2/4] (short) %v755_v3, 128 }
 0x253   : > { %v760_v5 = vpop.f32.mrb[20].mxu0  ;;  %870 = vxpose.xlu0.b32.cont [2/4] (short) %v757_v4, 128 }
 0x254   : > { %v761_v7 = vadd.f32 %v760_v5, %v512_v24  ;;  %v762_v8 = vpop.f32.mrb[21].mxu0 }
 0x255   : > { %v763_v9 = vadd.f32 %v762_v8, %v512_v24  ;;  %v764_v10 = vpop.f32.mrb[22].mxu0  ;;  %v452_v24 = vld [vmem:[%s7304_s2 + $0x88] sm:$0xff] }
 0x256   : > { %v766_v11 = vpop.f32.mrb[23].mxu0  ;;  %839 = vxpose.xlu1.b32.cont [3/4] (short) %v761_v7, 128  ;;  %v765_v12 = vadd.f32 %v764_v10, %v4999_v25 }
 0x257   : > { %871 = vxpose.xlu0.b32.cont [3/4] (short) %v763_v9, 128  ;;  %v767_v13 = vadd.f32 %v766_v11, %v4999_v25  ;;  %v5055_v25 = vpop.f32.mrb[10].mxu1 }
 0x258   : > { %v5057_v26 = vpop.f32.mrb[11].mxu1 }
 0x259   : > { %v5062_v28 = vpop.f32.mrb[12].mxu1 }
 0x25a   : > { %840 = vxpose.xlu1.b32.end [4/4] (short) %v765_v12, 128  ;;  %v5064_v29 = vpop.f32.mrb[13].mxu1 }
 0x25b   : > { %872 = vxpose.xlu0.b32.end [4/4] (short) %v767_v13, 128  ;;  %v5081_v35 = vpop.f32.mrb[14].mxu1 }
 0x25c   : > { %v5083_v36 = vpop.f32.mrb[15].mxu1 }
 0x2a8   : > { %546 = vperm.xlu1 %4431, %v452_v24  }
 0x2ac   : > { %551 = vperm.xlu1 %4431, %v453_v27  }
 0x2b0   : > { %521 = vperm.xlu1 %4431, %v447_v30  }
 0x2b4   : > { %541 = vperm.xlu0 %4430, %v451_v31   ;;  %531 = vperm.xlu1 %4431, %v449_v32  }
 0x2b8   : > { %556 = vperm.xlu0 %4430, %v454_v33   ;;  %481 = vperm.xlu1 %4431, %v439_v34  }
 0x2bc   : > { %526 = vperm.xlu0 %4430, %v448_v37   ;;  %491 = vperm.xlu1 %4431, %v441_v39  }
 0x2c0   : > { %536 = vperm.xlu0 %4430, %v450_v41  }
 0x2c4   : > { %486 = vperm.xlu0 %4430, %v440_v42  }
 0x2c8   : > { %496 = vperm.xlu0 %4430, %v442_v43  }
 0x2ce   : > { %v853_v44 = vpop.trf.xlu1 }
 0x2cf   : > { %v885_v45 = vpop.trf.xlu0 }
 0x2d2   : > { %v854_v46 = vpop.trf.xlu1 }
 0x2d3   : > { %v5100_v47 = vpack.c.bf16 %v854_v46, %v853_v44  ;;  %v886_v48 = vpop.trf.xlu0 }
 0x2d4   : > { %v5130_v42 = vpack.c.bf16 %v886_v48, %v885_v45 }
 0x2d5   : > { %4276 = vmatprep.mubr.msk.bf16.mxu1 %vm639_vm0, %v5100_v47 }
 0x2d6   : > { %v855_v49 = vpop.trf.xlu1  ;;  %7377 = vst [vmem:[#allocation8_spill] sm:$0xff] %v5130_v42 }
 0x2d7   : > { %v887_v60 = vpop.trf.xlu0 }
 0x2da   : > { %v856_v59 = vpop.trf.xlu1 }
 0x2db   : > { %v5104_v61 = vpack.c.bf16 %v856_v59, %v855_v49  ;;  %v888_v63 = vpop.trf.xlu0 }
 0x2dc   : > { %v5136_v44 = vpack.c.bf16 %v888_v63, %v887_v60 }
 0x2dd   : > { %4277 = vmatmul.mubr.msk.bf16.vlgmr.msra.gmra.mrb[24].mxu1 %vm639_vm0, %v5104_v61 }
 0x2de   : > { %v857_v62 = vpop.trf.xlu1  ;;  %7378 = vst [vmem:[#allocation9_spill] sm:$0xff] %v5136_v44 }
 0x2df   : > { %v889_v3 = vpop.trf.xlu0 }
 0x2e2   : > { %v858_v0 = vpop.trf.xlu1 }
 0x2e3   : > { %v5108_v1 = vpack.c.bf16 %v858_v0, %v857_v62  ;;  %v890_v6 = vpop.trf.xlu0 }
 0x2e4   : > { %v5138_v46 = vpack.c.bf16 %v890_v6, %v889_v3 }
 0x2e5   : > { %7371 = vst [vmem:[#allocation2_spill] sm:$0xff] %v5108_v1  ;;  %4280 = vmatprep.mubr.msk.bf16.mxu1 %vm639_vm0, %v5108_v1 }
 0x2e6   : > { %v859_v2 = vpop.trf.xlu1  ;;  %7379 = vst [vmem:[#allocation10_spill] sm:$0xff] %v5138_v46 }
 0x2e7   : > { %v891_v9 = vpop.trf.xlu0 }
 0x2ea   : > { %v860_v4 = vpop.trf.xlu1 }
 0x2eb   : > { %v5112_v5 = vpack.c.bf16 %v860_v4, %v859_v2  ;;  %v892_v12 = vpop.trf.xlu0  ;;  %v5160_v2 = vpop.f32.mrb[16].mxu1 }
 0x2ec   : > { %v5144_v45 = vpack.c.bf16 %v892_v12, %v891_v9  ;;  %v5163_v6 = vpop.f32.mrb[17].mxu1 }
 0x2ed   : > { %7372 = vst [vmem:[#allocation3_spill] sm:$0xff] %v5112_v5  ;;  %4281 = vmatmul.mubr.msk.bf16.gmra.mrb[28].mxu1 %vm639_vm0, %v5112_v5 }
 0x2ee   : > { %v861_v7 = vpop.trf.xlu1  ;;  %7380 = vst [vmem:[#allocation11_spill] sm:$0xff] %v5144_v45 }
 0x2ef   : > { %v893_v30 = vpop.trf.xlu0 }
 0x2f2   : > { %v862_v8 = vpop.trf.xlu1 }
 0x2f3   : > { %v5116_v10 = vpack.c.bf16 %v862_v8, %v861_v7  ;;  %v894_v33 = vpop.trf.xlu0  ;;  %v5165_v7 = vpop.f32.mrb[18].mxu1 }
 0x2f4   : > { %v5146_v48 = vpack.c.bf16 %v894_v33, %v893_v30  ;;  %v5167_v8 = vpop.f32.mrb[19].mxu1 }
 0x2f5   : > { %7373 = vst [vmem:[#allocation4_spill] sm:$0xff] %v5116_v10  ;;  %4284 = vmatprep.mubr.msk.bf16.mxu1 %vm639_vm0, %v5116_v10  ;;  %v5171_v12 = vpop.f32.mrb[20].mxu1 }
 0x2f6   : > { %v863_v11 = vpop.trf.xlu1  ;;  %7381 = vst [vmem:[#allocation12_spill] sm:$0xff] %v5146_v48  ;;  %v5175_v30 = vpop.f32.mrb[21].mxu1 }
 0x2f7   : > { %v895_v39 = vpop.trf.xlu0 }
 0x2fa   : > { %v864_v13 = vpop.trf.xlu1 }
 0x2fb   : > { %v5120_v24 = vpack.c.bf16 %v864_v13, %v863_v11  ;;  %v896_v43 = vpop.trf.xlu0 }
 0x2fc   : > { %v5152_v62 = vpack.c.bf16 %v896_v43, %v895_v39 }
 0x2fd   : > { %7374 = vst [vmem:[#allocation5_spill] sm:$0xff] %v5120_v24  ;;  %4285 = vmatmul.mubr.msk.bf16.gmra.mrb[32].mxu1 %vm639_vm0, %v5120_v24 }
 0x2fe   : > { %v865_v27 = vpop.trf.xlu1  ;;  %7382 = vst [vmem:[#allocation13_spill] sm:$0xff] %v5152_v62 }
 0x2ff   : > { %v897_v49 = vpop.trf.xlu0 }
 0x302   : > { %v866_v31 = vpop.trf.xlu1 }
 0x303   : > { %v5124_v32 = vpack.c.bf16 %v866_v31, %v865_v27  ;;  %v898_v59 = vpop.trf.xlu0 }
 0x304   : > { %v5154_v63 = vpack.c.bf16 %v898_v59, %v897_v49 }
 0x305   : > { %7375 = vst [vmem:[#allocation6_spill] sm:$0xff] %v5124_v32  ;;  %4288 = vmatprep.mubr.msk.bf16.mxu1 %vm639_vm0, %v5124_v32 }
 0x306   : > { %v867_v34 = vpop.trf.xlu1  ;;  %7383 = vst [vmem:[#allocation14_spill] sm:$0xff] %v5154_v63 }
 0x307   : > { %v899_v60 = vpop.trf.xlu0 }
 0x30a   : > { %v868_v37 = vpop.trf.xlu1 }
 0x30b   : > { %v5128_v41 = vpack.c.bf16 %v868_v37, %v867_v34  ;;  %v900_v3 = vpop.trf.xlu0 }
 0x30c   : > { %v5169_v9 = vpack.c.bf16 %v900_v3, %v899_v60 }
 0x30d   : > { %7376 = vst [vmem:[#allocation7_spill] sm:$0xff] %v5128_v41  ;;  %4289 = vmatmul.mubr.msk.bf16.gmra.mrb[36].mxu1 %vm639_vm0, %v5128_v41 }
 0x30e   : > { %4292 = vmatprep.mubr.msk.bf16.mxu1 %vm639_vm0, %v5130_v42  ;;  %7384 = vst [vmem:[#allocation15_spill] sm:$0xff] %v5169_v9 }
 0x315   : > { %4293 = vmatmul.mubr.msk.bf16.gmra.mrb[40].mxu1 %vm639_vm0, %v5136_v44 }
 0x316   : > { %4296 = vmatprep.mubr.msk.bf16.mxu1 %vm639_vm0, %v5138_v46 }
 0x31d   : > { %4297 = vmatmul.mubr.msk.bf16.gmra.mrb[44].mxu1 %vm639_vm0, %v5144_v45 }
 0x31e   : > { %4300 = vmatprep.mubr.msk.bf16.mxu1 %vm639_vm0, %v5146_v48 }
 0x325   : > { %4301 = vmatmul.mubr.msk.bf16.gmra.mrb[48].mxu1 %vm639_vm0, %v5152_v62 }
 0x326   : > { %4304 = vmatprep.mubr.msk.bf16.mxu1 %vm639_vm0, %v5154_v63 }
 0x327   : > { %v547_v0 = vpop.permute.xlu1 %546 }
 0x328   : > { %v795_v4 = vadd.f32 %v5055_v25, %v547_v0  ;;  %v5179_v25 = vpop.f32.mrb[22].mxu1 }
 0x329   : > { %v5181_v31 = vpop.f32.mrb[23].mxu1 }
 0x32b   : > { %v552_v11 = vpop.permute.xlu1 %551 }
 0x32c   : > { %v801_v13 = vadd.f32 %v5062_v28, %v552_v11  ;;  %v803_v27 = vadd.f32 %v5064_v29, %v552_v11  ;;  %v797_v29 = vadd.f32 %v5057_v26, %v547_v0 }
 0x32d   : > { %4305 = vmatmul.mubr.msk.bf16.gmra.mrb[52].mxu1 %vm639_vm0, %v5169_v9 }
 0x32f   : > { %v522_v33 = vpop.permute.xlu1 %521 }
 0x330   : > { %v771_v34 = vadd.f32 %v5032_v14, %v522_v33  ;;  %v773_v37 = vadd.f32 %v5034_v15, %v522_v33 }
 0x332   : > { %1809 = vxpose.xlu0.b32.start [1/4] (short) %v773_v37, 128  ;;  %1777 = vxpose.xlu1.b32.start [1/4] (short) %v771_v34, 128 }
 0x333   : > { %v542_v39 = vpop.permute.xlu0 %541  ;;  %v532_v28 = vpop.permute.xlu1 %531 }
 0x334   : > { %v791_v43 = vadd.f32 %v5048_v22, %v542_v39  ;;  %v793_v49 = vadd.f32 %v5050_v23, %v542_v39 }
 0x336   : > { %v5188_v59 = vpack.c.bf16 %v795_v4, %v791_v43  ;;  %v834_v60 = vpack.c.bf16 %v797_v29, %v793_v49  ;;  %v457_v29 = vld [vmem:[%s7304_s2 + $0xb0] sm:$0xff]  ;;  %v2952_v43 = vld [vmem:[%s7308_s6 + $0x80] sm:$0xff]  ;;  %v2800_v49 = vld [vmem:[%s7306_s4 + $0x8] sm:$0xff] }
 0x337   : > { %v557_v3 = vpop.permute.xlu0 %556  ;;  %v482_v11 = vpop.permute.xlu1 %481 }
 0x338   : > { %v805_v40 = vadd.f32 %v5081_v35, %v557_v3  ;;  %v807_v14 = vadd.f32 %v5083_v36, %v557_v3  ;;  %v731_v15 = vadd.f32 %v5005_v51, %v482_v11  ;;  %v733_v33 = vadd.f32 %v5007_v52, %v482_v11  ;;  %1344 = vmatprep.mubr.bf16.mxu1 %v834_v60  ;;  %v2802_v3 = vld [vmem:[%s7306_s4 + $0x18] sm:$0xff]  ;;  %v2956_v11 = vld [vmem:[%s7308_s6 + $0xa0] sm:$0xff] }
 0x339   : > { %1746 = vmatprep.mubr.bf16.mxu0 %v834_v60  ;;  %v781_v36 = vadd.f32 %v5040_v18, %v532_v28  ;;  %v783_v51 = vadd.f32 %v5042_v19, %v532_v28  ;;  %v2954_v60 = vld [vmem:[%s7308_s6 + $0x90] sm:$0xff] }
 0x33a   : > { %v5194_v26 = vpack.c.bf16 %v805_v40, %v801_v13  ;;  %v5196_v22 = vpack.c.bf16 %v807_v14, %v803_v27  ;;  %v2953_v14 = vld [vmem:[%s7308_s6 + $0x88] sm:$0xff] }
 0x33b   : > { %v527_v23 = vpop.permute.xlu0 %526  ;;  %v492_v34 = vpop.permute.xlu1 %491 }
 0x33c   : > { %v775_v0 = vadd.f32 %v5036_v16, %v527_v23  ;;  %v777_v4 = vadd.f32 %v5038_v17, %v527_v23  ;;  %v741_v19 = vadd.f32 %v5013_v55, %v492_v34  ;;  %v743_v39 = vadd.f32 %v5015_v56, %v492_v34  ;;  %v2799_v55 = vld [vmem:[%s7306_s4] sm:$0xff]  ;;  %v2955_v23 = vld [vmem:[%s7308_s6 + $0x98] sm:$0xff]  ;;  %v2961_v34 = vld [vmem:[%s7308_s6 + $0xc8] sm:$0xff] }
 0x33d   : > { %v455_v56 = vld [vmem:[%s7304_s2 + $0xa0] sm:$0xff] }
 0x33e   : > { %1810 = vxpose.xlu0.b32.cont [2/4] (short) %v777_v4, 128  ;;  %1778 = vxpose.xlu1.b32.cont [2/4] (short) %v775_v0, 128  ;;  %v2960_v4 = vld [vmem:[%s7308_s6 + $0xc0] sm:$0xff] }
 0x33f   : > { %v537_v35 = vpop.permute.xlu0 %536 }
 0x340   : > { %v785_v40 = vadd.f32 %v5044_v20, %v537_v35  ;;  %v787_v13 = vadd.f32 %v5046_v21, %v537_v35 }
 0x342   : > { %1811 = vxpose.xlu0.b32.cont [3/4] (short) %v783_v51, 128  ;;  %1779 = vxpose.xlu1.b32.cont [3/4] (short) %v781_v36, 128  ;;  %v2957_v51 = vld [vmem:[%s7308_s6 + $0xa8] sm:$0xff] }
 0x343   : > { %v487_v52 = vpop.permute.xlu0 %486 }
 0x344   : > { %v735_v27 = vadd.f32 %v5009_v53, %v487_v52  ;;  %v737_v16 = vadd.f32 %v5011_v54, %v487_v52  ;;  %v456_v54 = vld [vmem:[%s7304_s2 + $0xa8] sm:$0xff]  ;;  %v2962_v52 = vld [vmem:[%s7308_s6 + $0xd0] sm:$0xff] }
 0x346   : > { %v5206_v17 = vpack.c.bf16 %v735_v27, %v731_v15  ;;  %v5208_v37 = vpack.c.bf16 %v737_v16, %v733_v33  ;;  %1812 = vxpose.xlu0.b32.end [4/4] (short) %v787_v13, 128  ;;  %1780 = vxpose.xlu1.b32.end [4/4] (short) %v785_v40, 128  ;;  %v2958_v15 = vld [vmem:[%s7308_s6 + $0xb0] sm:$0xff]  ;;  %v2959_v40 = vld [vmem:[%s7308_s6 + $0xb8] sm:$0xff]  ;;  %v2964_v13 = vld [vmem:[%s7308_s6 + $0xe0] sm:$0xff] }
 0x347   : > { %v497_v18 = vpop.permute.xlu0 %496 }
 0x348   : > { %7385 = vst [vmem:[#allocation16_spill] sm:$0xff] %v5206_v17  ;;  %7386 = vst [vmem:[#allocation17_spill] sm:$0xff] %v5208_v37  ;;  %v745_v20 = vadd.f32 %v5017_v57, %v497_v18  ;;  %v747_v21 = vadd.f32 %v5019_v58, %v497_v18  ;;  %v2801_v57 = vld [vmem:[%s7306_s4 + $0x10] sm:$0xff]  ;;  %v458_v58 = vld [vmem:[%s7304_s2 + $0xb8] sm:$0xff] }
 0x349   : > { %v2936_v18 = vld [vmem:[%s7308_s6] sm:$0xff] }
 0x34a   : > { %v5214_v28 = vpack.c.bf16 %v745_v20, %v741_v19  ;;  %v5216_v53 = vpack.c.bf16 %v747_v21, %v743_v39 }
 0x34c   : > { %7387 = vst [vmem:[#allocation18_spill] sm:$0xff] %v5214_v28  ;;  %7388 = vst [vmem:[#allocation19_spill] sm:$0xff] %v5216_v53 }
 0x394   : > { %566 = vperm.xlu1 %4431, %v456_v54  }
 0x398   : > { %571 = vperm.xlu1 %4431, %v457_v29   ;;  %v2963_v29 = vld [vmem:[%s7308_s6 + $0xd8] sm:$0xff] }
 0x39c   : > { %2805 = vperm.xlu1 %4431, %v2799_v55  }
 0x39f   : > { %561 = vperm.xlu0 %4430, %v455_v56  }
 0x3a0   : > { %2815 = vperm.xlu1 %4431, %v2801_v57   ;;  %v2966_v57 = vld [vmem:[%s7308_s6 + $0xf0] sm:$0xff] }
 0x3a3   : > { %576 = vperm.xlu0 %4430, %v458_v58  }
 0x3a4   : > { %3050 = vperm.xlu1 %4431, %v2952_v43  }
 0x3a7   : > { %2810 = vperm.xlu0 %4430, %v2800_v49  }
 0x3a8   : > { %3060 = vperm.xlu1 %4431, %v2954_v60  }
 0x3ab   : > { %2820 = vperm.xlu0 %4430, %v2802_v3  }
 0x3ac   : > { %3070 = vperm.xlu1 %4431, %v2956_v11  }
 0x3af   : > { %3055 = vperm.xlu0 %4430, %v2953_v14  }
 0x3b0   : > { %v5257_v33 = vpop.f32.mrb[24].mxu1  ;;  %3080 = vperm.xlu1 %4431, %v2958_v15   ;;  %v2965_v15 = vld [vmem:[%s7308_s6 + $0xe8] sm:$0xff] }
 0x3b1   : > { %v5262_v0 = vpop.f32.mrb[25].mxu1 }
 0x3b2   : > { %v5267_v35 = vpop.f32.mrb[26].mxu1 }
 0x3b3   : > { %v5269_v36 = vpop.f32.mrb[27].mxu1  ;;  %3065 = vperm.xlu0 %4430, %v2955_v23   ;;  %v2938_v23 = vld [vmem:[%s7308_s6 + $0x10] sm:$0xff] }
 0x3b4   : > { %3090 = vperm.xlu1 %4431, %v2960_v4  }
 0x3b7   : > { %3075 = vperm.xlu0 %4430, %v2957_v51  }
 0x3b8   : > { %3100 = vperm.xlu1 %4431, %v2962_v52  }
 0x3ba   : > { %v1793_v27 = vpop.trf.xlu1  ;;  %v1825_v16 = vpop.trf.xlu0 }
 0x3bb   : > { %3085 = vperm.xlu0 %4430, %v2959_v40   ;;  %v2937_v40 = vld [vmem:[%s7308_s6 + $0x8] sm:$0xff] }
 0x3bc   : > { %3110 = vperm.xlu1 %4431, %v2964_v13  }
 0x3be   : > { %v1794_v19 = vpop.trf.xlu1  ;;  %v1826_v39 = vpop.trf.xlu0 }
 0x3bf   : > { %3095 = vperm.xlu0 %4430, %v2961_v34   ;;  %v5289_v20 = vpack.c.bf16 %v1794_v19, %v1793_v27  ;;  %v5291_v21 = vpack.c.bf16 %v1826_v39, %v1825_v16  ;;  %v2940_v27 = vld [vmem:[%s7308_s6 + $0x20] sm:$0xff]  ;;  %v2942_v19 = vld [vmem:[%s7308_s6 + $0x30] sm:$0xff] }
 0x3c0   : > { %v5293_v54 = vpop.f32.mrb[28].mxu1  ;;  %2970 = vperm.xlu1 %4431, %v2936_v18   ;;  %v2967_v18 = vld [vmem:[%s7308_s6 + $0xf8] sm:$0xff] }
 0x3c1   : > { %7389 = vst [vmem:[#allocation20_spill] sm:$0xff] %v5289_v20  ;;  %7390 = vst [vmem:[#allocation21_spill] sm:$0xff] %v5291_v21  ;;  %v1128_v55 = vmax.f32 %v5257_v33, %v5293_v54  ;;  %v5300_v56 = vpop.f32.mrb[29].mxu1 }
 0x3c2   : > { %v1126_v58 = vmax.f32 %v5262_v0, %v5300_v56  ;;  %v5307_v43 = vpop.f32.mrb[30].mxu1  ;;  %v1795_v49 = vpop.trf.xlu1 }
 0x3c3   : > { %v1129_v60 = vmax.f32 %v5267_v35, %v5307_v43  ;;  %v5311_v3 = vpop.f32.mrb[31].mxu1  ;;  %3105 = vperm.xlu0 %4430, %v2963_v29   ;;  %v1827_v11 = vpop.trf.xlu0 }
 0x3c4   : > { %v1127_v14 = vmax.f32 %v5269_v36, %v5311_v3  ;;  %3120 = vperm.xlu1 %4431, %v2966_v57  }
 0x3c6   : > { %v1796_v4 = vpop.trf.xlu1 }
 0x3c7   : > { %3115 = vperm.xlu0 %4430, %v2965_v15   ;;  %v5321_v51 = vpack.c.bf16 %v1796_v4, %v1795_v49  ;;  %v1828_v52 = vpop.trf.xlu0 }
 0x3c8   : > { %2980 = vperm.xlu1 %4431, %v2938_v23   ;;  %v5326_v13 = vpack.c.bf16 %v1828_v52, %v1827_v11  ;;  %v2939_v11 = vld [vmem:[%s7308_s6 + $0x18] sm:$0xff]  ;;  %v2944_v52 = vld [vmem:[%s7308_s6 + $0x40] sm:$0xff] }
 0x3c9   : > { %7391 = vst [vmem:[#allocation22_spill] sm:$0xff] %v5321_v51 }
 0x3ca   : > { %7392 = vst [vmem:[#allocation23_spill] sm:$0xff] %v5326_v13  ;;  %v1797_v16 = vpop.trf.xlu1 }
 0x3cb   : > { %2975 = vperm.xlu0 %4430, %v2937_v40   ;;  %v1829_v34 = vpop.trf.xlu0 }
 0x3cc   : > { %2990 = vperm.xlu1 %4431, %v2940_v27  }
 0x3ce   : > { %v1798_v39 = vpop.trf.xlu1 }
 0x3cf   : > { %3125 = vperm.xlu0 %4430, %v2967_v18   ;;  %v5337_v29 = vpack.c.bf16 %v1798_v39, %v1797_v16  ;;  %v1830_v57 = vpop.trf.xlu0 }
 0x3d0   : > { %v5339_v49 = vpop.f32.mrb[32].mxu1  ;;  %3000 = vperm.xlu1 %4431, %v2942_v19   ;;  %v5344_v15 = vpack.c.bf16 %v1830_v57, %v1829_v34 }
 0x3d1   : > { %7393 = vst [vmem:[#allocation24_spill] sm:$0xff] %v5337_v29  ;;  %v1132_v23 = vmax.f32 %v1128_v55, %v5339_v49  ;;  %v5347_v4 = vpop.f32.mrb[33].mxu1  ;;  %v2941_v55 = vld [vmem:[%s7308_s6 + $0x28] sm:$0xff] }
 0x3d2   : > { %7394 = vst [vmem:[#allocation25_spill] sm:$0xff] %v5344_v15  ;;  %v1130_v40 = vmax.f32 %v1126_v58, %v5347_v4  ;;  %v5353_v27 = vpop.f32.mrb[34].mxu1  ;;  %v1799_v16 = vpop.trf.xlu1  ;;  %v2946_v58 = vld [vmem:[%s7308_s6 + $0x50] sm:$0xff] }
 0x3d3   : > { %v1133_v18 = vmax.f32 %v1129_v60, %v5353_v27  ;;  %v5356_v19 = vpop.f32.mrb[35].mxu1  ;;  %2985 = vperm.xlu0 %4430, %v2939_v11   ;;  %v1831_v34 = vpop.trf.xlu0  ;;  %v2943_v11 = vld [vmem:[%s7308_s6 + $0x38] sm:$0xff] }
 0x3d4   : > { %v1131_v39 = vmax.f32 %v1127_v14, %v5356_v19  ;;  %3010 = vperm.xlu1 %4431, %v2944_v52   ;;  %v2948_v52 = vld [vmem:[%s7308_s6 + $0x60] sm:$0xff] }
 0x3d6   : > { %v1800_v57 = vpop.trf.xlu1 }
 0x3d7   : > { %2995 = vperm.xlu0 %4430, %v2941_v55   ;;  %v5365_v53 = vpack.c.bf16 %v1800_v57, %v1799_v16  ;;  %v1832_v60 = vpop.trf.xlu0  ;;  %v2945_v16 = vld [vmem:[%s7308_s6 + $0x48] sm:$0xff]  ;;  %v2950_v55 = vld [vmem:[%s7308_s6 + $0x70] sm:$0xff] }
 0x3d8   : > { %3020 = vperm.xlu1 %4431, %v2946_v58   ;;  %v5370_v14 = vpack.c.bf16 %v1832_v60, %v1831_v34 }
 0x3d9   : > { %7395 = vst [vmem:[#allocation26_spill] sm:$0xff] %v5365_v53 }
 0x3da   : > { %7396 = vst [vmem:[#allocation27_spill] sm:$0xff] %v5370_v14  ;;  %v1801_v37 = vpop.trf.xlu1 }
 0x3db   : > { %3005 = vperm.xlu0 %4430, %v2943_v11   ;;  %v1833_v15 = vpop.trf.xlu0  ;;  %v2947_v11 = vld [vmem:[%s7308_s6 + $0x58] sm:$0xff] }
 0x3dc   : > { %3030 = vperm.xlu1 %4431, %v2948_v52  }
 0x3de   : > { %v1802_v58 = vpop.trf.xlu1 }
 0x3df   : > { %3015 = vperm.xlu0 %4430, %v2945_v16   ;;  %v5381_v34 = vpack.c.bf16 %v1802_v58, %v1801_v37  ;;  %v1834_v57 = vpop.trf.xlu0  ;;  %v3789_v16 = vld [vmem:[%s7310_s8] sm:$0xff] }
 0x3e0   : > { %v5383_v60 = vpop.f32.mrb[36].mxu1  ;;  %3040 = vperm.xlu1 %4431, %v2950_v55   ;;  %v5388_v52 = vpack.c.bf16 %v1834_v57, %v1833_v15 }
 0x3e1   : > { %7397 = vst [vmem:[#allocation28_spill] sm:$0xff] %v5381_v34  ;;  %v1136_v14 = vmax.f32 %v1132_v23, %v5383_v60  ;;  %v5391_v13 = vpop.f32.mrb[37].mxu1  ;;  %v2949_v23 = vld [vmem:[%s7308_s6 + $0x68] sm:$0xff] }
 0x3e2   : > { %7398 = vst [vmem:[#allocation29_spill] sm:$0xff] %v5388_v52  ;;  %v1134_v37 = vmax.f32 %v1130_v40, %v5391_v13  ;;  %v5397_v58 = vpop.f32.mrb[38].mxu1  ;;  %v1803_v21 = vpop.trf.xlu1  ;;  %v3791_v40 = vld [vmem:[%s7310_s8 + $0x10] sm:$0xff] }
 0x3e3   : > { %v1137_v55 = vmax.f32 %v1133_v18, %v5397_v58  ;;  %v5400_v34 = vpop.f32.mrb[39].mxu1  ;;  %3025 = vperm.xlu0 %4430, %v2947_v11   ;;  %v1835_v15 = vpop.trf.xlu0 }
 0x3e4   : > { %v1135_v57 = vmax.f32 %v1131_v39, %v5400_v34  ;;  %3795 = vperm.xlu1 %4431, %v3789_v16   ;;  %v2951_v39 = vld [vmem:[%s7308_s6 + $0x78] sm:$0xff] }
 0x3e6   : > { %v1804_v52 = vpop.trf.xlu1 }
 0x3e7   : > { %3035 = vperm.xlu0 %4430, %v2949_v23   ;;  %v5409_v53 = vpack.c.bf16 %v1804_v52, %v1803_v21  ;;  %v1836_v18 = vpop.trf.xlu0 }
 0x3e8   : > { %v5411_v29 = vpop.f32.mrb[40].mxu1  ;;  %3805 = vperm.xlu1 %4431, %v3791_v40   ;;  %v5446_v42 = vpack.c.bf16 %v1836_v18, %v1835_v15 }
 0x3e9   : > { %7399 = vst [vmem:[#allocation30_spill] sm:$0xff] %v5409_v53  ;;  %v1140_v11 = vmax.f32 %v1136_v14, %v5411_v29  ;;  %v5417_v16 = vpop.f32.mrb[41].mxu1  ;;  %v3790_v53 = vld [vmem:[%s7310_s8 + $0x8] sm:$0xff] }
 0x3ea   : > { %v1138_v51 = vmax.f32 %v1134_v37, %v5417_v16  ;;  %v5420_v20 = vpop.f32.mrb[42].mxu1  ;;  %v1805_v28 = vpop.trf.xlu1  ;;  %v3792_v37 = vld [vmem:[%s7310_s8 + $0x18] sm:$0xff]  ;;  %7401 = vst [vmem:[#allocation32_spill] sm:$0xff] %v5446_v42 }
 0x3eb   : > { %v1141_v21 = vmax.f32 %v1137_v55, %v5420_v20  ;;  %v5423_v52 = vpop.f32.mrb[43].mxu1  ;;  %3045 = vperm.xlu0 %4430, %v2951_v39   ;;  %v1837_v23 = vpop.trf.xlu0 }
 0x3ec   : > { %v1139_v40 = vmax.f32 %v1135_v57, %v5423_v52 }
 0x3ee   : > { %v1806_v14 = vpop.trf.xlu1 }
 0x3ef   : > { %3800 = vperm.xlu0 %4430, %v3790_v53   ;;  %v1838_v17 = vpop.trf.xlu0  ;;  %v5444_v44 = vpack.c.bf16 %v1806_v14, %v1805_v28 }
 0x3f0   : > { %v5429_v9 = vpop.f32.mrb[44].mxu1  ;;  %v5448_v41 = vpack.c.bf16 %v1838_v17, %v1837_v23 }
 0x3f1   : > { %v1144_v55 = vmax.f32 %v1140_v11, %v5429_v9  ;;  %v5435_v63 = vpop.f32.mrb[45].mxu1  ;;  %7400 = vst [vmem:[#allocation31_spill] sm:$0xff] %v5444_v44 }
 0x3f2   : > { %v1142_v39 = vmax.f32 %v1138_v51, %v5435_v63  ;;  %v5438_v57 = vpop.f32.mrb[46].mxu1  ;;  %v1807_v62 = vpop.trf.xlu1  ;;  %7402 = vst [vmem:[#allocation33_spill] sm:$0xff] %v5448_v41 }
 0x3f3   : > { %v1145_v48 = vmax.f32 %v1141_v21, %v5438_v57  ;;  %v5441_v45 = vpop.f32.mrb[47].mxu1  ;;  %3810 = vperm.xlu0 %4430, %v3792_v37   ;;  %v1839_v53 = vpop.trf.xlu0 }
 0x3f4   : > { %v1143_v46 = vmax.f32 %v1139_v40, %v5441_v45 }
 0x3f6   : > { %v1808_v11 = vpop.trf.xlu1 }
 0x3f7   : > { %v5450_v32 = vpack.c.bf16 %v1808_v11, %v1807_v62  ;;  %v1840_v51 = vpop.trf.xlu0 }
 0x3f8   : > { %v5452_v24 = vpop.f32.mrb[48].mxu1  ;;  %v5454_v10 = vpack.c.bf16 %v1840_v51, %v1839_v53 }
 0x3f9   : > { %7403 = vst [vmem:[#allocation34_spill] sm:$0xff] %v5450_v32  ;;  %v1148_v21 = vmax.f32 %v1144_v55, %v5452_v24  ;;  %v5457_v37 = vpop.f32.mrb[49].mxu1 }
 0x3fa   : > { %7404 = vst [vmem:[#allocation35_spill] sm:$0xff] %v5454_v10  ;;  %v1146_v40 = vmax.f32 %v1142_v39, %v5457_v37  ;;  %v5460_v28 = vpop.f32.mrb[50].mxu1 }
 0x3fb   : > { %v1149_v15 = vmax.f32 %v1145_v48, %v5460_v28  ;;  %v5463_v18 = vpop.f32.mrb[51].mxu1 }
 0x3fc   : > { %v1147_v62 = vmax.f32 %v1143_v46, %v5463_v18 }
 0x400   : > { %v5466_v17 = vpop.f32.mrb[52].mxu1 }
 0x401   : > { %v1152_v23 = vmax.f32 %v1148_v21, %v5466_v17  ;;  %v5469_v14 = vpop.f32.mrb[53].mxu1 }
 0x402   : > { %v1150_v55 = vmax.f32 %v1146_v40, %v5469_v14  ;;  %v5472_v53 = vpop.f32.mrb[54].mxu1 }
 0x403   : > { %v1153_v39 = vmax.f32 %v1149_v15, %v5472_v53  ;;  %v5475_v11 = vpop.f32.mrb[55].mxu1 }
 0x404   : > { %v1151_v48 = vmax.f32 %v1147_v62, %v5475_v11 }
 0x405   : > { %v1155_v51 = vmax.f32 %v1152_v23, %v1153_v39 }
 0x406   : > { %v1154_v10 = vmax.f32 %v1150_v55, %v1151_v48 }
 0x408   : > { %v1156_v41 = vmax.f32 %v1154_v10, %v1155_v51 }
 0x40a   : > { %v1157_v46 = vrot.slane %v1156_v41, 4 }
 0x40c   : > { %v1158_v42 = vmax.f32 %v1156_v41, %v1157_v46 }
 0x40e   : > { %v1159_v32 = vrot.slane %v1158_v42, 2 }
 0x410   : > { %v1160_v44 = vmax.f32 %v1158_v42, %v1159_v32 }
 0x412   : > { %v1161_v21 = vrot.slane %v1160_v44, 1 }
 0x413   : > { %v567_v5 = vpop.permute.xlu1 %566 }
 0x414   : > { %v5478_v1 = vmax.f32 %v1160_v44, %v1161_v21  ;;  %v5481_v40 = vadd.f32 %v5165_v7, %v567_v5 }
 0x416   : > { %v1163_v15 = vsub.f32 %v5262_v0, %v5478_v1  ;;  %v1164_v62 = vsub.f32 %v5269_v36, %v5478_v1  ;;  %v1165_v10 = vsub.f32 %v5257_v33, %v5478_v1  ;;  %v1166_v41 = vsub.f32 %v5267_v35, %v5478_v1 }
 0x417   : > { %v1167_v32 = vsub.f32 %v5300_v56, %v5478_v1  ;;  %v1168_v42 = vsub.f32 %v5311_v3, %v5478_v1  ;;  %v1169_v44 = vsub.f32 %v5293_v54, %v5478_v1  ;;  %v1170_v7 = vsub.f32 %v5307_v43, %v5478_v1 }
 0x418   : > { %v1171_v0 = vsub.f32 %v5347_v4, %v5478_v1  ;;  %v1172_v33 = vsub.f32 %v5356_v19, %v5478_v1  ;;  %v1173_v35 = vsub.f32 %v5339_v49, %v5478_v1  ;;  %v1174_v36 = vsub.f32 %v5353_v27, %v5478_v1 }
 0x419   : > { %v1175_v56 = vsub.f32 %v5391_v13, %v5478_v1  ;;  %v1176_v54 = vsub.f32 %v5400_v34, %v5478_v1  ;;  %v1177_v43 = vsub.f32 %v5383_v60, %v5478_v1  ;;  %v1178_v3 = vsub.f32 %v5397_v58, %v5478_v1  ;;  %v572_v13 = vpop.permute.xlu1 %571 }
 0x41a   : > { %v1179_v4 = vsub.f32 %v5417_v16, %v5478_v1  ;;  %v1180_v49 = vsub.f32 %v5423_v52, %v5478_v1  ;;  %v1181_v27 = vsub.f32 %v5411_v29, %v5478_v1  ;;  %v1195_v16 = vmul.f32 1.442695, %v1163_v15 }
 0x41b   : > { %v1197_v23 = vmul.f32 1.442695, %v1164_v62  ;;  %v1199_v58 = vmul.f32 1.442695, %v1165_v10  ;;  %v1201_v60 = vmul.f32 1.442695, %v1166_v41  ;;  %v817_v15 = vadd.f32 %v5167_v8, %v567_v5 }
 0x41c   : > { %4472 = vpow2.f32 %v1195_v16  ;;  %v1203_v55 = vmul.f32 1.442695, %v1167_v32  ;;  %v1205_v39 = vmul.f32 1.442695, %v1168_v42  ;;  %v1207_v48 = vmul.f32 1.442695, %v1169_v44 }
 0x41d   : > { %4474 = vpow2.f32 %v1197_v23  ;;  %v1209_v19 = vmul.f32 1.442695, %v1170_v7  ;;  %v1211_v51 = vmul.f32 1.442695, %v1171_v0  ;;  %v1213_v46 = vmul.f32 1.442695, %v1172_v33 }
 0x41e   : > { %v562_v34 = vpop.permute.xlu0 %561  ;;  %4476 = vpow2.f32 %v1199_v58  ;;  %v1215_v21 = vmul.f32 1.442695, %v1173_v35  ;;  %v1217_v10 = vmul.f32 1.442695, %v1174_v36  ;;  %v821_v41 = vadd.f32 %v5171_v12, %v572_v13 }
 0x41f   : > { %4478 = vpow2.f32 %v1201_v60  ;;  %v823_v32 = vadd.f32 %v5175_v30, %v572_v13  ;;  %v1219_v42 = vmul.f32 1.442695, %v1175_v56  ;;  %v1221_v44 = vmul.f32 1.442695, %v1176_v54 }
 0x420   : > { %4480 = vpow2.f32 %v1203_v55  ;;  %v811_v7 = vadd.f32 %v5160_v2, %v562_v34  ;;  %v813_v0 = vadd.f32 %v5163_v6, %v562_v34  ;;  %v1223_v8 = vmul.f32 1.442695, %v1177_v43 }
 0x421   : > { %4482 = vpow2.f32 %v1205_v39  ;;  %v1225_v36 = vmul.f32 1.442695, %v1178_v3  ;;  %v1229_v3 = vmul.f32 1.442695, %v1180_v49  ;;  %v7405_v58 = vsub.f32 %v5420_v20, %v5478_v1 }
 0x422   : > { %4484 = vpow2.f32 %v1207_v48  ;;  %v577_v62 = vpop.permute.xlu0 %576  ;;  %v5557_v12 = vpack.c.bf16 %v5481_v40, %v811_v7  ;;  %v5561_v56 = vpack.c.bf16 %v817_v15, %v813_v0  ;;  %v7406_v16 = vsub.f32 %v5435_v63, %v5478_v1 }
 0x423   : > { %4486 = vpow2.f32 %v1209_v19  ;;  %v825_v33 = vadd.f32 %v5179_v25, %v577_v62  ;;  %v827_v35 = vadd.f32 %v5181_v31, %v577_v62  ;;  %v1227_v31 = vmul.f32 1.442695, %v1179_v4 }
 0x424   : > { %4488 = vpow2.f32 %v1211_v51  ;;  %v1231_v4 = vmul.f32 1.442695, %v1181_v27  ;;  %v1233_v52 = vmul.f32 1.442695, %v7405_v58  ;;  %v1235_v29 = vmul.f32 1.442695, %v7406_v16 }
 0x425   : > { %4490 = vpow2.f32 %v1213_v46  ;;  %v5563_v2 = vpack.c.bf16 %v825_v33, %v821_v41  ;;  %v5565_v6 = vpack.c.bf16 %v827_v35, %v823_v32  ;;  %v7407_v39 = vsub.f32 %v5441_v45, %v5478_v1 }
 0x426   : > { %v5554_v5 = vpop.eup %4472  ;;  %4492 = vpow2.f32 %v1215_v21  ;;  %v7408_v51 = vsub.f32 %v5429_v9, %v5478_v1  ;;  %v7409_v62 = vsub.f32 %v5438_v57, %v5478_v1  ;;  %v7410_v41 = vsub.f32 %v5457_v37, %v5478_v1 }
 0x427   : > { %v5559_v30 = vpop.eup %4474  ;;  %4494 = vpow2.f32 %v1217_v10  ;;  %v1237_v20 = vmul.f32 1.442695, %v7407_v39  ;;  %v7411_v7 = vsub.f32 %v5463_v18, %v5478_v1  ;;  %v7412_v33 = vsub.f32 %v5452_v24, %v5478_v1 }
 0x428   : > { %v5567_v25 = vpop.eup %4476  ;;  %4496 = vpow2.f32 %v1219_v42  ;;  %v1259_v54 = vadd.f32 %v5559_v30, %v5554_v5  ;;  %v1296_v40 = vpack.c.bf16 %v5559_v30, %v5554_v5  ;;  %v1239_v63 = vmul.f32 1.442695, %v7408_v51 }
 0x429   : > { %v5573_v43 = vpop.eup %4478  ;;  %4498 = vpow2.f32 %v1221_v44  ;;  %v1241_v45 = vmul.f32 1.442695, %v7409_v62  ;;  %v1243_v9 = vmul.f32 1.442695, %v7410_v41  ;;  %v1245_v57 = vmul.f32 1.442695, %v7411_v7 }
 0x42a   : > { %v5578_v13 = vpop.eup %4480  ;;  %4500 = vpow2.f32 %v1223_v8  ;;  %v1260_v19 = vadd.f32 %v5567_v25, %v1259_v54  ;;  %v1297_v34 = vpack.c.bf16 %v5573_v43, %v5567_v25  ;;  %v1247_v37 = vmul.f32 1.442695, %v7412_v33 }
 0x42b   : > { %v5586_v60 = vpop.eup %4482  ;;  %4502 = vpow2.f32 %v1225_v36  ;;  %v7417_v51 = vsub.f32 %v5472_v53, %v5478_v1 }
 0x42c   : > { %v5591_v49 = vpop.eup %4484  ;;  %4504 = vpow2.f32 %v1227_v31  ;;  %v1261_v27 = vadd.f32 %v5573_v43, %v1260_v19  ;;  %v1298_v23 = vpack.c.bf16 %v5586_v60, %v5578_v13  ;;  %v7413_v31 = vsub.f32 %v5460_v28, %v5478_v1 }
 0x42d   : > { %v5599_v55 = vpop.eup %4486  ;;  %4506 = vpow2.f32 %v1229_v3  ;;  %v7414_v3 = vsub.f32 %v5469_v14, %v5478_v1 }
 0x42e   : > { %v5604_v48 = vpop.eup %4488  ;;  %4508 = vpow2.f32 %v1231_v4  ;;  %v1262_v46 = vadd.f32 %v5578_v13, %v1261_v27  ;;  %v1299_v21 = vpack.c.bf16 %v5599_v55, %v5591_v49  ;;  %v1249_v18 = vmul.f32 1.442695, %v7413_v31 }
 0x42f   : > { %v5612_v15 = vpop.eup %4490  ;;  %4510 = vpow2.f32 %v1233_v52  ;;  %v1251_v24 = vmul.f32 1.442695, %v7414_v3  ;;  %v7415_v52 = vsub.f32 %v5475_v11, %v5478_v1 }
 0x430   : > { %v5617_v10 = vpop.eup %4492  ;;  %4512 = vpow2.f32 %v1235_v29  ;;  %v1263_v32 = vadd.f32 %v5586_v60, %v1262_v46  ;;  %v1300_v42 = vpack.c.bf16 %v5612_v15, %v5604_v48  ;;  %v7416_v29 = vsub.f32 %v5466_v17, %v5478_v1 }
 0x431   : > { %v5625_v44 = vpop.eup %4494  ;;  %4514 = vpow2.f32 %v1237_v20  ;;  %v1253_v28 = vmul.f32 1.442695, %v7415_v52 }
 0x432   : > { %v5630_v0 = vpop.eup %4496  ;;  %4516 = vpow2.f32 %v1239_v63  ;;  %v1264_v35 = vadd.f32 %v5591_v49, %v1263_v32  ;;  %v1301_v8 = vpack.c.bf16 %v5625_v44, %v5617_v10  ;;  %v1255_v27 = vmul.f32 1.442695, %v7416_v29 }
 0x433   : > { %v5638_v36 = vpop.eup %4498  ;;  %4518 = vpow2.f32 %v1241_v45  ;;  %v1257_v63 = vmul.f32 1.442695, %v7417_v51  ;;  %v7428_v51 = vld [vmem:[#allocation12_spill] sm:$0xff] }
 0x434   : > { %v5643_v54 = vpop.eup %4500  ;;  %4520 = vpow2.f32 %v1243_v9  ;;  %v1265_v4 = vadd.f32 %v5599_v55, %v1264_v35  ;;  %v1302_v19 = vpack.c.bf16 %v5638_v36, %v5630_v0 }
 0x435   : > { %v5651_v58 = vpop.eup %4502  ;;  %4522 = vpow2.f32 %v1245_v57 }
 0x436   : > { %v4505_v16 = vpop.eup %4504  ;;  %4524 = vpow2.f32 %v1247_v37  ;;  %v1266_v14 = vadd.f32 %v5604_v48, %v1265_v4  ;;  %v1303_v39 = vpack.c.bf16 %v5651_v58, %v5643_v54 }
 0x437   : > { %v4507_v20 = vpop.eup %4506  ;;  %4526 = vpow2.f32 %v1249_v18 }
 0x438   : > { %v4509_v46 = vpop.eup %4508  ;;  %4528 = vpow2.f32 %v1251_v24  ;;  %v1267_v11 = vadd.f32 %v5612_v15, %v1266_v14  ;;  %v1304_v62 = vpack.c.bf16 %v4507_v20, %v4505_v16 }
 0x439   : > { %v4511_v45 = vpop.eup %4510  ;;  %4530 = vpow2.f32 %v1253_v28 }
 0x43a   : > { %v4513_v17 = vpop.eup %4512  ;;  %4532 = vpow2.f32 %v1255_v27  ;;  %v1268_v41 = vadd.f32 %v5617_v10, %v1267_v11  ;;  %4106 = vmatprep.subr.bf16.mxu1 %v1304_v62  ;;  %v1305_v9 = vpack.c.bf16 %v4511_v45, %v4509_v46  ;;  %v7431_v11 = vld [vmem:[#allocation15_spill] sm:$0xff] }
 0x43b   : > { %v4515_v32 = vpop.eup %4514  ;;  %4534 = vpow2.f32 %v1257_v63  ;;  %4107 = vmatpush3.bf16.msra.mxu1 %v1296_v40  ;;  %v7429_v63 = vld [vmem:[#allocation13_spill] sm:$0xff] }
 0x43c   : > { %v4517_v1 = vpop.eup %4516  ;;  %v1269_v53 = vadd.f32 %v5625_v44, %v1268_v41  ;;  %4108 = vmatprep.subr.bf16.mxu1 %v1305_v9  ;;  %v1306_v7 = vpack.c.bf16 %v4515_v32, %v4513_v17 }
 0x43d   : > { %v4519_v57 = vpop.eup %4518 }
 0x43e   : > { %v4521_v33 = vpop.eup %4520  ;;  %v1270_v37 = vadd.f32 %v5630_v0, %v1269_v53  ;;  %v1307_v35 = vpack.c.bf16 %v4519_v57, %v4517_v1 }
 0x43f   : > { %v4523_v31 = vpop.eup %4522  ;;  %4109 = vmatpush3.bf16.msra.mxu1 %v1297_v34 }
 0x440   : > { %v4525_v18 = vpop.eup %4524  ;;  %v1271_v3 = vadd.f32 %v5638_v36, %v1270_v37  ;;  %4110 = vmatprep.subr.bf16.mxu1 %v1306_v7  ;;  %v1308_v5 = vpack.c.bf16 %v4523_v31, %v4521_v33  ;;  %v7420_v36 = vld [vmem:[#allocation4_spill] sm:$0xff] }
 0x441   : > { %v4527_v30 = vpop.eup %4526 }
 0x442   : > { %v4529_v40 = vpop.eup %4528  ;;  %v1272_v24 = vadd.f32 %v5643_v54, %v1271_v3  ;;  %v1309_v4 = vpack.c.bf16 %v4527_v30, %v4525_v18 }
 0x443   : > { %v4531_v52 = vpop.eup %4530  ;;  %4111 = vmatpush3.bf16.msra.mxu1 %v1298_v23 }
 0x444   : > { %v4533_v28 = vpop.eup %4532  ;;  %v1273_v29 = vadd.f32 %v5651_v58, %v1272_v24  ;;  %4112 = vmatprep.subr.bf16.mxu1 %v1307_v35  ;;  %v1310_v25 = vpack.c.bf16 %v4531_v52, %v4529_v40 }
 0x445   : > { %v4535_v43 = vpop.eup %4534 }
 0x446   : > { %v1274_v34 = vadd.f32 %v4505_v16, %v1273_v29  ;;  %v1311_v27 = vpack.c.bf16 %v4535_v43, %v4533_v28  ;;  %v7424_v16 = vld [vmem:[#allocation8_spill] sm:$0xff] }
 0x447   : > { %4113 = vmatpush3.bf16.msra.mxu1 %v1299_v21 }
 0x448   : > { %v1275_v14 = vadd.f32 %v4507_v20, %v1274_v34  ;;  %4114 = vmatprep.subr.bf16.mxu1 %v1308_v5  ;;  %v7427_v20 = vld [vmem:[#allocation11_spill] sm:$0xff] }
 0x44a   : > { %v1276_v54 = vadd.f32 %v4509_v46, %v1275_v14  ;;  %v7430_v46 = vld [vmem:[#allocation14_spill] sm:$0xff] }
 0x44b   : > { %4115 = vmatpush3.bf16.msra.mxu1 %v1300_v42 }
 0x44c   : > { %v1277_v13 = vadd.f32 %v4511_v45, %v1276_v54  ;;  %4116 = vmatprep.subr.bf16.mxu1 %v1309_v4 }
 0x44e   : > { %v1278_v60 = vadd.f32 %v4513_v17, %v1277_v13 }
 0x44f   : > { %4117 = vmatpush3.bf16.msra.mxu1 %v1301_v8  ;;  %v7418_v8 = vld [vmem:[#allocation2_spill] sm:$0xff] }
 0x450   : > { %v1279_v23 = vadd.f32 %v4515_v32, %v1278_v60  ;;  %4118 = vmatprep.subr.bf16.mxu1 %v1310_v25 }
 0x452   : > { %v1280_v58 = vadd.f32 %v4517_v1, %v1279_v23 }
 0x453   : > { %4119 = vmatpush3.bf16.msra.mxu1 %v1302_v19  ;;  %v7422_v19 = vld [vmem:[#allocation6_spill] sm:$0xff] }
 0x454   : > { %v1281_v49 = vadd.f32 %v4519_v57, %v1280_v58  ;;  %4120 = vmatprep.subr.bf16.mxu1 %v1311_v27 }
 0x456   : > { %v1282_v55 = vadd.f32 %v4521_v33, %v1281_v49 }
 0x457   : > { %4121 = vmatpush3.bf16.msra.mxu1 %v1303_v39  ;;  %v7426_v39 = vld [vmem:[#allocation10_spill] sm:$0xff] }
 0x458   : > { %v1283_v48 = vadd.f32 %v4523_v31, %v1282_v55  ;;  %4308 = vmatprep.subr.bf16.mxu1 %v5001_v38 }
 0x45a   : > { %v1284_v21 = vadd.f32 %v4525_v18, %v1283_v48  ;;  %1345 = vmatmul.mubr.bf16.vlgmr.msra.gmra.mrb[56].mxu1 %v5188_v59 }
 0x45b   : > { %1352 = vmatprep.mubr.bf16.mxu1 %v5196_v22  ;;  %4309 = vmatpush3.bf16.msra.mxu1 %v5001_v38  ;;  %v7419_v38 = vld [vmem:[#allocation3_spill] sm:$0xff] }
 0x45c   : > { %v1285_v15 = vadd.f32 %v4527_v30, %v1284_v21  ;;  %4310 = vmatprep.subr.bf16.mxu1 %v5003_v50 }
 0x45e   : > { %v1286_v10 = vadd.f32 %v4529_v40, %v1285_v15 }
 0x45f   : > { %4311 = vmatpush3.bf16.msra.mxu1 %v5003_v50  ;;  %v7421_v50 = vld [vmem:[#allocation5_spill] sm:$0xff] }
 0x460   : > { %v1287_v42 = vadd.f32 %v4531_v52, %v1286_v10 }
 0x462   : > { %v1288_v44 = vadd.f32 %v4533_v28, %v1287_v42  ;;  %1353 = vmatmul.mubr.bf16.gmra.mrb[60].mxu1 %v5194_v26 }
 0x463   : > { %4312 = vmatprep.mubr.msk.bf16.mxu1 %vm639_vm0, %v5100_v47  ;;  %v7423_v47 = vld [vmem:[#allocation7_spill] sm:$0xff] }
 0x464   : > { %v1289_v0 = vadd.f32 %v4535_v43, %v1288_v44 }
 0x466   : > { %v1290_v62 = vrot.slane %v1289_v0, 4 }
 0x468   : > { %v1291_v45 = vadd.f32 %v1290_v62, %v1289_v0 }
 0x46a   : > { %4313 = vmatmul.mubr.msk.bf16.vlgmr.msra.gmra.mrb[64].mxu1 %vm639_vm0, %v5104_v61  ;;  %v7425_v61 = vld [vmem:[#allocation9_spill] sm:$0xff]  ;;  %v1292_v17 = vrot.slane %v1291_v45, 2 }
 0x46b   : > { %4316 = vmatprep.mubr.msk.bf16.mxu1 %vm639_vm0, %v7418_v8 }
 0x46c   : > { %v1293_v41 = vadd.f32 %v1292_v17, %v1291_v45 }
 0x46e   : > { %v1294_v9 = vrot.slane %v1293_v41, 1 }
 0x470   : > { %v1295_v32 = vadd.f32 %v1294_v9, %v1293_v41 }
 0x472   : > { %4317 = vmatmul.mubr.msk.bf16.gmra.mrb[68].mxu1 %vm639_vm0, %v7419_v38  ;;  %4536 = vrcp.f32 %v1295_v32 }
 0x473   : > { %4320 = vmatprep.mubr.msk.bf16.mxu1 %vm639_vm0, %v7420_v36 }
 0x47a   : > { %4321 = vmatmul.mubr.msk.bf16.gmra.mrb[72].mxu1 %vm639_vm0, %v7421_v50 }
 0x47b   : > { %4324 = vmatprep.mubr.msk.bf16.mxu1 %vm639_vm0, %v7422_v19 }
 0x47c   : > { %v4537_v33 = vpop.eup %4536 }
 0x482   : > { %4325 = vmatmul.mubr.msk.bf16.gmra.mrb[76].mxu1 %vm639_vm0, %v7423_v47 }
 0x483   : > { %4328 = vmatprep.mubr.msk.bf16.mxu1 %vm639_vm0, %v7424_v16 }
 0x48a   : > { %4329 = vmatmul.mubr.msk.bf16.gmra.mrb[80].mxu1 %vm639_vm0, %v7425_v61 }
 0x48b   : > { %4332 = vmatprep.mubr.msk.bf16.mxu1 %vm639_vm0, %v7426_v39 }
 0x492   : > { %4333 = vmatmul.mubr.msk.bf16.gmra.mrb[84].mxu1 %vm639_vm0, %v7427_v20 }
 0x493   : > { %4336 = vmatprep.mubr.msk.bf16.mxu1 %vm639_vm0, %v7428_v51 }
 0x49a   : > { %4337 = vmatmul.mubr.msk.bf16.gmra.mrb[88].mxu1 %vm639_vm0, %v7429_v63 }
 0x49b   : > { %4340 = vmatprep.mubr.msk.bf16.mxu1 %vm639_vm0, %v7430_v46 }
 0x4a2   : > { %4341 = vmatmul.mubr.msk.bf16.gmra.mrb[92].mxu1 %vm639_vm0, %v7431_v11 }
 0x4a3   : > { %2284 = vmatprep.mubr.bf16.mxu1 %v5561_v56 }
 0x52d   : > { %v4122_v1 = vpop.f32.mrb[56].mxu1 }
 0x52e   : > { %v4123_v53 = vpop.f32.mrb[57].mxu1 }
 0x52f   : > { %v4124_v7 = vadd.f32 %v4123_v53, %v4122_v1  ;;  %v4125_v57 = vpop.f32.mrb[58].mxu1 }
 0x530   : > { %v4126_v37 = vpop.f32.mrb[59].mxu1 }
 0x531   : > { %v5733_v35 = vmul.f32 %v4537_v33, %v4124_v7  ;;  %v4127_v31 = vadd.f32 %v4126_v37, %v4125_v57 }
 0x533   : > { %7432 = vst [vmem:[#allocation2_spill] sm:$0xff] %v5733_v35  ;;  %v5735_v18 = vmul.f32 %v4537_v33, %v4127_v31 }
 0x535   : > { %7433 = vst [vmem:[#allocation3_spill] sm:$0xff] %v5735_v18  ;;  %v4128_v5 = vpop.f32.mrb[60].mxu1 }
 0x536   : > { %v4129_v30 = vpop.f32.mrb[61].mxu1 }
 0x537   : > { %v4130_v40 = vadd.f32 %v4129_v30, %v4128_v5  ;;  %v4131_v24 = vpop.f32.mrb[62].mxu1 }
 0x538   : > { %v4132_v4 = vpop.f32.mrb[63].mxu1 }
 0x539   : > { %v5739_v52 = vmul.f32 %v4537_v33, %v4130_v40  ;;  %v4133_v28 = vadd.f32 %v4132_v4, %v4131_v24 }
 0x53b   : > { %7434 = vst [vmem:[#allocation4_spill] sm:$0xff] %v5739_v52  ;;  %v5741_v29 = vmul.f32 %v4537_v33, %v4133_v28 }
 0x53d   : > { %7435 = vst [vmem:[#allocation5_spill] sm:$0xff] %v5741_v29  ;;  %v5745_v43 = vpop.f32.mrb[64].mxu1 }
 0x53e   : > { %v5747_v34 = vpop.f32.mrb[65].mxu1 }
 0x53f   : > { %v5749_v27 = vpop.f32.mrb[66].mxu1 }
 0x540   : > { %v5751_v14 = vpop.f32.mrb[67].mxu1 }
 0x545   : > { %v5753_v54 = vpop.f32.mrb[68].mxu1 }
 0x546   : > { %v1530_v13 = vmax.f32 %v5745_v43, %v5753_v54  ;;  %v5757_v60 = vpop.f32.mrb[69].mxu1 }
 0x547   : > { %v1528_v23 = vmax.f32 %v5747_v34, %v5757_v60  ;;  %v5761_v58 = vpop.f32.mrb[70].mxu1 }
 0x548   : > { %v1531_v49 = vmax.f32 %v5749_v27, %v5761_v58  ;;  %v5765_v55 = vpop.f32.mrb[71].mxu1 }
 0x549   : > { %v1529_v48 = vmax.f32 %v5751_v14, %v5765_v55 }
 0x54d   : > { %v5769_v21 = vpop.f32.mrb[72].mxu1 }
 0x54e   : > { %v1534_v15 = vmax.f32 %v1530_v13, %v5769_v21  ;;  %v5772_v10 = vpop.f32.mrb[73].mxu1 }
 0x54f   : > { %v1532_v42 = vmax.f32 %v1528_v23, %v5772_v10  ;;  %v5775_v44 = vpop.f32.mrb[74].mxu1 }
 0x550   : > { %v1535_v0 = vmax.f32 %v1531_v49, %v5775_v44  ;;  %v5778_v8 = vpop.f32.mrb[75].mxu1 }
 0x551   : > { %v1533_v38 = vmax.f32 %v1529_v48, %v5778_v8 }
 0x555   : > { %v5781_v36 = vpop.f32.mrb[76].mxu1 }
 0x556   : > { %v1538_v50 = vmax.f32 %v1534_v15, %v5781_v36  ;;  %v5784_v19 = vpop.f32.mrb[77].mxu1 }
 0x557   : > { %v1536_v47 = vmax.f32 %v1532_v42, %v5784_v19  ;;  %v5787_v16 = vpop.f32.mrb[78].mxu1 }
 0x558   : > { %v1539_v61 = vmax.f32 %v1535_v0, %v5787_v16  ;;  %v5790_v39 = vpop.f32.mrb[79].mxu1 }
 0x559   : > { %v1537_v20 = vmax.f32 %v1533_v38, %v5790_v39 }
 0x55d   : > { %v5793_v51 = vpop.f32.mrb[80].mxu1 }
 0x55e   : > { %v1542_v63 = vmax.f32 %v1538_v50, %v5793_v51  ;;  %v5796_v46 = vpop.f32.mrb[81].mxu1 }
 0x55f   : > { %v1540_v11 = vmax.f32 %v1536_v47, %v5796_v46  ;;  %v5799_v62 = vpop.f32.mrb[82].mxu1 }
 0x560   : > { %v1543_v45 = vmax.f32 %v1539_v61, %v5799_v62  ;;  %v5802_v17 = vpop.f32.mrb[83].mxu1 }
 0x561   : > { %v1541_v41 = vmax.f32 %v1537_v20, %v5802_v17 }
 0x565   : > { %v5805_v9 = vpop.f32.mrb[84].mxu1 }
 0x566   : > { %v1546_v32 = vmax.f32 %v1542_v63, %v5805_v9  ;;  %v5808_v1 = vpop.f32.mrb[85].mxu1 }
 0x567   : > { %v1544_v53 = vmax.f32 %v1540_v11, %v5808_v1  ;;  %v5811_v7 = vpop.f32.mrb[86].mxu1 }
 0x568   : > { %v1547_v57 = vmax.f32 %v1543_v45, %v5811_v7  ;;  %v5814_v33 = vpop.f32.mrb[87].mxu1 }
 0x569   : > { %v1545_v37 = vmax.f32 %v1541_v41, %v5814_v33 }
 0x56d   : > { %v5817_v31 = vpop.f32.mrb[88].mxu1 }
 0x56e   : > { %v1550_v5 = vmax.f32 %v1546_v32, %v5817_v31  ;;  %v5820_v30 = vpop.f32.mrb[89].mxu1 }
 0x56f   : > { %v1548_v40 = vmax.f32 %v1544_v53, %v5820_v30  ;;  %v5823_v24 = vpop.f32.mrb[90].mxu1 }
 0x570   : > { %v1551_v4 = vmax.f32 %v1547_v57, %v5823_v24  ;;  %v5826_v28 = vpop.f32.mrb[91].mxu1 }
 0x571   : > { %v1549_v13 = vmax.f32 %v1545_v37, %v5826_v28 }
 0x575   : > { %v5829_v23 = vpop.f32.mrb[92].mxu1 }
 0x576   : > { %v1554_v49 = vmax.f32 %v1550_v5, %v5829_v23  ;;  %v5832_v48 = vpop.f32.mrb[93].mxu1 }
 0x577   : > { %v1552_v15 = vmax.f32 %v1548_v40, %v5832_v48  ;;  %v5835_v42 = vpop.f32.mrb[94].mxu1 }
 0x578   : > { %v1555_v0 = vmax.f32 %v1551_v4, %v5835_v42  ;;  %v5838_v38 = vpop.f32.mrb[95].mxu1 }
 0x579   : > { %v1553_v50 = vmax.f32 %v1549_v13, %v5838_v38 }
 0x57a   : > { %v1557_v47 = vmax.f32 %v1554_v49, %v1555_v0 }
 0x57b   : > { %v1556_v61 = vmax.f32 %v1552_v15, %v1553_v50 }
 0x57d   : > { %v1558_v20 = vmax.f32 %v1556_v61, %v1557_v47 }
 0x57f   : > { %v1559_v63 = vrot.slane %v1558_v20, 4 }
 0x581   : > { %v1560_v11 = vmax.f32 %v1558_v20, %v1559_v63 }
 0x583   : > { %v1561_v45 = vrot.slane %v1560_v11, 2 }
 0x585   : > { %v1562_v41 = vmax.f32 %v1560_v11, %v1561_v45 }
 0x587   : > { %v1563_v32 = vrot.slane %v1562_v41, 1 }
 0x589   : > { %v5841_v53 = vmax.f32 %v1562_v41, %v1563_v32 }
 0x58b   : > { %v1565_v57 = vsub.f32 %v5747_v34, %v5841_v53  ;;  %v1566_v37 = vsub.f32 %v5751_v14, %v5841_v53  ;;  %v1567_v5 = vsub.f32 %v5745_v43, %v5841_v53  ;;  %v1568_v40 = vsub.f32 %v5749_v27, %v5841_v53 }
 0x58c   : > { %v1569_v4 = vsub.f32 %v5757_v60, %v5841_v53  ;;  %v1570_v13 = vsub.f32 %v5765_v55, %v5841_v53  ;;  %v1571_v49 = vsub.f32 %v5753_v54, %v5841_v53  ;;  %v1572_v34 = vsub.f32 %v5761_v58, %v5841_v53 }
 0x58d   : > { %v1573_v14 = vsub.f32 %v5772_v10, %v5841_v53  ;;  %v1574_v43 = vsub.f32 %v5778_v8, %v5841_v53  ;;  %v1575_v27 = vsub.f32 %v5769_v21, %v5841_v53  ;;  %v1576_v60 = vsub.f32 %v5775_v44, %v5841_v53 }
 0x58e   : > { %v1577_v55 = vsub.f32 %v5784_v19, %v5841_v53  ;;  %v1578_v54 = vsub.f32 %v5790_v39, %v5841_v53  ;;  %v1579_v58 = vsub.f32 %v5781_v36, %v5841_v53  ;;  %v1580_v10 = vsub.f32 %v5787_v16, %v5841_v53 }
 0x58f   : > { %v1581_v8 = vsub.f32 %v5796_v46, %v5841_v53  ;;  %v1582_v21 = vsub.f32 %v5802_v17, %v5841_v53  ;;  %v1583_v44 = vsub.f32 %v5793_v51, %v5841_v53  ;;  %v1584_v19 = vsub.f32 %v5799_v62, %v5841_v53 }
 0x590   : > { %v1585_v39 = vsub.f32 %v5808_v1, %v5841_v53  ;;  %v1586_v36 = vsub.f32 %v5814_v33, %v5841_v53  ;;  %v1587_v16 = vsub.f32 %v5805_v9, %v5841_v53  ;;  %v1588_v46 = vsub.f32 %v5811_v7, %v5841_v53 }
 0x591   : > { %v1589_v17 = vsub.f32 %v5820_v30, %v5841_v53  ;;  %v1590_v51 = vsub.f32 %v5826_v28, %v5841_v53  ;;  %v1591_v62 = vsub.f32 %v5817_v31, %v5841_v53  ;;  %v1592_v1 = vsub.f32 %v5823_v24, %v5841_v53 }
 0x592   : > { %v1593_v15 = vsub.f32 %v5832_v48, %v5841_v53  ;;  %v1597_v61 = vmul.f32 1.442695, %v1565_v57  ;;  %v1599_v20 = vmul.f32 1.442695, %v1566_v37  ;;  %v1601_v63 = vmul.f32 1.442695, %v1567_v5 }
 0x593   : > { %v1603_v11 = vmul.f32 1.442695, %v1568_v40  ;;  %v1605_v45 = vmul.f32 1.442695, %v1569_v4  ;;  %v1607_v41 = vmul.f32 1.442695, %v1570_v13 }
 0x594   : > { %4538 = vpow2.f32 %v1597_v61  ;;  %v1609_v32 = vmul.f32 1.442695, %v1571_v49  ;;  %v1611_v25 = vmul.f32 1.442695, %v1572_v34  ;;  %v1613_v3 = vmul.f32 1.442695, %v1573_v14 }
 0x595   : > { %4540 = vpow2.f32 %v1599_v20  ;;  %v1615_v0 = vmul.f32 1.442695, %v1574_v43  ;;  %v1617_v50 = vmul.f32 1.442695, %v1575_v27  ;;  %v1619_v47 = vmul.f32 1.442695, %v1576_v60 }
 0x596   : > { %4542 = vpow2.f32 %v1601_v63  ;;  %v1621_v57 = vmul.f32 1.442695, %v1577_v55  ;;  %v1623_v37 = vmul.f32 1.442695, %v1578_v54  ;;  %v1625_v40 = vmul.f32 1.442695, %v1579_v58 }
 0x597   : > { %4544 = vpow2.f32 %v1603_v11  ;;  %v1627_v13 = vmul.f32 1.442695, %v1580_v10  ;;  %v1629_v34 = vmul.f32 1.442695, %v1581_v8  ;;  %v1631_v43 = vmul.f32 1.442695, %v1582_v21 }
 0x598   : > { %4546 = vpow2.f32 %v1605_v45  ;;  %v1633_v60 = vmul.f32 1.442695, %v1583_v44  ;;  %v1635_v10 = vmul.f32 1.442695, %v1584_v19  ;;  %v1639_v44 = vmul.f32 1.442695, %v1586_v36 }
 0x599   : > { %4548 = vpow2.f32 %v1607_v41  ;;  %v1641_v19 = vmul.f32 1.442695, %v1587_v16  ;;  %v1643_v33 = vmul.f32 1.442695, %v1588_v46  ;;  %v1645_v9 = vmul.f32 1.442695, %v1589_v17 }
 0x59a   : > { %4550 = vpow2.f32 %v1609_v32  ;;  %v1647_v7 = vmul.f32 1.442695, %v1590_v51  ;;  %v1649_v30 = vmul.f32 1.442695, %v1591_v62  ;;  %v1651_v28 = vmul.f32 1.442695, %v1592_v1 }
 0x59b   : > { %4552 = vpow2.f32 %v1611_v25  ;;  %v1653_v31 = vmul.f32 1.442695, %v1593_v15 }
 0x59c   : > { %4554 = vpow2.f32 %v1613_v3 }
 0x59d   : > { %4556 = vpow2.f32 %v1615_v0  ;;  %v1637_v0 = vmul.f32 1.442695, %v1585_v39 }
 0x59e   : > { %v5907_v5 = vpop.eup %4538  ;;  %4558 = vpow2.f32 %v1617_v50 }
 0x59f   : > { %v5909_v4 = vpop.eup %4540  ;;  %4560 = vpow2.f32 %v1619_v47 }
 0x5a0   : > { %v5911_v49 = vpop.eup %4542  ;;  %4562 = vpow2.f32 %v1621_v57  ;;  %v1661_v25 = vadd.f32 %v5909_v4, %v5907_v5  ;;  %v1698_v3 = vpack.c.bf16 %v5909_v4, %v5907_v5 }
 0x5a1   : > { %v5917_v14 = vpop.eup %4544  ;;  %4564 = vpow2.f32 %v1623_v37 }
 0x5a2   : > { %v5919_v27 = vpop.eup %4546  ;;  %4566 = vpow2.f32 %v1625_v40  ;;  %v1662_v55 = vadd.f32 %v5911_v49, %v1661_v25  ;;  %v1699_v54 = vpack.c.bf16 %v5917_v14, %v5911_v49  ;;  %v7436_v40 = vsub.f32 %v5838_v38, %v5841_v53 }
 0x5a3   : > { %v5924_v58 = vpop.eup %4548  ;;  %4568 = vpow2.f32 %v1627_v13  ;;  %v7437_v13 = vsub.f32 %v5829_v23, %v5841_v53 }
 0x5a4   : > { %v5926_v8 = vpop.eup %4550  ;;  %4570 = vpow2.f32 %v1629_v34  ;;  %v1663_v50 = vadd.f32 %v5917_v14, %v1662_v55  ;;  %v1700_v21 = vpack.c.bf16 %v5924_v58, %v5919_v27  ;;  %v1655_v24 = vmul.f32 1.442695, %v7436_v40 }
 0x5a5   : > { %v5931_v47 = vpop.eup %4552  ;;  %4572 = vpow2.f32 %v1631_v43  ;;  %v1657_v34 = vmul.f32 1.442695, %v7437_v13  ;;  %v7438_v43 = vsub.f32 %v5835_v42, %v5841_v53 }
 0x5a6   : > { %v5936_v61 = vpop.eup %4554  ;;  %4574 = vpow2.f32 %v1633_v60  ;;  %v1664_v39 = vadd.f32 %v5919_v27, %v1663_v50  ;;  %v1701_v20 = vpack.c.bf16 %v5931_v47, %v5926_v8 }
 0x5a7   : > { %v5944_v63 = vpop.eup %4556  ;;  %4576 = vpow2.f32 %v1635_v10  ;;  %v1659_v60 = vmul.f32 1.442695, %v7438_v43  ;;  %v7448_v43 = vld [vmem:[#allocation34_spill] sm:$0xff] }
 0x5a8   : > { %v5949_v36 = vpop.eup %4558  ;;  %4578 = vpow2.f32 %v1637_v0  ;;  %v1665_v16 = vadd.f32 %v5924_v58, %v1664_v39  ;;  %v1702_v11 = vpack.c.bf16 %v5944_v63, %v5936_v61 }
 0x5a9   : > { %v5957_v45 = vpop.eup %4560  ;;  %4580 = vpow2.f32 %v1639_v44 }
 0x5aa   : > { %v5962_v46 = vpop.eup %4562  ;;  %4582 = vpow2.f32 %v1641_v19  ;;  %v1666_v17 = vadd.f32 %v5926_v8, %v1665_v16  ;;  %v1703_v41 = vpack.c.bf16 %v5957_v45, %v5949_v36 }
 0x5ab   : > { %v5970_v32 = vpop.eup %4564  ;;  %4584 = vpow2.f32 %v1643_v33 }
 0x5ac   : > { %v5975_v51 = vpop.eup %4566  ;;  %4586 = vpow2.f32 %v1645_v9  ;;  %v1667_v62 = vadd.f32 %v5931_v47, %v1666_v17  ;;  %v1704_v57 = vpack.c.bf16 %v5970_v32, %v5962_v46 }
 0x5ad   : > { %v5983_v37 = vpop.eup %4568  ;;  %4588 = vpow2.f32 %v1647_v7 }
 0x5ae   : > { %v4571_v1 = vpop.eup %4570  ;;  %4590 = vpow2.f32 %v1649_v30  ;;  %v1668_v48 = vadd.f32 %v5936_v61, %v1667_v62  ;;  %v1705_v15 = vpack.c.bf16 %v5983_v37, %v5975_v51 }
 0x5af   : > { %v4573_v25 = vpop.eup %4572  ;;  %4592 = vpow2.f32 %v1651_v28 }
 0x5b0   : > { %v4575_v55 = vpop.eup %4574  ;;  %4594 = vpow2.f32 %v1653_v31  ;;  %v1669_v38 = vadd.f32 %v5944_v63, %v1668_v48  ;;  %v1706_v10 = vpack.c.bf16 %v4573_v25, %v4571_v1 }
 0x5b1   : > { %v4577_v0 = vpop.eup %4576  ;;  %4596 = vpow2.f32 %v1655_v24 }
 0x5b2   : > { %v4579_v23 = vpop.eup %4578  ;;  %4598 = vpow2.f32 %v1657_v34  ;;  %v1670_v50 = vadd.f32 %v5949_v36, %v1669_v38  ;;  %4152 = vmatprep.subr.bf16.mxu0 %v1706_v10  ;;  %v1707_v44 = vpack.c.bf16 %v4577_v0, %v4575_v55  ;;  %v7451_v38 = vld [vmem:[#allocation25_spill] sm:$0xff]  ;;  %v7452_v10 = vld [vmem:[#allocation27_spill] sm:$0xff] }
 0x5b3   : > { %v4581_v19 = vpop.eup %4580  ;;  %4600 = vpow2.f32 %v1659_v60  ;;  %4153 = vmatpush3.bf16.msra.mxu0 %v1698_v3  ;;  %v7449_v60 = vld [vmem:[#allocation21_spill] sm:$0xff] }
 0x5b4   : > { %v4583_v42 = vpop.eup %4582  ;;  %v1671_v53 = vadd.f32 %v5957_v45, %v1670_v50  ;;  %4154 = vmatprep.subr.bf16.mxu0 %v1707_v44  ;;  %v1708_v39 = vpack.c.bf16 %v4581_v19, %v4579_v23  ;;  %v7455_v50 = vld [vmem:[#allocation33_spill] sm:$0xff]  ;;  %v7456_v44 = vld [vmem:[#allocation35_spill] sm:$0xff] }
 0x5b5   : > { %v4585_v33 = vpop.eup %4584 }
 0x5b6   : > { %v4587_v9 = vpop.eup %4586  ;;  %v1672_v16 = vadd.f32 %v5962_v46, %v1671_v53  ;;  %v1709_v7 = vpack.c.bf16 %v4585_v33, %v4583_v42 }
 0x5b7   : > { %v4589_v30 = vpop.eup %4588  ;;  %4155 = vmatpush3.bf16.msra.mxu0 %v1699_v54 }
 0x5b8   : > { %v4591_v17 = vpop.eup %4590  ;;  %v1673_v28 = vadd.f32 %v5970_v32, %v1672_v16  ;;  %4156 = vmatprep.subr.bf16.mxu0 %v1708_v39  ;;  %v1710_v5 = vpack.c.bf16 %v4589_v30, %v4587_v9  ;;  %v7441_v32 = vld [vmem:[#allocation20_spill] sm:$0xff] }
 0x5b9   : > { %v4593_v4 = vpop.eup %4592 }
 0x5ba   : > { %v4595_v3 = vpop.eup %4594  ;;  %v1674_v31 = vadd.f32 %v5975_v51, %v1673_v28  ;;  %v1711_v62 = vpack.c.bf16 %v4593_v4, %v4591_v17 }
 0x5bb   : > { %v4597_v40 = vpop.eup %4596  ;;  %4157 = vmatpush3.bf16.msra.mxu0 %v1700_v21 }
 0x5bc   : > { %v4599_v24 = vpop.eup %4598  ;;  %v1675_v13 = vadd.f32 %v5983_v37, %v1674_v31  ;;  %4158 = vmatprep.subr.bf16.mxu0 %v1709_v7  ;;  %v1712_v49 = vpack.c.bf16 %v4597_v40, %v4595_v3 }
 0x5bd   : > { %v4601_v14 = vpop.eup %4600 }
 0x5be   : > { %v1676_v54 = vadd.f32 %v4571_v1, %v1675_v13  ;;  %v1713_v34 = vpack.c.bf16 %v4601_v14, %v4599_v24  ;;  %v7442_v1 = vld [vmem:[#allocation22_spill] sm:$0xff] }
 0x5bf   : > { %4159 = vmatpush3.bf16.msra.mxu0 %v1701_v20  ;;  %v7439_v20 = vld [vmem:[#allocation16_spill] sm:$0xff] }
 0x5c0   : > { %v1677_v48 = vadd.f32 %v4573_v25, %v1676_v54  ;;  %4160 = vmatprep.subr.bf16.mxu0 %v1710_v5  ;;  %v7446_v25 = vld [vmem:[#allocation30_spill] sm:$0xff] }
 0x5c2   : > { %v1678_v51 = vadd.f32 %v4575_v55, %v1677_v48  ;;  %v7450_v55 = vld [vmem:[#allocation23_spill] sm:$0xff] }
 0x5c3   : > { %4161 = vmatpush3.bf16.msra.mxu0 %v1702_v11  ;;  %v7440_v11 = vld [vmem:[#allocation18_spill] sm:$0xff] }
 0x5c4   : > { %v1679_v27 = vadd.f32 %v4577_v0, %v1678_v51  ;;  %4162 = vmatprep.subr.bf16.mxu0 %v1711_v62  ;;  %v7453_v0 = vld [vmem:[#allocation29_spill] sm:$0xff] }
 0x5c6   : > { %v1680_v58 = vadd.f32 %v4579_v23, %v1679_v27  ;;  %v7454_v23 = vld [vmem:[#allocation32_spill] sm:$0xff] }
 0x5c7   : > { %4163 = vmatpush3.bf16.msra.mxu0 %v1703_v41 }
 0x5c8   : > { %v1681_v21 = vadd.f32 %v4581_v19, %v1680_v58  ;;  %4164 = vmatprep.subr.bf16.mxu0 %v1712_v49 }
 0x5ca   : > { %v1682_v37 = vadd.f32 %v4583_v42, %v1681_v21 }
 0x5cb   : > { %4165 = vmatpush3.bf16.msra.mxu0 %v1704_v57 }
 0x5cc   : > { %v1683_v8 = vadd.f32 %v4585_v33, %v1682_v37  ;;  %4166 = vmatprep.subr.bf16.mxu0 %v1713_v34 }
 0x5ce   : > { %v1684_v47 = vadd.f32 %v4587_v9, %v1683_v8 }
 0x5cf   : > { %4167 = vmatpush3.bf16.msra.mxu0 %v1705_v15  ;;  %v7445_v15 = vld [vmem:[#allocation28_spill] sm:$0xff] }
 0x5d0   : > { %v1685_v61 = vadd.f32 %v4589_v30, %v1684_v47  ;;  %4344 = vmatprep.subr.bf16.mxu0 %v7439_v20 }
 0x5d2   : > { %v1686_v63 = vadd.f32 %v4591_v17, %v1685_v61  ;;  %1747 = vmatmul.mubr.bf16.vlgmr.msra.gmra.mrb[24].mxu0 %v5188_v59  ;;  %v7443_v59 = vld [vmem:[#allocation24_spill] sm:$0xff] }
 0x5d3   : > { %1754 = vmatprep.mubr.bf16.mxu0 %v5196_v22  ;;  %4345 = vmatpush3.bf16.msra.mxu0 %v7439_v20  ;;  %v7444_v22 = vld [vmem:[#allocation26_spill] sm:$0xff] }
 0x5d4   : > { %v1687_v36 = vadd.f32 %v4593_v4, %v1686_v63  ;;  %4346 = vmatprep.subr.bf16.mxu0 %v7440_v11 }
 0x5d6   : > { %v1688_v45 = vadd.f32 %v4595_v3, %v1687_v36 }
 0x5d7   : > { %4347 = vmatpush3.bf16.msra.mxu0 %v7440_v11 }
 0x5d8   : > { %v1689_v46 = vadd.f32 %v4597_v40, %v1688_v45 }
 0x5da   : > { %v1690_v41 = vadd.f32 %v4599_v24, %v1689_v46  ;;  %1755 = vmatmul.mubr.bf16.gmra.mrb[28].mxu0 %v5194_v26  ;;  %v7447_v26 = vld [vmem:[#allocation31_spill] sm:$0xff] }
 0x5db   : > { %4348 = vmatprep.mubr.msk.bf16.mxu0 %vm639_vm0, %v7441_v32 }
 0x5dc   : > { %v1691_v57 = vadd.f32 %v4601_v14, %v1690_v41 }
 0x5de   : > { %v1692_v19 = vrot.slane %v1691_v57, 4 }
 0x5e0   : > { %v1693_v42 = vadd.f32 %v1692_v19, %v1691_v57 }
 0x5e2   : > { %4349 = vmatmul.mubr.msk.bf16.vlgmr.msra.gmra.mrb[32].mxu0 %vm639_vm0, %v7442_v1  ;;  %v1694_v53 = vrot.slane %v1693_v42, 2 }
 0x5e3   : > { %4352 = vmatprep.mubr.msk.bf16.mxu0 %vm639_vm0, %v7443_v59 }
 0x5e4   : > { %v1695_v39 = vadd.f32 %v1694_v53, %v1693_v42 }
 0x5e6   : > { %v1696_v33 = vrot.slane %v1695_v39, 1 }
 0x5e8   : > { %v1697_v9 = vadd.f32 %v1696_v33, %v1695_v39 }
 0x5ea   : > { %4353 = vmatmul.mubr.msk.bf16.gmra.mrb[36].mxu0 %vm639_vm0, %v7444_v22  ;;  %4602 = vrcp.f32 %v1697_v9 }
 0x5eb   : > { %4356 = vmatprep.mubr.msk.bf16.mxu0 %vm639_vm0, %v7445_v15 }
 0x5f2   : > { %4357 = vmatmul.mubr.msk.bf16.gmra.mrb[40].mxu0 %vm639_vm0, %v7446_v25 }
 0x5f3   : > { %4360 = vmatprep.mubr.msk.bf16.mxu0 %vm639_vm0, %v7447_v26 }
 0x5f4   : > { %v4603_v28 = vpop.eup %4602 }
 0x5fa   : > { %4361 = vmatmul.mubr.msk.bf16.gmra.mrb[44].mxu0 %vm639_vm0, %v7448_v43 }
 0x5fb   : > { %4364 = vmatprep.mubr.msk.bf16.mxu0 %vm639_vm0, %v7449_v60 }
 0x602   : > { %4365 = vmatmul.mubr.msk.bf16.gmra.mrb[48].mxu0 %vm639_vm0, %v7450_v55 }
 0x603   : > { %4368 = vmatprep.mubr.msk.bf16.mxu0 %vm639_vm0, %v7451_v38 }
 0x60a   : > { %4369 = vmatmul.mubr.msk.bf16.gmra.mrb[52].mxu0 %vm639_vm0, %v7452_v10 }
 0x60b   : > { %4372 = vmatprep.mubr.msk.bf16.mxu0 %vm639_vm0, %v7453_v0 }
 0x612   : > { %4373 = vmatmul.mubr.msk.bf16.gmra.mrb[56].mxu0 %vm639_vm0, %v7454_v23 }
 0x613   : > { %4376 = vmatprep.mubr.msk.bf16.mxu0 %vm639_vm0, %v7455_v50 }
 0x61a   : > { %4377 = vmatmul.mubr.msk.bf16.gmra.mrb[60].mxu0 %vm639_vm0, %v7456_v44 }
 0x61b   : > { %2686 = vmatprep.mubr.bf16.mxu0 %v5561_v56 }
 0x6a5   : > { %v4168_v16 = vpop.f32.mrb[24].mxu0 }
 0x6a6   : > { %v4169_v7 = vpop.f32.mrb[25].mxu0 }
 0x6a7   : > { %v4170_v30 = vadd.f32 %v4169_v7, %v4168_v16  ;;  %v4171_v17 = vpop.f32.mrb[26].mxu0 }
 0x6a8   : > { %v4172_v5 = vpop.f32.mrb[27].mxu0 }
 0x6a9   : > { %v6065_v4 = vmul.f32 %v4603_v28, %v4170_v30  ;;  %v4173_v3 = vadd.f32 %v4172_v5, %v4171_v17 }
 0x6ab   : > { %7457 = vst [vmem:[#allocation6_spill] sm:$0xff] %v6065_v4  ;;  %v6067_v31 = vmul.f32 %v4603_v28, %v4173_v3 }
 0x6ad   : > { %7458 = vst [vmem:[#allocation7_spill] sm:$0xff] %v6067_v31  ;;  %v4174_v62 = vpop.f32.mrb[28].mxu0 }
 0x6ae   : > { %v4175_v40 = vpop.f32.mrb[29].mxu0 }
 0x6af   : > { %v4176_v24 = vadd.f32 %v4175_v40, %v4174_v62  ;;  %v4177_v13 = vpop.f32.mrb[30].mxu0 }
 0x6b0   : > { %v4178_v49 = vpop.f32.mrb[31].mxu0 }
 0x6b1   : > { %v6071_v14 = vmul.f32 %v4603_v28, %v4176_v24  ;;  %v4179_v54 = vadd.f32 %v4178_v49, %v4177_v13 }
 0x6b3   : > { %7459 = vst [vmem:[#allocation8_spill] sm:$0xff] %v6071_v14  ;;  %v6073_v34 = vmul.f32 %v4603_v28, %v4179_v54 }
 0x6b5   : > { %7460 = vst [vmem:[#allocation9_spill] sm:$0xff] %v6073_v34  ;;  %v6075_v48 = vpop.f32.mrb[32].mxu0 }
 0x6b6   : > { %v6079_v27 = vpop.f32.mrb[33].mxu0 }
 0x6b7   : > { %v6081_v58 = vpop.f32.mrb[34].mxu0 }
 0x6b8   : > { %v6083_v21 = vpop.f32.mrb[35].mxu0 }
 0x6bd   : > { %v6085_v37 = vpop.f32.mrb[36].mxu0 }
 0x6be   : > { %v2068_v8 = vmax.f32 %v6075_v48, %v6085_v37  ;;  %v6089_v47 = vpop.f32.mrb[37].mxu0 }
 0x6bf   : > { %v2066_v61 = vmax.f32 %v6079_v27, %v6089_v47  ;;  %v6093_v20 = vpop.f32.mrb[38].mxu0 }
 0x6c0   : > { %v2069_v63 = vmax.f32 %v6081_v58, %v6093_v20  ;;  %v6097_v36 = vpop.f32.mrb[39].mxu0 }
 0x6c1   : > { %v2067_v11 = vmax.f32 %v6083_v21, %v6097_v36 }
 0x6c5   : > { %v6101_v45 = vpop.f32.mrb[40].mxu0 }
 0x6c6   : > { %v2072_v46 = vmax.f32 %v2068_v8, %v6101_v45  ;;  %v6104_v41 = vpop.f32.mrb[41].mxu0 }
 0x6c7   : > { %v2070_v57 = vmax.f32 %v2066_v61, %v6104_v41  ;;  %v6107_v19 = vpop.f32.mrb[42].mxu0 }
 0x6c8   : > { %v2073_v42 = vmax.f32 %v2069_v63, %v6107_v19  ;;  %v6110_v53 = vpop.f32.mrb[43].mxu0 }
 0x6c9   : > { %v2071_v39 = vmax.f32 %v2067_v11, %v6110_v53 }
 0x6cd   : > { %v6113_v33 = vpop.f32.mrb[44].mxu0 }
 0x6ce   : > { %v2076_v9 = vmax.f32 %v2072_v46, %v6113_v33  ;;  %v6116_v16 = vpop.f32.mrb[45].mxu0 }
 0x6cf   : > { %v2074_v7 = vmax.f32 %v2070_v57, %v6116_v16  ;;  %v6119_v30 = vpop.f32.mrb[46].mxu0 }
 0x6d0   : > { %v2077_v17 = vmax.f32 %v2073_v42, %v6119_v30  ;;  %v6122_v28 = vpop.f32.mrb[47].mxu0 }
 0x6d1   : > { %v2075_v5 = vmax.f32 %v2071_v39, %v6122_v28 }
 0x6d5   : > { %v6125_v3 = vpop.f32.mrb[48].mxu0 }
 0x6d6   : > { %v2080_v62 = vmax.f32 %v2076_v9, %v6125_v3  ;;  %v6128_v40 = vpop.f32.mrb[49].mxu0 }
 0x6d7   : > { %v2078_v24 = vmax.f32 %v2074_v7, %v6128_v40  ;;  %v6131_v13 = vpop.f32.mrb[50].mxu0 }
 0x6d8   : > { %v2081_v49 = vmax.f32 %v2077_v17, %v6131_v13  ;;  %v6134_v54 = vpop.f32.mrb[51].mxu0 }
 0x6d9   : > { %v2079_v8 = vmax.f32 %v2075_v5, %v6134_v54 }
 0x6dd   : > { %v6137_v61 = vpop.f32.mrb[52].mxu0 }
 0x6de   : > { %v2084_v63 = vmax.f32 %v2080_v62, %v6137_v61  ;;  %v6140_v11 = vpop.f32.mrb[53].mxu0 }
 0x6df   : > { %v2082_v46 = vmax.f32 %v2078_v24, %v6140_v11  ;;  %v6143_v57 = vpop.f32.mrb[54].mxu0 }
 0x6e0   : > { %v2085_v42 = vmax.f32 %v2081_v49, %v6143_v57  ;;  %v6146_v39 = vpop.f32.mrb[55].mxu0 }
 0x6e1   : > { %v2083_v9 = vmax.f32 %v2079_v8, %v6146_v39 }
 0x6e5   : > { %v6149_v7 = vpop.f32.mrb[56].mxu0 }
 0x6e6   : > { %v2088_v17 = vmax.f32 %v2084_v63, %v6149_v7  ;;  %v6152_v5 = vpop.f32.mrb[57].mxu0 }
 0x6e7   : > { %v2086_v62 = vmax.f32 %v2082_v46, %v6152_v5  ;;  %v6155_v51 = vpop.f32.mrb[58].mxu0 }
 0x6e8   : > { %v2089_v24 = vmax.f32 %v2085_v42, %v6155_v51  ;;  %v6158_v56 = vpop.f32.mrb[59].mxu0 }
 0x6e9   : > { %v2087_v49 = vmax.f32 %v2083_v9, %v6158_v56 }
 0x6ed   : > { %v6161_v52 = vpop.f32.mrb[60].mxu0 }
 0x6ee   : > { %v2092_v8 = vmax.f32 %v2088_v17, %v6161_v52  ;;  %v6164_v29 = vpop.f32.mrb[61].mxu0 }
 0x6ef   : > { %v2090_v63 = vmax.f32 %v2086_v62, %v6164_v29  ;;  %v6167_v14 = vpop.f32.mrb[62].mxu0 }
 0x6f0   : > { %v2093_v46 = vmax.f32 %v2089_v24, %v6167_v14  ;;  %v6170_v34 = vpop.f32.mrb[63].mxu0 }
 0x6f1   : > { %v2091_v42 = vmax.f32 %v2087_v49, %v6170_v34 }
 0x6f2   : > { %v2095_v35 = vmax.f32 %v2092_v8, %v2093_v46 }
 0x6f3   : > { %v2094_v18 = vmax.f32 %v2090_v63, %v2091_v42 }
 0x6f5   : > { %v2096_v4 = vmax.f32 %v2094_v18, %v2095_v35 }
 0x6f7   : > { %v2097_v9 = vrot.slane %v2096_v4, 4 }
 0x6f9   : > { %v2098_v31 = vmax.f32 %v2096_v4, %v2097_v9 }
 0x6fb   : > { %v2099_v44 = vrot.slane %v2098_v31, 2 }
 0x6fd   : > { %v2100_v50 = vmax.f32 %v2098_v31, %v2099_v44 }
 0x6ff   : > { %v2101_v17 = vrot.slane %v2100_v50, 1 }
 0x701   : > { %v6173_v23 = vmax.f32 %v2100_v50, %v2101_v17 }
 0x703   : > { %v2103_v62 = vsub.f32 %v6079_v27, %v6173_v23  ;;  %v2104_v24 = vsub.f32 %v6083_v21, %v6173_v23  ;;  %v2105_v0 = vsub.f32 %v6075_v48, %v6173_v23  ;;  %v2106_v49 = vsub.f32 %v6081_v58, %v6173_v23 }
 0x704   : > { %v2107_v35 = vsub.f32 %v6089_v47, %v6173_v23  ;;  %v2108_v18 = vsub.f32 %v6097_v36, %v6173_v23  ;;  %v2109_v50 = vsub.f32 %v6085_v37, %v6173_v23  ;;  %v2110_v44 = vsub.f32 %v6093_v20, %v6173_v23 }
 0x705   : > { %v2111_v4 = vsub.f32 %v6104_v41, %v6173_v23  ;;  %v2112_v31 = vsub.f32 %v6110_v53, %v6173_v23  ;;  %v2113_v48 = vsub.f32 %v6101_v45, %v6173_v23  ;;  %v2114_v27 = vsub.f32 %v6107_v19, %v6173_v23 }
 0x706   : > { %v2115_v58 = vsub.f32 %v6116_v16, %v6173_v23  ;;  %v2116_v21 = vsub.f32 %v6122_v28, %v6173_v23  ;;  %v2117_v37 = vsub.f32 %v6113_v33, %v6173_v23  ;;  %v2118_v47 = vsub.f32 %v6119_v30, %v6173_v23 }
 0x707   : > { %v2119_v20 = vsub.f32 %v6128_v40, %v6173_v23  ;;  %v2120_v36 = vsub.f32 %v6134_v54, %v6173_v23  ;;  %v2121_v45 = vsub.f32 %v6125_v3, %v6173_v23  ;;  %v2122_v41 = vsub.f32 %v6131_v13, %v6173_v23 }
 0x708   : > { %v2123_v19 = vsub.f32 %v6140_v11, %v6173_v23  ;;  %v2124_v53 = vsub.f32 %v6146_v39, %v6173_v23  ;;  %v2125_v33 = vsub.f32 %v6137_v61, %v6173_v23  ;;  %v2126_v16 = vsub.f32 %v6143_v57, %v6173_v23 }
 0x709   : > { %v2127_v30 = vsub.f32 %v6152_v5, %v6173_v23  ;;  %v2135_v63 = vmul.f32 1.442695, %v2103_v62  ;;  %v2137_v46 = vmul.f32 1.442695, %v2104_v24  ;;  %v2139_v42 = vmul.f32 1.442695, %v2105_v0 }
 0x70a   : > { %v2141_v9 = vmul.f32 1.442695, %v2106_v49  ;;  %v2143_v17 = vmul.f32 1.442695, %v2107_v35  ;;  %v2145_v40 = vmul.f32 1.442695, %v2108_v18 }
 0x70b   : > { %4604 = vpow2.f32 %v2135_v63  ;;  %v2147_v3 = vmul.f32 1.442695, %v2109_v50  ;;  %v2149_v13 = vmul.f32 1.442695, %v2110_v44  ;;  %v2151_v54 = vmul.f32 1.442695, %v2111_v4 }
 0x70c   : > { %4606 = vpow2.f32 %v2137_v46  ;;  %v2153_v28 = vmul.f32 1.442695, %v2112_v31  ;;  %v2155_v11 = vmul.f32 1.442695, %v2113_v48  ;;  %v2157_v8 = vmul.f32 1.442695, %v2114_v27 }
 0x70d   : > { %4608 = vpow2.f32 %v2139_v42  ;;  %v2159_v62 = vmul.f32 1.442695, %v2115_v58  ;;  %v2161_v0 = vmul.f32 1.442695, %v2116_v21  ;;  %v2163_v49 = vmul.f32 1.442695, %v2117_v37 }
 0x70e   : > { %4610 = vpow2.f32 %v2141_v9  ;;  %v2165_v18 = vmul.f32 1.442695, %v2118_v47  ;;  %v2167_v44 = vmul.f32 1.442695, %v2119_v20  ;;  %v2169_v27 = vmul.f32 1.442695, %v2120_v36 }
 0x70f   : > { %4612 = vpow2.f32 %v2143_v17  ;;  %v2171_v21 = vmul.f32 1.442695, %v2121_v45  ;;  %v2177_v45 = vmul.f32 1.442695, %v2124_v53  ;;  %v2181_v39 = vmul.f32 1.442695, %v2126_v16 }
 0x710   : > { %4614 = vpow2.f32 %v2145_v40  ;;  %v2175_v40 = vmul.f32 1.442695, %v2123_v19  ;;  %v2183_v61 = vmul.f32 1.442695, %v2127_v30  ;;  %v7461_v9 = vsub.f32 %v6158_v56, %v6173_v23 }
 0x711   : > { %4616 = vpow2.f32 %v2147_v3  ;;  %v7462_v17 = vsub.f32 %v6149_v7, %v6173_v23 }
 0x712   : > { %4618 = vpow2.f32 %v2149_v13  ;;  %v2185_v57 = vmul.f32 1.442695, %v7461_v9 }
 0x713   : > { %4620 = vpow2.f32 %v2151_v54  ;;  %v2187_v5 = vmul.f32 1.442695, %v7462_v17 }
 0x714   : > { %4622 = vpow2.f32 %v2153_v28  ;;  %v2173_v28 = vmul.f32 1.442695, %v2122_v41  ;;  %v2179_v41 = vmul.f32 1.442695, %v2125_v33 }
 0x715   : > { %v6239_v24 = vpop.eup %4604  ;;  %4624 = vpow2.f32 %v2155_v11 }
 0x716   : > { %v6241_v35 = vpop.eup %4606  ;;  %4626 = vpow2.f32 %v2157_v8 }
 0x717   : > { %v6243_v50 = vpop.eup %4608  ;;  %4628 = vpow2.f32 %v2159_v62  ;;  %v2199_v4 = vadd.f32 %v6241_v35, %v6239_v24  ;;  %v2236_v31 = vpack.c.bf16 %v6241_v35, %v6239_v24 }
 0x718   : > { %v6249_v48 = vpop.eup %4610  ;;  %4630 = vpow2.f32 %v2161_v0 }
 0x719   : > { %v6251_v58 = vpop.eup %4612  ;;  %4632 = vpow2.f32 %v2163_v49  ;;  %v2200_v37 = vadd.f32 %v6243_v50, %v2199_v4  ;;  %v2237_v47 = vpack.c.bf16 %v6249_v48, %v6243_v50  ;;  %v7463_v49 = vsub.f32 %v6155_v51, %v6173_v23 }
 0x71a   : > { %v6256_v20 = vpop.eup %4614  ;;  %4634 = vpow2.f32 %v2165_v18 }
 0x71b   : > { %v6258_v3 = vpop.eup %4616  ;;  %4636 = vpow2.f32 %v2167_v44  ;;  %v2201_v13 = vadd.f32 %v6249_v48, %v2200_v37  ;;  %v2238_v36 = vpack.c.bf16 %v6256_v20, %v6251_v58  ;;  %v2189_v56 = vmul.f32 1.442695, %v7463_v49 }
 0x71c   : > { %v6263_v54 = vpop.eup %4618  ;;  %4638 = vpow2.f32 %v2169_v27  ;;  %v7464_v44 = vsub.f32 %v6164_v29, %v6173_v23  ;;  %v7465_v37 = vsub.f32 %v6170_v34, %v6173_v23 }
 0x71d   : > { %v6268_v11 = vpop.eup %4620  ;;  %4640 = vpow2.f32 %v2171_v21  ;;  %v2202_v19 = vadd.f32 %v6251_v58, %v2201_v13  ;;  %v2239_v8 = vpack.c.bf16 %v6263_v54, %v6258_v3 }
 0x71e   : > { %v6276_v63 = vpop.eup %4622  ;;  %4642 = vpow2.f32 %v2173_v28  ;;  %v2191_v7 = vmul.f32 1.442695, %v7464_v44  ;;  %v2193_v51 = vmul.f32 1.442695, %v7465_v37 }
 0x71f   : > { %v6281_v53 = vpop.eup %4624  ;;  %4644 = vpow2.f32 %v2175_v40  ;;  %v2203_v33 = vadd.f32 %v6256_v20, %v2202_v19  ;;  %v2240_v46 = vpack.c.bf16 %v6276_v63, %v6268_v11  ;;  %v7466_v40 = vsub.f32 %v6161_v52, %v6173_v23 }
 0x720   : > { %v6289_v42 = vpop.eup %4626  ;;  %4646 = vpow2.f32 %v2177_v45  ;;  %v7467_v19 = vsub.f32 %v6167_v14, %v6173_v23 }
 0x721   : > { %v6294_v16 = vpop.eup %4628  ;;  %4648 = vpow2.f32 %v2179_v41  ;;  %v2204_v30 = vadd.f32 %v6258_v3, %v2203_v33  ;;  %v2241_v62 = vpack.c.bf16 %v6289_v42, %v6281_v53  ;;  %v2195_v13 = vmul.f32 1.442695, %v7466_v40 }
 0x722   : > { %v6302_v0 = vpop.eup %4630  ;;  %4650 = vpow2.f32 %v2181_v39  ;;  %v2197_v39 = vmul.f32 1.442695, %v7467_v19 }
 0x723   : > { %v6307_v18 = vpop.eup %4632  ;;  %4652 = vpow2.f32 %v2183_v61  ;;  %v2205_v4 = vadd.f32 %v6263_v54, %v2204_v30  ;;  %v2242_v27 = vpack.c.bf16 %v6302_v0, %v6294_v16 }
 0x724   : > { %v6315_v21 = vpop.eup %4634  ;;  %4654 = vpow2.f32 %v2185_v57 }
 0x725   : > { %v4637_v28 = vpop.eup %4636  ;;  %4656 = vpow2.f32 %v2187_v5  ;;  %v2206_v29 = vadd.f32 %v6268_v11, %v2205_v4  ;;  %v2243_v45 = vpack.c.bf16 %v6315_v21, %v6307_v18 }
 0x726   : > { %v4639_v41 = vpop.eup %4638  ;;  %4658 = vpow2.f32 %v2189_v56 }
 0x727   : > { %v4641_v61 = vpop.eup %4640  ;;  %4660 = vpow2.f32 %v2191_v7  ;;  %v2207_v34 = vadd.f32 %v6276_v63, %v2206_v29  ;;  %v2244_v33 = vpack.c.bf16 %v4639_v41, %v4637_v28 }
 0x728   : > { %v4643_v9 = vpop.eup %4642  ;;  %4662 = vpow2.f32 %v2193_v51 }
 0x729   : > { %v4645_v52 = vpop.eup %4644  ;;  %4664 = vpow2.f32 %v2195_v13  ;;  %v2208_v57 = vadd.f32 %v6281_v53, %v2207_v34  ;;  %4198 = vmatprep.subr.bf16.mxu1 %v2244_v33  ;;  %v2245_v17 = vpack.c.bf16 %v4643_v9, %v4641_v61 }
 0x72a   : > { %v4647_v5 = vpop.eup %4646  ;;  %4666 = vpow2.f32 %v2197_v39  ;;  %4199 = vmatpush3.bf16.msra.mxu1 %v2236_v31 }
 0x72b   : > { %v4649_v23 = vpop.eup %4648  ;;  %v2209_v14 = vadd.f32 %v6289_v42, %v2208_v57  ;;  %4200 = vmatprep.subr.bf16.mxu1 %v2245_v17  ;;  %v2246_v30 = vpack.c.bf16 %v4647_v5, %v4645_v52 }
 0x72c   : > { %v4651_v49 = vpop.eup %4650 }
 0x72d   : > { %v4653_v56 = vpop.eup %4652  ;;  %v2210_v44 = vadd.f32 %v6294_v16, %v2209_v14  ;;  %v2247_v7 = vpack.c.bf16 %v4651_v49, %v4649_v23 }
 0x72e   : > { %v4655_v4 = vpop.eup %4654  ;;  %4201 = vmatpush3.bf16.msra.mxu1 %v2237_v47 }
 0x72f   : > { %v4657_v37 = vpop.eup %4656  ;;  %v2211_v51 = vadd.f32 %v6302_v0, %v2210_v44  ;;  %4202 = vmatprep.subr.bf16.mxu1 %v2246_v30  ;;  %v2248_v24 = vpack.c.bf16 %v4655_v4, %v4653_v56 }
 0x730   : > { %v4659_v35 = vpop.eup %4658 }
 0x731   : > { %v4661_v31 = vpop.eup %4660  ;;  %v2212_v40 = vadd.f32 %v6307_v18, %v2211_v51  ;;  %v2249_v13 = vpack.c.bf16 %v4659_v35, %v4657_v37 }
 0x732   : > { %v4663_v29 = vpop.eup %4662  ;;  %4203 = vmatpush3.bf16.msra.mxu1 %v2238_v36 }
 0x733   : > { %v4665_v19 = vpop.eup %4664  ;;  %v2213_v39 = vadd.f32 %v6315_v21, %v2212_v40  ;;  %4204 = vmatprep.subr.bf16.mxu1 %v2247_v7  ;;  %v2250_v50 = vpack.c.bf16 %v4663_v29, %v4661_v31 }
 0x734   : > { %v4667_v48 = vpop.eup %4666 }
 0x735   : > { %v2214_v47 = vadd.f32 %v4637_v28, %v2213_v39  ;;  %v2251_v34 = vpack.c.bf16 %v4667_v48, %v4665_v19 }
 0x736   : > { %4205 = vmatpush3.bf16.msra.mxu1 %v2239_v8  ;;  %v7468_v8 = vld [vmem:[#allocation17_spill] sm:$0xff] }
 0x737   : > { %v2215_v33 = vadd.f32 %v4639_v41, %v2214_v47  ;;  %4206 = vmatprep.subr.bf16.mxu1 %v2248_v24 }
 0x739   : > { %v2216_v18 = vadd.f32 %v4641_v61, %v2215_v33 }
 0x73a   : > { %4207 = vmatpush3.bf16.msra.mxu1 %v2240_v46  ;;  %v7469_v46 = vld [vmem:[#allocation19_spill] sm:$0xff] }
 0x73b   : > { %v2217_v58 = vadd.f32 %v4643_v9, %v2216_v18  ;;  %4208 = vmatprep.subr.bf16.mxu1 %v2249_v13 }
 0x73d   : > { %v2218_v20 = vadd.f32 %v4645_v52, %v2217_v58 }
 0x73e   : > { %4209 = vmatpush3.bf16.msra.mxu1 %v2241_v62 }
 0x73f   : > { %v2219_v36 = vadd.f32 %v4647_v5, %v2218_v20  ;;  %4210 = vmatprep.subr.bf16.mxu1 %v2250_v50 }
 0x741   : > { %v2220_v21 = vadd.f32 %v4649_v23, %v2219_v36 }
 0x742   : > { %4211 = vmatpush3.bf16.msra.mxu1 %v2242_v27 }
 0x743   : > { %v2221_v3 = vadd.f32 %v4651_v49, %v2220_v21  ;;  %4212 = vmatprep.subr.bf16.mxu1 %v2251_v34 }
 0x745   : > { %v2222_v54 = vadd.f32 %v4653_v56, %v2221_v3 }
 0x746   : > { %4213 = vmatpush3.bf16.msra.mxu1 %v2243_v45 }
 0x747   : > { %v2223_v11 = vadd.f32 %v4655_v4, %v2222_v54  ;;  %4380 = vmatprep.subr.bf16.mxu1 %v7468_v8 }
 0x749   : > { %v2224_v63 = vadd.f32 %v4657_v37, %v2223_v11  ;;  %2285 = vmatmul.mubr.bf16.vlgmr.msra.gmra.mrb[96].mxu1 %v5557_v12 }
 0x74a   : > { %2292 = vmatprep.mubr.bf16.mxu1 %v5565_v6  ;;  %4381 = vmatpush3.bf16.msra.mxu1 %v7468_v8 }
 0x74b   : > { %v2225_v53 = vadd.f32 %v4659_v35, %v2224_v63  ;;  %4382 = vmatprep.subr.bf16.mxu1 %v7469_v46 }
 0x74d   : > { %v2226_v42 = vadd.f32 %v4661_v31, %v2225_v53 }
 0x74e   : > { %4383 = vmatpush3.bf16.msra.mxu1 %v7469_v46 }
 0x74f   : > { %v2227_v16 = vadd.f32 %v4663_v29, %v2226_v42 }
 0x751   : > { %v2228_v62 = vadd.f32 %v4665_v19, %v2227_v16  ;;  %2293 = vmatmul.mubr.bf16.gmra.mrb[100].mxu1 %v5563_v2 }
 0x752   : > { %4384 = vmatprep.mubr.msk.bf16.mxu1 %vm639_vm0, %v7441_v32  ;;  %v7470_v32 = vld [vmem:[#allocation29_spill] sm:$0xff] }
 0x753   : > { %v2229_v0 = vadd.f32 %v4667_v48, %v2228_v62 }
 0x759   : > { %4385 = vmatmul.mubr.msk.bf16.vlgmr.msra.gmra.mrb[104].mxu1 %vm639_vm0, %v7442_v1  ;;  %v7471_v1 = vld [vmem:[#allocation32_spill] sm:$0xff] }
 0x75a   : > { %4388 = vmatprep.mubr.msk.bf16.mxu1 %vm639_vm0, %v7443_v59  ;;  %v7472_v59 = vld [vmem:[#allocation33_spill] sm:$0xff] }
 0x761   : > { %4389 = vmatmul.mubr.msk.bf16.gmra.mrb[108].mxu1 %vm639_vm0, %v7444_v22  ;;  %v7473_v22 = vld [vmem:[#allocation35_spill] sm:$0xff] }
 0x762   : > { %4392 = vmatprep.mubr.msk.bf16.mxu1 %vm639_vm0, %v7445_v15  ;;  %v7474_v15 = vmov 0  }
 0x769   : > { %4393 = vmatmul.mubr.msk.bf16.gmra.mrb[112].mxu1 %vm639_vm0, %v7446_v25  ;;  %v2230_v25 = vrot.slane %v2229_v0, 4 }
 0x76a   : > { %4396 = vmatprep.mubr.msk.bf16.mxu1 %vm639_vm0, %v7447_v26 }
 0x76b   : > { %v2231_v26 = vadd.f32 %v2230_v25, %v2229_v0 }
 0x771   : > { %4397 = vmatmul.mubr.msk.bf16.gmra.mrb[116].mxu1 %vm639_vm0, %v7448_v43  ;;  %v2232_v43 = vrot.slane %v2231_v26, 2 }
 0x772   : > { %4400 = vmatprep.mubr.msk.bf16.mxu1 %vm639_vm0, %v7449_v60 }
 0x773   : > { %v2233_v60 = vadd.f32 %v2232_v43, %v2231_v26 }
 0x779   : > { %4401 = vmatmul.mubr.msk.bf16.gmra.mrb[120].mxu1 %vm639_vm0, %v7450_v55  ;;  %v2234_v55 = vrot.slane %v2233_v60, 1 }
 0x77a   : > { %4404 = vmatprep.mubr.msk.bf16.mxu1 %vm639_vm0, %v7451_v38 }
 0x77b   : > { %v2235_v38 = vadd.f32 %v2234_v55, %v2233_v60 }
 0x77d   : > { %4668 = vrcp.f32 %v2235_v38 }
 0x781   : > { %4405 = vmatmul.mubr.msk.bf16.gmra.mrb[124].mxu1 %vm639_vm0, %v7452_v10 }
 0x782   : > { %4408 = vmatprep.mubr.msk.bf16.mxu1 %vm639_vm0, %v7470_v32 }
 0x787   : > { %v4669_v41 = vpop.eup %4668 }
 0x789   : > { %4409 = vmatmul.mubr.msk.bf16.gmra.mrb[128].mxu1 %vm639_vm0, %v7471_v1 }
 0x78a   : > { %4412 = vmatprep.mubr.msk.bf16.mxu1 %vm639_vm0, %v7472_v59 }
 0x791   : > { %4413 = vmatmul.mubr.msk.bf16.gmra.mrb[132].mxu1 %vm639_vm0, %v7473_v22 }
 0x792   : > { %3857 = vmatprep.mubr.bf16.mxu1 %v7474_v15 }
 0x81c   : > { %v4214_v10 = vpop.f32.mrb[96].mxu1 }
 0x81d   : > { %v4215_v27 = vpop.f32.mrb[97].mxu1 }
 0x81e   : > { %v4216_v28 = vadd.f32 %v4215_v27, %v4214_v10  ;;  %v4217_v45 = vpop.f32.mrb[98].mxu1 }
 0x81f   : > { %v4218_v61 = vpop.f32.mrb[99].mxu1 }
 0x820   : > { %v6397_v9 = vmul.f32 %v4669_v41, %v4216_v28  ;;  %v4219_v52 = vadd.f32 %v4218_v61, %v4217_v45 }
 0x822   : > { %v6399_v57 = vmul.f32 %v4669_v41, %v4219_v52 }
 0x824   : > { %v4220_v5 = vpop.f32.mrb[100].mxu1 }
 0x825   : > { %v4221_v23 = vpop.f32.mrb[101].mxu1 }
 0x826   : > { %v4222_v14 = vadd.f32 %v4221_v23, %v4220_v5  ;;  %v4223_v30 = vpop.f32.mrb[102].mxu1 }
 0x827   : > { %v4224_v49 = vpop.f32.mrb[103].mxu1 }
 0x828   : > { %v6403_v56 = vmul.f32 %v4669_v41, %v4222_v14  ;;  %v4225_v44 = vadd.f32 %v4224_v49, %v4223_v30 }
 0x82a   : > { %v6405_v7 = vmul.f32 %v4669_v41, %v4225_v44 }
 0x82c   : > { %v6409_v37 = vpop.f32.mrb[104].mxu1 }
 0x82d   : > { %v6411_v51 = vpop.f32.mrb[105].mxu1 }
 0x82e   : > { %v6413_v24 = vpop.f32.mrb[106].mxu1 }
 0x82f   : > { %v6415_v35 = vpop.f32.mrb[107].mxu1 }
 0x834   : > { %v6417_v31 = vpop.f32.mrb[108].mxu1 }
 0x835   : > { %v2470_v40 = vmax.f32 %v6409_v37, %v6417_v31  ;;  %v6421_v13 = vpop.f32.mrb[109].mxu1 }
 0x836   : > { %v2468_v29 = vmax.f32 %v6411_v51, %v6421_v13  ;;  %v6425_v19 = vpop.f32.mrb[110].mxu1 }
 0x837   : > { %v2471_v39 = vmax.f32 %v6413_v24, %v6425_v19  ;;  %v6429_v50 = vpop.f32.mrb[111].mxu1 }
 0x838   : > { %v2469_v48 = vmax.f32 %v6415_v35, %v6429_v50 }
 0x83c   : > { %v6433_v47 = vpop.f32.mrb[112].mxu1 }
 0x83d   : > { %v2474_v34 = vmax.f32 %v2470_v40, %v6433_v47  ;;  %v6436_v33 = vpop.f32.mrb[113].mxu1 }
 0x83e   : > { %v2472_v18 = vmax.f32 %v2468_v29, %v6436_v33  ;;  %v6439_v58 = vpop.f32.mrb[114].mxu1 }
 0x83f   : > { %v2475_v20 = vmax.f32 %v2471_v39, %v6439_v58  ;;  %v6442_v36 = vpop.f32.mrb[115].mxu1 }
 0x840   : > { %v2473_v21 = vmax.f32 %v2469_v48, %v6442_v36 }
 0x844   : > { %v6445_v3 = vpop.f32.mrb[116].mxu1 }
 0x845   : > { %v2478_v54 = vmax.f32 %v2474_v34, %v6445_v3  ;;  %v6448_v11 = vpop.f32.mrb[117].mxu1 }
 0x846   : > { %v2476_v8 = vmax.f32 %v2472_v18, %v6448_v11  ;;  %v6451_v63 = vpop.f32.mrb[118].mxu1 }
 0x847   : > { %v2479_v53 = vmax.f32 %v2475_v20, %v6451_v63  ;;  %v6454_v46 = vpop.f32.mrb[119].mxu1 }
 0x848   : > { %v2477_v42 = vmax.f32 %v2473_v21, %v6454_v46 }
 0x84c   : > { %v6457_v16 = vpop.f32.mrb[120].mxu1 }
 0x84d   : > { %v2482_v62 = vmax.f32 %v2478_v54, %v6457_v16  ;;  %v6460_v0 = vpop.f32.mrb[121].mxu1 }
 0x84e   : > { %v2480_v32 = vmax.f32 %v2476_v8, %v6460_v0  ;;  %v6463_v1 = vpop.f32.mrb[122].mxu1 }
 0x84f   : > { %v2483_v59 = vmax.f32 %v2479_v53, %v6463_v1  ;;  %v6466_v22 = vpop.f32.mrb[123].mxu1 }
 0x850   : > { %v2481_v25 = vmax.f32 %v2477_v42, %v6466_v22 }
 0x854   : > { %v6469_v26 = vpop.f32.mrb[124].mxu1 }
 0x855   : > { %v2486_v43 = vmax.f32 %v2482_v62, %v6469_v26  ;;  %v6472_v60 = vpop.f32.mrb[125].mxu1 }
 0x856   : > { %v2484_v55 = vmax.f32 %v2480_v32, %v6472_v60  ;;  %v6475_v38 = vpop.f32.mrb[126].mxu1 }
 0x857   : > { %v2487_v10 = vmax.f32 %v2483_v59, %v6475_v38  ;;  %v6478_v27 = vpop.f32.mrb[127].mxu1 }
 0x858   : > { %v2485_v28 = vmax.f32 %v2481_v25, %v6478_v27 }
 0x85c   : > { %v6481_v45 = vpop.f32.mrb[128].mxu1 }
 0x85d   : > { %v2490_v41 = vmax.f32 %v2486_v43, %v6481_v45  ;;  %v6484_v61 = vpop.f32.mrb[129].mxu1 }
 0x85e   : > { %v2488_v52 = vmax.f32 %v2484_v55, %v6484_v61  ;;  %v6487_v5 = vpop.f32.mrb[130].mxu1 }
 0x85f   : > { %v2491_v23 = vmax.f32 %v2487_v10, %v6487_v5  ;;  %v6490_v14 = vpop.f32.mrb[131].mxu1 }
 0x860   : > { %v2489_v30 = vmax.f32 %v2485_v28, %v6490_v14 }
 0x864   : > { %v6493_v49 = vpop.f32.mrb[132].mxu1 }
 0x865   : > { %v2494_v44 = vmax.f32 %v2490_v41, %v6493_v49  ;;  %v6496_v40 = vpop.f32.mrb[133].mxu1 }
 0x866   : > { %v2492_v29 = vmax.f32 %v2488_v52, %v6496_v40  ;;  %v6499_v39 = vpop.f32.mrb[134].mxu1 }
 0x867   : > { %v2495_v48 = vmax.f32 %v2491_v23, %v6499_v39  ;;  %v6502_v34 = vpop.f32.mrb[135].mxu1 }
 0x868   : > { %v2493_v18 = vmax.f32 %v2489_v30, %v6502_v34 }
 0x869   : > { %v2497_v20 = vmax.f32 %v2494_v44, %v2495_v48 }
 0x86a   : > { %v2496_v21 = vmax.f32 %v2492_v29, %v2493_v18 }
 0x86c   : > { %v2498_v54 = vmax.f32 %v2496_v21, %v2497_v20 }
 0x86e   : > { %v2499_v8 = vrot.slane %v2498_v54, 4 }
 0x870   : > { %v2500_v53 = vmax.f32 %v2498_v54, %v2499_v8 }
 0x872   : > { %v2501_v42 = vrot.slane %v2500_v53, 2 }
 0x874   : > { %v2502_v62 = vmax.f32 %v2500_v53, %v2501_v42 }
 0x876   : > { %v2503_v32 = vrot.slane %v2502_v62, 1 }
 0x878   : > { %v6505_v59 = vmax.f32 %v2502_v62, %v2503_v32 }
 0x87a   : > { %v2505_v25 = vsub.f32 %v6411_v51, %v6505_v59  ;;  %v2506_v43 = vsub.f32 %v6415_v35, %v6505_v59  ;;  %v2507_v55 = vsub.f32 %v6409_v37, %v6505_v59  ;;  %v2508_v10 = vsub.f32 %v6413_v24, %v6505_v59 }
 0x87b   : > { %v2509_v28 = vsub.f32 %v6421_v13, %v6505_v59  ;;  %v2510_v41 = vsub.f32 %v6429_v50, %v6505_v59  ;;  %v2511_v52 = vsub.f32 %v6417_v31, %v6505_v59  ;;  %v2512_v51 = vsub.f32 %v6425_v19, %v6505_v59 }
 0x87c   : > { %v2513_v35 = vsub.f32 %v6436_v33, %v6505_v59  ;;  %v2514_v37 = vsub.f32 %v6442_v36, %v6505_v59  ;;  %v2515_v24 = vsub.f32 %v6433_v47, %v6505_v59  ;;  %v2516_v13 = vsub.f32 %v6439_v58, %v6505_v59 }
 0x87d   : > { %v2517_v50 = vsub.f32 %v6448_v11, %v6505_v59  ;;  %v2518_v31 = vsub.f32 %v6454_v46, %v6505_v59  ;;  %v2519_v19 = vsub.f32 %v6445_v3, %v6505_v59  ;;  %v2520_v33 = vsub.f32 %v6451_v63, %v6505_v59 }
 0x87e   : > { %v2521_v36 = vsub.f32 %v6460_v0, %v6505_v59  ;;  %v2522_v47 = vsub.f32 %v6466_v22, %v6505_v59  ;;  %v2523_v58 = vsub.f32 %v6457_v16, %v6505_v59  ;;  %v2524_v11 = vsub.f32 %v6463_v1, %v6505_v59 }
 0x87f   : > { %v2525_v46 = vsub.f32 %v6472_v60, %v6505_v59  ;;  %v2526_v3 = vsub.f32 %v6478_v27, %v6505_v59  ;;  %v2527_v63 = vsub.f32 %v6469_v26, %v6505_v59  ;;  %v2528_v0 = vsub.f32 %v6475_v38, %v6505_v59 }
 0x880   : > { %v2529_v22 = vsub.f32 %v6484_v61, %v6505_v59  ;;  %v2530_v16 = vsub.f32 %v6490_v14, %v6505_v59  ;;  %v2531_v1 = vsub.f32 %v6481_v45, %v6505_v59  ;;  %v2532_v60 = vsub.f32 %v6487_v5, %v6505_v59 }
 0x881   : > { %v2533_v23 = vsub.f32 %v6496_v40, %v6505_v59  ;;  %v2534_v30 = vsub.f32 %v6502_v34, %v6505_v59  ;;  %v2535_v44 = vsub.f32 %v6493_v49, %v6505_v59  ;;  %v2536_v29 = vsub.f32 %v6499_v39, %v6505_v59 }
 0x882   : > { %v2537_v48 = vmul.f32 1.442695, %v2505_v25  ;;  %v2539_v18 = vmul.f32 1.442695, %v2506_v43  ;;  %v2541_v20 = vmul.f32 1.442695, %v2507_v55 }
 0x883   : > { %v2543_v21 = vmul.f32 1.442695, %v2508_v10  ;;  %v2545_v54 = vmul.f32 1.442695, %v2509_v28  ;;  %v2547_v8 = vmul.f32 1.442695, %v2510_v41 }
 0x884   : > { %4670 = vpow2.f32 %v2537_v48  ;;  %v2549_v53 = vmul.f32 1.442695, %v2511_v52  ;;  %v2551_v42 = vmul.f32 1.442695, %v2512_v51  ;;  %v2553_v62 = vmul.f32 1.442695, %v2513_v35 }
 0x885   : > { %4672 = vpow2.f32 %v2539_v18  ;;  %v2555_v32 = vmul.f32 1.442695, %v2514_v37  ;;  %v2557_v4 = vmul.f32 1.442695, %v2515_v24  ;;  %v2559_v17 = vmul.f32 1.442695, %v2516_v13 }
 0x886   : > { %4674 = vpow2.f32 %v2541_v20  ;;  %v2561_v25 = vmul.f32 1.442695, %v2517_v50  ;;  %v2563_v43 = vmul.f32 1.442695, %v2518_v31  ;;  %v2565_v10 = vmul.f32 1.442695, %v2519_v19 }
 0x887   : > { %4676 = vpow2.f32 %v2543_v21  ;;  %v2567_v41 = vmul.f32 1.442695, %v2520_v33  ;;  %v2569_v51 = vmul.f32 1.442695, %v2521_v36  ;;  %v2571_v13 = vmul.f32 1.442695, %v2522_v47 }
 0x888   : > { %4678 = vpow2.f32 %v2545_v54  ;;  %v2573_v50 = vmul.f32 1.442695, %v2523_v58  ;;  %v2575_v33 = vmul.f32 1.442695, %v2524_v11  ;;  %v2577_v48 = vmul.f32 1.442695, %v2525_v46 }
 0x889   : > { %4680 = vpow2.f32 %v2547_v8  ;;  %v2579_v58 = vmul.f32 1.442695, %v2526_v3  ;;  %v2581_v11 = vmul.f32 1.442695, %v2527_v63  ;;  %v2583_v27 = vmul.f32 1.442695, %v2528_v0 }
 0x88a   : > { %4682 = vpow2.f32 %v2549_v53  ;;  %v2585_v26 = vmul.f32 1.442695, %v2529_v22  ;;  %v2587_v38 = vmul.f32 1.442695, %v2530_v16  ;;  %v2589_v61 = vmul.f32 1.442695, %v2531_v1 }
 0x88b   : > { %4684 = vpow2.f32 %v2551_v42  ;;  %v2591_v14 = vmul.f32 1.442695, %v2532_v60  ;;  %v2593_v45 = vmul.f32 1.442695, %v2533_v23  ;;  %v2595_v5 = vmul.f32 1.442695, %v2534_v30 }
 0x88c   : > { %4686 = vpow2.f32 %v2553_v62 }
 0x88d   : > { %4688 = vpow2.f32 %v2555_v32 }
 0x88e   : > { %v6571_v55 = vpop.eup %4670  ;;  %4690 = vpow2.f32 %v2557_v4 }
 0x88f   : > { %v6573_v28 = vpop.eup %4672  ;;  %4692 = vpow2.f32 %v2559_v17 }
 0x890   : > { %v6575_v52 = vpop.eup %4674  ;;  %4694 = vpow2.f32 %v2561_v25  ;;  %v2601_v35 = vadd.f32 %v6573_v28, %v6571_v55  ;;  %v2638_v37 = vpack.c.bf16 %v6573_v28, %v6571_v55 }
 0x891   : > { %v6581_v24 = vpop.eup %4676  ;;  %4696 = vpow2.f32 %v2563_v43 }
 0x892   : > { %v6583_v4 = vpop.eup %4678  ;;  %4698 = vpow2.f32 %v2565_v10  ;;  %v2602_v17 = vadd.f32 %v6575_v52, %v2601_v35  ;;  %v2639_v31 = vpack.c.bf16 %v6581_v24, %v6575_v52  ;;  %v2597_v10 = vmul.f32 1.442695, %v2535_v44 }
 0x893   : > { %v6588_v19 = vpop.eup %4680  ;;  %4700 = vpow2.f32 %v2567_v41 }
 0x894   : > { %v6590_v36 = vpop.eup %4682  ;;  %4702 = vpow2.f32 %v2569_v51  ;;  %v2603_v18 = vadd.f32 %v6581_v24, %v2602_v17  ;;  %v2640_v47 = vpack.c.bf16 %v6588_v19, %v6583_v4  ;;  %v2599_v51 = vmul.f32 1.442695, %v2536_v29 }
 0x895   : > { %v6595_v20 = vpop.eup %4684  ;;  %4704 = vpow2.f32 %v2571_v13 }
 0x896   : > { %v6600_v21 = vpop.eup %4686  ;;  %4706 = vpow2.f32 %v2573_v50  ;;  %v2604_v46 = vadd.f32 %v6583_v4, %v2603_v18  ;;  %v2641_v54 = vpack.c.bf16 %v6595_v20, %v6590_v36 }
 0x897   : > { %v6608_v8 = vpop.eup %4688  ;;  %4708 = vpow2.f32 %v2575_v33 }
 0x898   : > { %v6613_v3 = vpop.eup %4690  ;;  %4710 = vpow2.f32 %v2577_v48  ;;  %v2605_v63 = vadd.f32 %v6588_v19, %v2604_v46  ;;  %v2642_v53 = vpack.c.bf16 %v6608_v8, %v6600_v21 }
 0x899   : > { %v6621_v42 = vpop.eup %4692  ;;  %4712 = vpow2.f32 %v2579_v58 }
 0x89a   : > { %v6626_v0 = vpop.eup %4694  ;;  %4714 = vpow2.f32 %v2581_v11  ;;  %v2606_v22 = vadd.f32 %v6590_v36, %v2605_v63  ;;  %v2643_v62 = vpack.c.bf16 %v6621_v42, %v6613_v3 }
 0x89b   : > { %v6634_v32 = vpop.eup %4696  ;;  %4716 = vpow2.f32 %v2583_v27 }
 0x89c   : > { %v6639_v16 = vpop.eup %4698  ;;  %4718 = vpow2.f32 %v2585_v26  ;;  %v2607_v1 = vadd.f32 %v6595_v20, %v2606_v22  ;;  %v2644_v25 = vpack.c.bf16 %v6634_v32, %v6626_v0 }
 0x89d   : > { %v6647_v43 = vpop.eup %4700  ;;  %4720 = vpow2.f32 %v2587_v38 }
 0x89e   : > { %v4703_v60 = vpop.eup %4702  ;;  %4722 = vpow2.f32 %v2589_v61  ;;  %v2608_v40 = vadd.f32 %v6600_v21, %v2607_v1  ;;  %v2645_v23 = vpack.c.bf16 %v6647_v43, %v6639_v16 }
 0x89f   : > { %v4705_v41 = vpop.eup %4704  ;;  %4724 = vpow2.f32 %v2591_v14 }
 0x8a0   : > { %v4707_v35 = vpop.eup %4706  ;;  %4726 = vpow2.f32 %v2593_v45  ;;  %v2609_v34 = vadd.f32 %v6608_v8, %v2608_v40  ;;  %v2646_v30 = vpack.c.bf16 %v4705_v41, %v4703_v60  ;;  %v7476_v8 = vld [vmem:[#allocation6_spill] sm:$0xff]  ;;  %v7485_v40 = vld [vmem:[#allocation4_spill] sm:$0xff] }
 0x8a1   : > { %v4709_v13 = vpop.eup %4708  ;;  %4728 = vpow2.f32 %v2595_v5 }
 0x8a2   : > { %v4711_v49 = vpop.eup %4710  ;;  %4730 = vpow2.f32 %v2597_v10  ;;  %v2610_v44 = vadd.f32 %v6613_v3, %v2609_v34  ;;  %4244 = vmatprep.subr.bf16.mxu0 %v2646_v30  ;;  %v2647_v50 = vpack.c.bf16 %v4709_v13, %v4707_v35  ;;  %v7478_v3 = vld [vmem:[#allocation3_spill] sm:$0xff]  ;;  %v7484_v10 = vld [vmem:[#allocation5_spill] sm:$0xff] }
 0x8a3   : > { %v4713_v17 = vpop.eup %4712  ;;  %4732 = vpow2.f32 %v2599_v51  ;;  %4245 = vmatpush3.bf16.msra.mxu0 %v2638_v37 }
 0x8a4   : > { %v4715_v39 = vpop.eup %4714  ;;  %v2611_v59 = vadd.f32 %v6621_v42, %v2610_v44  ;;  %4246 = vmatprep.subr.bf16.mxu0 %v2647_v50  ;;  %v2648_v29 = vpack.c.bf16 %v4713_v17, %v4711_v49  ;;  %v7479_v42 = vld [vmem:[#allocation2_spill] sm:$0xff] }
 0x8a5   : > { %v4717_v33 = vpop.eup %4716 }
 0x8a6   : > { %v4719_v48 = vpop.eup %4718  ;;  %v2612_v18 = vadd.f32 %v6626_v0, %v2611_v59  ;;  %v2649_v58 = vpack.c.bf16 %v4717_v33, %v4715_v39 }
 0x8a7   : > { %v4721_v11 = vpop.eup %4720  ;;  %4247 = vmatpush3.bf16.msra.mxu0 %v2639_v31 }
 0x8a8   : > { %v4723_v46 = vpop.eup %4722  ;;  %v2613_v27 = vadd.f32 %v6634_v32, %v2612_v18  ;;  %4248 = vmatprep.subr.bf16.mxu0 %v2648_v29  ;;  %v2650_v55 = vpack.c.bf16 %v4721_v11, %v4719_v48  ;;  %v7481_v32 = vld [vmem:[#allocation9_spill] sm:$0xff] }
 0x8a9   : > { %v4725_v28 = vpop.eup %4724 }
 0x8aa   : > { %v4727_v37 = vpop.eup %4726  ;;  %v2614_v26 = vadd.f32 %v6639_v16, %v2613_v27  ;;  %v2651_v63 = vpack.c.bf16 %v4725_v28, %v4723_v46 }
 0x8ab   : > { %v4729_v38 = vpop.eup %4728  ;;  %4249 = vmatpush3.bf16.msra.mxu0 %v2640_v47 }
 0x8ac   : > { %v4731_v61 = vpop.eup %4730  ;;  %v2615_v22 = vadd.f32 %v6647_v43, %v2614_v26  ;;  %4250 = vmatprep.subr.bf16.mxu0 %v2649_v58  ;;  %v2652_v52 = vpack.c.bf16 %v4729_v38, %v4727_v37 }
 0x8ad   : > { %v4733_v24 = vpop.eup %4732 }
 0x8ae   : > { %v2616_v31 = vadd.f32 %v4703_v60, %v2615_v22  ;;  %v2653_v14 = vpack.c.bf16 %v4733_v24, %v4731_v61  ;;  %v7488_v22 = vpack.c.bf16 %v6405_v7, %v6403_v56 }
 0x8af   : > { %4251 = vmatpush3.bf16.msra.mxu0 %v2641_v54  ;;  %v7475_v54 = vld [vmem:[#allocation7_spill] sm:$0xff] }
 0x8b0   : > { %v2617_v45 = vadd.f32 %v4705_v41, %v2616_v31  ;;  %4252 = vmatprep.subr.bf16.mxu0 %v2650_v55  ;;  %v4804_v31 = vld [vmem:[%s4887_s14 + $0x10] sm:$0xff] }
 0x8b2   : > { %v2618_v16 = vadd.f32 %v4707_v35, %v2617_v45  ;;  %v4805_v45 = vld [vmem:[%s4887_s14 + $0x18] sm:$0xff] }
 0x8b3   : > { %4253 = vmatpush3.bf16.msra.mxu0 %v2642_v53  ;;  %v7477_v53 = vpack.c.bf16 %v7475_v54, %v7476_v8 }
 0x8b4   : > { %v2619_v4 = vadd.f32 %v4709_v13, %v2618_v16  ;;  %4254 = vmatprep.subr.bf16.mxu0 %v2651_v63 }
 0x8b6   : > { %v2620_v19 = vadd.f32 %v4711_v49, %v2619_v4  ;;  %v4806_v4 = vld [vmem:[%s4887_s14] sm:$0xff] }
 0x8b7   : > { %4255 = vmatpush3.bf16.msra.mxu0 %v2643_v62  ;;  %v7480_v62 = vpack.c.bf16 %v7478_v3, %v7479_v42 }
 0x8b8   : > { %v2621_v47 = vadd.f32 %v4713_v17, %v2620_v19  ;;  %4256 = vmatprep.subr.bf16.mxu0 %v2652_v52 }
 0x8ba   : > { %v2622_v1 = vadd.f32 %v4715_v39, %v2621_v47  ;;  %v2811_v47 = vpop.permute.xlu0 %2810 }
 0x8bb   : > { %4257 = vmatpush3.bf16.msra.mxu0 %v2644_v25  ;;  %v7482_v25 = vld [vmem:[#allocation8_spill] sm:$0xff] }
 0x8bc   : > { %v2623_v36 = vadd.f32 %v4717_v33, %v2622_v1  ;;  %4258 = vmatprep.subr.bf16.mxu0 %v2653_v14  ;;  %v7483_v5 = vpack.c.bf16 %v7481_v32, %v7482_v25  ;;  %v2806_v14 = vpop.permute.xlu1 %2805  ;;  %v4807_v1 = vld [vmem:[%s4887_s14 + $0x8] sm:$0xff] }
 0x8be   : > { %v2624_v20 = vadd.f32 %v4719_v48, %v2623_v36 }
 0x8bf   : > { %4259 = vmatpush3.bf16.msra.mxu0 %v2645_v23  ;;  %v7486_v23 = vpack.c.bf16 %v7484_v10, %v7485_v40  ;;  %v4810_v10 = vld [vmem:[%s4887_s14 + $0x30] sm:$0xff] }
 0x8c0   : > { %v2625_v21 = vadd.f32 %v4721_v11, %v2624_v20  ;;  %2738 = vmatprep.subr.bf16.mxu0 %v7477_v53  ;;  %v4808_v53 = vld [vmem:[%s4887_s14 + $0x20] sm:$0xff]  ;;  %v2816_v42 = vpop.permute.xlu1 %2815 }
 0x8c2   : > { %v2626_v43 = vadd.f32 %v4723_v46, %v2625_v21  ;;  %2687 = vmatmul.mubr.bf16.vlgmr.msra.gmra.mrb[64].mxu0 %v5557_v12 }
 0x8c3   : > { %2694 = vmatprep.mubr.bf16.mxu0 %v5565_v6  ;;  %2739 = vmatpush1.bf16.msra.mxu0 %v7480_v62 }
 0x8c4   : > { %v2627_v0 = vadd.f32 %v4725_v28, %v2626_v43  ;;  %2740 = vmatprep.subr.bf16.mxu0 %v7483_v5  ;;  %v7487_v28 = vpack.c.bf16 %v6399_v57, %v6397_v9  ;;  %v4445_v9 = vld [vmem:[%s7305_s3 + $0x8] sm:$0xff]  }
 0x8c6   : > { %v2628_v60 = vadd.f32 %v4727_v37, %v2627_v0  ;;  %v4809_v0 = vld [vmem:[%s4887_s14 + $0x28] sm:$0xff] }
 0x8c7   : > { %2741 = vmatpush1.bf16.msra.mxu0 %v7486_v23 }
 0x8c8   : > { %v2629_v41 = vadd.f32 %v4729_v38, %v2628_v60 }
 0x8ca   : > { %v2630_v51 = vadd.f32 %v4731_v61, %v2629_v41  ;;  %2695 = vmatmul.mubr.bf16.gmra.mrb[68].mxu0 %v5563_v2  ;;  %v4444_v61 = vld [vmem:[%s7305_s3] sm:$0xff]   ;;  %v2821_v41 = vpop.permute.xlu0 %2820 }
 0x8cb   : > { %2770 = vmatprep.mubr.bf16.mxu0 %v7474_v15 }
 0x8cc   : > { %v2631_v12 = vadd.f32 %v4733_v24, %v2630_v51 }
 0x8ce   : > { %v2632_v6 = vrot.slane %v2631_v12, 4 }
 0x8d0   : > { %v2633_v35 = vadd.f32 %v2632_v6, %v2631_v12  ;;  %v4811_v6 = vld [vmem:[%s4887_s14 + $0x38] sm:$0xff] }
 0x8d2   : > { %v2634_v34 = vrot.slane %v2633_v35, 2 }
 0x8d4   : > { %v2635_v30 = vadd.f32 %v2634_v34, %v2633_v35 }
 0x8d6   : > { %v2636_v13 = vrot.slane %v2635_v30, 1 }
 0x8d8   : > { %v2637_v49 = vadd.f32 %v2636_v13, %v2635_v30 }
 0x8da   : > { %4734 = vrcp.f32 %v2637_v49 }
 0x8e4   : > { %v4735_v59 = vpop.eup %4734 }
 0x995   : > { %v4260_v44 = vpop.f32.mrb[64].mxu0 }
 0x996   : > { %v4261_v50 = vpop.f32.mrb[65].mxu0 }
 0x997   : > { %v4262_v17 = vadd.f32 %v4261_v50, %v4260_v44  ;;  %v4263_v39 = vpop.f32.mrb[66].mxu0 }
 0x998   : > { %v4264_v29 = vpop.f32.mrb[67].mxu0 }
 0x999   : > { %v2705_v33 = vmul.f32 %v4735_v59, %v4262_v17  ;;  %v4265_v48 = vadd.f32 %v4264_v29, %v4263_v39 }
 0x99b   : > { %v2706_v18 = vmul.f32 %v4735_v59, %v4265_v48 }
 0x99d   : > { %v4266_v2 = vpop.f32.mrb[68].mxu0  ;;  %v2714_v58 = vpack.c.bf16 %v2706_v18, %v2705_v33 }
 0x99e   : > { %v4267_v11 = vpop.f32.mrb[69].mxu0 }
 0x99f   : > { %v4268_v46 = vadd.f32 %v4267_v11, %v4266_v2  ;;  %v4269_v27 = vpop.f32.mrb[70].mxu0  ;;  %2742 = vmatprep.subr.bf16.mxu0 %v2714_v58 }
 0x9a0   : > { %v4270_v55 = vpop.f32.mrb[71].mxu0  ;;  %2743 = vmatpush1.bf16.msra.mxu0 %v7487_v28 }
 0x9a1   : > { %v2707_v37 = vmul.f32 %v4735_v59, %v4268_v46  ;;  %v4271_v26 = vadd.f32 %v4270_v55, %v4269_v27 }
 0x9a3   : > { %v2708_v63 = vmul.f32 %v4735_v59, %v4271_v26 }
 0x9a5   : > { %v2716_v38 = vpack.c.bf16 %v2708_v63, %v2707_v37 }
 0x9a7   : > { %2744 = vmatprep.subr.bf16.mxu0 %v2716_v38 }
 0x9a8   : > { %2745 = vmatpush1.bf16.msra.mxu0 %v7488_v22 }
 0x9ab   : > { %4048 = vmatmul.mubr.msk.bf16.vlgmr.msra.gmra.mrb[72].mxu0 %vm2731_vm1, %v4444_v61 }
 0x9ac   : > { %2780 = vmatprep.mubr.bf16.mxu0 %v7474_v15 }
 0x9b3   : > { %4049 = vmatmul.mubr.msk.bf16.gmra.mrb[76].mxu0 %vm2731_vm1, %v4445_v9 }
 0x9b4   : > { %3288 = vmatprep.mubr.bf16.mxu0 %v7474_v15 }
 0xa7e   : > { %v2772_v57 = vpop.f32.mrb[72].mxu0 }
 0xa7f   : > { %v2774_v52 = vpop.f32.mrb[73].mxu0  ;;  %v2791_v19 = vadd.f32 %v4806_v4, %v2772_v57 }
 0xa80   : > { %v2776_v24 = vpop.f32.mrb[74].mxu0  ;;  %v2792_v36 = vadd.f32 %v4807_v1, %v2774_v52 }
 0xa81   : > { %v2793_v56 = vadd.f32 %v4804_v31, %v2776_v24  ;;  %v2778_v7 = vpop.f32.mrb[75].mxu0  ;;  %v6727_v8 = vadd.f32 %v2806_v14, %v2791_v19 }
 0xa82   : > { %v2794_v16 = vadd.f32 %v4805_v45, %v2778_v7  ;;  %v6730_v62 = vadd.f32 %v2806_v14, %v2792_v36 }
 0xa83   : > { %v6723_v20 = vadd.f32 %v2811_v47, %v2793_v56  ;;  %7491 = vst [vmem:[#allocation12_spill] sm:$0xff] %v6727_v8 }
 0xa84   : > { %v6725_v21 = vadd.f32 %v2811_v47, %v2794_v16  ;;  %7492 = vst [vmem:[#allocation13_spill] sm:$0xff] %v6730_v62 }
 0xa85   : > { %7489 = vst [vmem:[#allocation10_spill] sm:$0xff] %v6723_v20  ;;  %v2831_v5 = vadd.f32 %v6723_v20, %v6727_v8 }
 0xa86   : > { %7490 = vst [vmem:[#allocation11_spill] sm:$0xff] %v6725_v21  ;;  %v2782_v54 = vpop.f32.mrb[76].mxu0  ;;  %v2840_v51 = vadd.f32 %v6725_v21, %v6730_v62 }
 0xa87   : > { %v2795_v43 = vadd.f32 %v4808_v53, %v2782_v54  ;;  %v2784_v3 = vpop.f32.mrb[77].mxu0 }
 0xa88   : > { %v2796_v32 = vadd.f32 %v4809_v0, %v2784_v3  ;;  %v2786_v25 = vpop.f32.mrb[78].mxu0 }
 0xa89   : > { %v6735_v60 = vadd.f32 %v2816_v42, %v2795_v43  ;;  %v2797_v40 = vadd.f32 %v4810_v10, %v2786_v25  ;;  %v2788_v23 = vpop.f32.mrb[79].mxu0 }
 0xa8a   : > { %v6740_v12 = vadd.f32 %v2816_v42, %v2796_v32  ;;  %v2798_v35 = vadd.f32 %v4811_v6, %v2788_v23 }
 0xa8b   : > { %7493 = vst [vmem:[#allocation14_spill] sm:$0xff] %v6735_v60  ;;  %v2832_v34 = vadd.f32 %v2831_v5, %v6735_v60  ;;  %v6744_v30 = vadd.f32 %v2821_v41, %v2797_v40 }
 0xa8c   : > { %7494 = vst [vmem:[#allocation15_spill] sm:$0xff] %v6740_v12  ;;  %v2841_v13 = vadd.f32 %v2840_v51, %v6740_v12  ;;  %v6747_v49 = vadd.f32 %v2821_v41, %v2798_v35 }
 0xa8d   : > { %7495 = vst [vmem:[#allocation16_spill] sm:$0xff] %v6744_v30  ;;  %v2833_v44 = vadd.f32 %v2832_v34, %v6744_v30 }
 0xa8e   : > { %7496 = vst [vmem:[#allocation18_spill] sm:$0xff] %v6747_v49  ;;  %v2842_v50 = vadd.f32 %v2841_v13, %v6747_v49 }
 0xa8f   : > { %v2834_v17 = vrot.slane %v2833_v44, 4 }
 0xa90   : > { %v2843_v39 = vrot.slane %v2842_v50, 4 }
 0xa91   : > { %v2835_v59 = vadd.f32 %v2834_v17, %v2833_v44 }
 0xa92   : > { %v2844_v29 = vadd.f32 %v2843_v39, %v2842_v50 }
 0xa93   : > { %v2836_v33 = vrot.slane %v2835_v59, 2 }
 0xa94   : > { %v2845_v48 = vrot.slane %v2844_v29, 2 }
 0xa95   : > { %v2837_v18 = vadd.f32 %v2836_v33, %v2835_v59 }
 0xa96   : > { %v2846_v2 = vadd.f32 %v2845_v48, %v2844_v29 }
 0xa97   : > { %v2838_v58 = vrot.slane %v2837_v18, 1 }
 0xa98   : > { %v2847_v11 = vrot.slane %v2846_v2, 1 }
 0xa99   : > { %v2839_v46 = vadd.f32 %v2838_v58, %v2837_v18 }
 0xa9a   : > { %v2848_v27 = vadd.f32 %v2847_v11, %v2846_v2 }
 0xa9b   : > { %v2850_v55 = vmul.f32 0.03125, %v2839_v46 }
 0xa9c   : > { %v2851_v28 = vmul.f32 0.03125, %v2848_v27  ;;  %v4446_v27 = vld [vmem:[%s7307_s5] sm:$0xff]  }
 0xa9d   : > { %v2852_v37 = vsub.f32 %v6727_v8, %v2850_v55  ;;  %v2854_v26 = vsub.f32 %v6723_v20, %v2850_v55  ;;  %v2856_v63 = vsub.f32 %v6735_v60, %v2850_v55  ;;  %v2858_v9 = vsub.f32 %v6744_v30, %v2850_v55  ;;  %v4447_v55 = vld [vmem:[%s7307_s5 + $0x8] sm:$0xff]  }
 0xa9e   : > { %v2853_v38 = vsub.f32 %v6730_v62, %v2851_v28  ;;  %v2855_v61 = vsub.f32 %v6725_v21, %v2851_v28  ;;  %v2857_v22 = vsub.f32 %v6740_v12, %v2851_v28  ;;  %v2859_v24 = vsub.f32 %v6747_v49, %v2851_v28  ;;  %v4448_v28 = vld [vmem:[%s7307_s5 + $0x10] sm:$0xff]  }
 0xa9f   : > { %v2860_v57 = vmul.f32 %v2852_v37, %v2852_v37  ;;  %v2862_v52 = vmul.f32 %v2854_v26, %v2854_v26  ;;  %v2864_v7 = vmul.f32 %v2856_v63, %v2856_v63  ;;  %v2866_v4 = vmul.f32 %v2858_v9, %v2858_v9 }
 0xaa0   : > { %v2861_v31 = vmul.f32 %v2853_v38, %v2853_v38  ;;  %v2863_v56 = vmul.f32 %v2855_v61, %v2855_v61  ;;  %v2865_v45 = vmul.f32 %v2857_v22, %v2857_v22  ;;  %v2867_v47 = vmul.f32 %v2859_v24, %v2859_v24 }
 0xaa1   : > { %v2868_v14 = vadd.f32 %v2862_v52, %v2860_v57  ;;  %v4456_v57 = vld [vmem:[%s7307_s5 + $0x50] sm:$0xff]   ;;  %v4457_v52 = vld [vmem:[%s7307_s5 + $0x58] sm:$0xff]  }
 0xaa2   : > { %v2877_v16 = vadd.f32 %v2863_v56, %v2861_v31  ;;  %v4459_v31 = vld [vmem:[%s7307_s5 + $0x68] sm:$0xff]   ;;  %v4460_v56 = vld [vmem:[%s7307_s5 + $0x70] sm:$0xff]  }
 0xaa3   : > { %v2869_v19 = vadd.f32 %v2868_v14, %v2864_v7  ;;  %v4461_v7 = vld [vmem:[%s7307_s5 + $0x78] sm:$0xff]   ;;  %v6838_v14 = vpop.permute.xlu1 %3050 }
 0xaa4   : > { %v2878_v1 = vadd.f32 %v2877_v16, %v2865_v45  ;;  %v6840_v45 = vpop.permute.xlu0 %3055 }
 0xaa5   : > { %v2870_v36 = vadd.f32 %v2869_v19, %v2866_v4 }
 0xaa6   : > { %v2879_v54 = vadd.f32 %v2878_v1, %v2867_v47 }
 0xaa7   : > { %v2871_v53 = vrot.slane %v2870_v36, 4  ;;  %v6842_v16 = vpop.permute.xlu1 %3060 }
 0xaa8   : > { %v2880_v43 = vrot.slane %v2879_v54, 4  ;;  %v6844_v4 = vpop.permute.xlu0 %3065 }
 0xaa9   : > { %v2872_v3 = vadd.f32 %v2871_v53, %v2870_v36 }
 0xaaa   : > { %v2881_v42 = vadd.f32 %v2880_v43, %v2879_v54 }
 0xaab   : > { %v2873_v0 = vrot.slane %v2872_v3, 2  ;;  %v6846_v19 = vpop.permute.xlu1 %3070 }
 0xaac   : > { %v2882_v32 = vrot.slane %v2881_v42, 2  ;;  %v6848_v36 = vpop.permute.xlu0 %3075 }
 0xaad   : > { %v2874_v25 = vadd.f32 %v2873_v0, %v2872_v3 }
 0xaae   : > { %v2883_v5 = vadd.f32 %v2882_v32, %v2881_v42 }
 0xaaf   : > { %v2875_v10 = vrot.slane %v2874_v25, 1  ;;  %v6850_v43 = vpop.permute.xlu1 %3080 }
 0xab0   : > { %v2884_v40 = vrot.slane %v2883_v5, 1  ;;  %v6852_v3 = vpop.permute.xlu0 %3085 }
 0xab1   : > { %v2876_v23 = vadd.f32 %v2875_v10, %v2874_v25 }
 0xab2   : > { %v2885_v41 = vadd.f32 %v2884_v40, %v2883_v5 }
 0xab3   : > { %v2886_v51 = vmul.f32 0.03125, %v2876_v23  ;;  %v6854_v32 = vpop.permute.xlu1 %3090 }
 0xab4   : > { %v2887_v6 = vmul.f32 0.03125, %v2885_v41  ;;  %v6856_v10 = vpop.permute.xlu0 %3095 }
 0xab5   : > { %v2888_v35 = vadd.f32 1e-05, %v2886_v51 }
 0xab6   : > { %v2889_v34 = vadd.f32 1e-05, %v2887_v6 }
 0xab7   : > { %4736 = vrsqrt.f32 %v2888_v35  ;;  %v6858_v40 = vpop.permute.xlu1 %3100 }
 0xab8   : > { %4738 = vrsqrt.f32 %v2889_v34  ;;  %v6860_v35 = vpop.permute.xlu0 %3105 }
 0xabb   : > { %v6862_v34 = vpop.permute.xlu1 %3110 }
 0xac1   : > { %v4737_v13 = vpop.eup %4736 }
 0xac2   : > { %v4739_v44 = vpop.eup %4738  ;;  %v2892_v50 = vmul.f32 %v4737_v13, %v2852_v37  ;;  %v2894_v17 = vmul.f32 %v4737_v13, %v2854_v26  ;;  %v2898_v18 = vmul.f32 %v4737_v13, %v2858_v9  ;;  %v2896_v58 = vmul.f32 %v4737_v13, %v2856_v63  ;;  %v4449_v37 = vld [vmem:[%s7307_s5 + $0x18] sm:$0xff]   ;;  %v4450_v26 = vld [vmem:[%s7307_s5 + $0x20] sm:$0xff]   ;;  %v4451_v63 = vld [vmem:[%s7307_s5 + $0x28] sm:$0xff]  }
 0xac3   : > { %v2893_v39 = vmul.f32 %v4739_v44, %v2853_v38  ;;  %v2895_v59 = vmul.f32 %v4739_v44, %v2855_v61  ;;  %v2897_v29 = vmul.f32 %v4739_v44, %v2857_v22  ;;  %v2899_v33 = vmul.f32 %v4739_v44, %v2859_v24  ;;  %v4452_v38 = vld [vmem:[%s7307_s5 + $0x30] sm:$0xff]   ;;  %v4453_v61 = vld [vmem:[%s7307_s5 + $0x38] sm:$0xff]   ;;  %v4454_v22 = vld [vmem:[%s7307_s5 + $0x40] sm:$0xff]  }
 0xac4   : > { %v2900_v2 = vpack.c.bf16 %v2894_v17, %v2892_v50  ;;  %v2902_v46 = vpack.c.bf16 %v2898_v18, %v2896_v58  ;;  %v4455_v9 = vld [vmem:[%s7307_s5 + $0x48] sm:$0xff]   ;;  %v4458_v24 = vld [vmem:[%s7307_s5 + $0x60] sm:$0xff]   ;;  %v6864_v50 = vpop.permute.xlu0 %3115 }
 0xac5   : > { %v2901_v48 = vpack.c.bf16 %v2895_v59, %v2893_v39  ;;  %v2903_v11 = vpack.c.bf16 %v2899_v33, %v2897_v29  ;;  %v2971_v59 = vpop.permute.xlu1 %2970 }
 0xac7   : > { %3256 = vmatprep.subr.bf16.mxu0 %v2901_v48 }
 0xac8   : > { %3257 = vmatpush1.bf16.msra.mxu0 %v2900_v2  ;;  %v2976_v29 = vpop.permute.xlu0 %2975 }
 0xac9   : > { %3258 = vmatprep.subr.bf16.mxu0 %v2903_v11  ;;  %v6866_v18 = vpop.permute.xlu1 %3120 }
 0xacc   : > { %3259 = vmatpush1.bf16.msra.mxu0 %v2902_v46  ;;  %v6870_v11 = vpop.permute.xlu0 %3125 }
 0xacd   : > { %v2981_v46 = vpop.permute.xlu1 %2980 }
 0xacf   : > { %4066 = vmatmul.mubr.msk.bf16.vlgmr.msra.gmra.mrb[80].mxu0 %vm639_vm0, %v4446_v27 }
 0xad0   : > { %3298 = vmatprep.mubr.bf16.mxu0 %v7474_v15 }
 0xad7   : > { %4067 = vmatmul.mubr.msk.bf16.gmra.mrb[84].mxu0 %vm639_vm0, %v4447_v55 }
 0xad8   : > { %3308 = vmatprep.mubr.bf16.mxu0 %v7474_v15 }
 0xadf   : > { %4068 = vmatmul.mubr.msk.bf16.gmra.mrb[88].mxu0 %vm639_vm0, %v4448_v28 }
 0xae0   : > { %3318 = vmatprep.mubr.bf16.mxu0 %v7474_v15 }
 0xae7   : > { %4069 = vmatmul.mubr.msk.bf16.gmra.mrb[92].mxu0 %vm639_vm0, %v4449_v37 }
 0xae8   : > { %3328 = vmatprep.mubr.bf16.mxu0 %v7474_v15 }
 0xaef   : > { %4070 = vmatmul.mubr.msk.bf16.gmra.mrb[96].mxu0 %vm639_vm0, %v4450_v26  ;;  %v2986_v26 = vpop.permute.xlu0 %2985 }
 0xaf0   : > { %3338 = vmatprep.mubr.bf16.mxu0 %v7474_v15 }
 0xaf7   : > { %4071 = vmatmul.mubr.msk.bf16.gmra.mrb[100].mxu0 %vm639_vm0, %v4451_v63  ;;  %v2991_v63 = vpop.permute.xlu1 %2990 }
 0xaf8   : > { %3348 = vmatprep.mubr.bf16.mxu0 %v7474_v15 }
 0xaff   : > { %4072 = vmatmul.mubr.msk.bf16.gmra.mrb[104].mxu0 %vm639_vm0, %v4452_v38 }
 0xb00   : > { %3358 = vmatprep.mubr.bf16.mxu0 %v7474_v15 }
 0xb07   : > { %4073 = vmatmul.mubr.msk.bf16.gmra.mrb[108].mxu0 %vm639_vm0, %v4453_v61 }
 0xb08   : > { %3368 = vmatprep.mubr.bf16.mxu0 %v7474_v15 }
 0xb0f   : > { %4074 = vmatmul.mubr.msk.bf16.gmra.mrb[112].mxu0 %vm639_vm0, %v4454_v22  ;;  %v2996_v22 = vpop.permute.xlu0 %2995 }
 0xb10   : > { %3378 = vmatprep.mubr.bf16.mxu0 %v7474_v15 }
 0xb17   : > { %4075 = vmatmul.mubr.msk.bf16.gmra.mrb[116].mxu0 %vm639_vm0, %v4455_v9 }
 0xb18   : > { %3388 = vmatprep.mubr.bf16.mxu0 %v7474_v15 }
 0xb1f   : > { %4076 = vmatmul.mubr.msk.bf16.gmra.mrb[120].mxu0 %vm639_vm0, %v4456_v57 }
 0xb20   : > { %3398 = vmatprep.mubr.bf16.mxu0 %v7474_v15 }
 0xb27   : > { %4077 = vmatmul.mubr.msk.bf16.gmra.mrb[124].mxu0 %vm639_vm0, %v4457_v52  ;;  %v3001_v52 = vpop.permute.xlu1 %3000 }
 0xb28   : > { %3408 = vmatprep.mubr.bf16.mxu0 %v7474_v15 }
 0xb2f   : > { %4078 = vmatmul.mubr.msk.bf16.gmra.mrb[128].mxu0 %vm639_vm0, %v4458_v24  ;;  %v3006_v24 = vpop.permute.xlu0 %3005 }
 0xb30   : > { %3418 = vmatprep.mubr.bf16.mxu0 %v7474_v15 }
 0xb33   : > { %v6890_v12 = vpop.permute.xlu0 %3015 }
 0xb34   : > { %7505 = vst [vmem:[#allocation21_spill] sm:$0xff] %v6890_v12 }
 0xb37   : > { %4079 = vmatmul.mubr.msk.bf16.gmra.mrb[132].mxu0 %vm639_vm0, %v4459_v31 }
 0xb38   : > { %3428 = vmatprep.mubr.bf16.mxu0 %v7474_v15 }
 0xb3f   : > { %4080 = vmatmul.mubr.msk.bf16.gmra.mrb[136].mxu0 %vm639_vm0, %v4460_v56 }
 0xb40   : > { %3438 = vmatprep.mubr.bf16.mxu0 %v7474_v15 }
 0xb47   : > { %4081 = vmatmul.mubr.msk.bf16.gmra.mrb[140].mxu0 %vm639_vm0, %v4461_v7  ;;  %v3011_v7 = vpop.permute.xlu1 %3010 }
 0xb4b   : > { %v6892_v60 = vpop.permute.xlu1 %3020 }
 0xb4c   : > { %7506 = vst [vmem:[#allocation23_spill] sm:$0xff] %v6892_v60 }
 0xba2   : > { %v3290_v47 = vpop.f32.mrb[80].mxu0 }
 0xba3   : > { %v3292_v1 = vpop.f32.mrb[81].mxu0  ;;  %v6894_v21 = vadd.f32 %v3290_v47, %v2971_v59 }
 0xba4   : > { %v3294_v54 = vpop.f32.mrb[82].mxu0  ;;  %v6896_v20 = vadd.f32 %v3292_v1, %v2971_v59 }
 0xba5   : > { %v3296_v53 = vpop.f32.mrb[83].mxu0  ;;  %v6898_v8 = vadd.f32 %v3294_v54, %v2976_v29 }
 0xba6   : > { %v6900_v15 = vadd.f32 %v3296_v53, %v2976_v29  ;;  %v6920_v29 = vpop.permute.xlu0 %3025 }
 0xba7   : > { %7507 = vst [vmem:[#allocation25_spill] sm:$0xff] %v6920_v29 }
 0xbaa   : > { %v3300_v42 = vpop.f32.mrb[84].mxu0 }
 0xbab   : > { %v3302_v0 = vpop.f32.mrb[85].mxu0 }
 0xbac   : > { %v3304_v25 = vpop.f32.mrb[86].mxu0 }
 0xbad   : > { %v3306_v5 = vpop.f32.mrb[87].mxu0 }
 0xbb2   : > { %v3310_v23 = vpop.f32.mrb[88].mxu0 }
 0xbb3   : > { %v3312_v41 = vpop.f32.mrb[89].mxu0  ;;  %v6914_v59 = vadd.f32 %v3310_v23, %v2991_v63 }
 0xbb4   : > { %v3314_v51 = vpop.f32.mrb[90].mxu0  ;;  %v6916_v54 = vadd.f32 %v3312_v41, %v2991_v63  ;;  %v6934_v63 = vpop.permute.xlu1 %3030 }
 0xbb5   : > { %v3316_v6 = vpop.f32.mrb[91].mxu0  ;;  %7510 = vst [vmem:[#allocation19_spill] sm:$0xff] %v6934_v63 }
 0xbba   : > { %v3320_v13 = vpop.f32.mrb[92].mxu0 }
 0xbbb   : > { %v3322_v44 = vpop.f32.mrb[93].mxu0 }
 0xbbc   : > { %v3324_v17 = vpop.f32.mrb[94].mxu0  ;;  %v6931_v23 = vadd.f32 %v3322_v44, %v3001_v52 }
 0xbbd   : > { %v3326_v39 = vpop.f32.mrb[95].mxu0 }
 0xbbe   : > { %7509 = vst [vmem:[#allocation17_spill] sm:$0xff] %v6931_v23 }
 0xbc2   : > { %v3330_v33 = vpop.f32.mrb[96].mxu0 }
 0xbc3   : > { %v3332_v48 = vpop.f32.mrb[97].mxu0 }
 0xbc4   : > { %v3334_v2 = vpop.f32.mrb[98].mxu0 }
 0xbc5   : > { %v6868_v58 = vpop.f32.mrb[99].mxu0 }
 0xbc6   : > { %7497 = vst [vmem:[#allocation20_spill] sm:$0xff] %v6868_v58 }
 0xbca   : > { %v3340_v27 = vpop.f32.mrb[100].mxu0 }
 0xbcb   : > { %v6872_v55 = vpop.f32.mrb[101].mxu0 }
 0xbcc   : > { %7498 = vst [vmem:[#allocation22_spill] sm:$0xff] %v6872_v55  ;;  %v3344_v28 = vpop.f32.mrb[102].mxu0  ;;  %v6911_v55 = vadd.f32 %v3306_v5, %v2986_v26 }
 0xbcd   : > { %v6874_v37 = vpop.f32.mrb[103].mxu0 }
 0xbce   : > { %7499 = vst [vmem:[#allocation24_spill] sm:$0xff] %v6874_v37  ;;  %v6909_v37 = vadd.f32 %v3304_v25, %v2986_v26  ;;  %v6924_v25 = vadd.f32 %v3316_v6, %v2996_v22 }
 0xbd0   : > { %7508 = vst [vmem:[#allocation27_spill] sm:$0xff] %v6924_v25 }
 0xbd2   : > { %v3350_v38 = vpop.f32.mrb[104].mxu0 }
 0xbd3   : > { %v6876_v61 = vpop.f32.mrb[105].mxu0 }
 0xbd4   : > { %7500 = vst [vmem:[#allocation26_spill] sm:$0xff] %v6876_v61  ;;  %v6878_v9 = vpop.f32.mrb[106].mxu0 }
 0xbd5   : > { %v6880_v57 = vpop.f32.mrb[107].mxu0 }
 0xbd6   : > { %7501 = vst [vmem:[#allocation28_spill] sm:$0xff] %v6880_v57  ;;  %v6902_v57 = vadd.f32 %v3300_v42, %v2981_v46 }
 0xbda   : > { %v6882_v31 = vpop.f32.mrb[108].mxu0 }
 0xbdb   : > { %v6884_v56 = vpop.f32.mrb[109].mxu0 }
 0xbdc   : > { %7502 = vst [vmem:[#allocation30_spill] sm:$0xff] %v6884_v56  ;;  %v6886_v49 = vpop.f32.mrb[110].mxu0 }
 0xbdd   : > { %7503 = vst [vmem:[#allocation31_spill] sm:$0xff] %v6886_v49  ;;  %v6888_v30 = vpop.f32.mrb[111].mxu0 }
 0xbde   : > { %7504 = vst [vmem:[#allocation34_spill] sm:$0xff] %v6888_v30  ;;  %v6907_v30 = vadd.f32 %v3302_v0, %v2981_v46  ;;  %v6922_v0 = vadd.f32 %v3314_v51, %v2996_v22  ;;  %v6941_v22 = vadd.f32 %v3330_v33, %v3011_v7 }
 0xbe0   : > { %7513 = vst [vmem:[#allocation33_spill] sm:$0xff] %v6941_v22 }
 0xbe2   : > { %v3370_v62 = vpop.f32.mrb[112].mxu0 }
 0xbe3   : > { %v6905_v56 = vadd.f32 %v3370_v62, %v6838_v14  ;;  %v3372_v61 = vpop.f32.mrb[113].mxu0 }
 0xbe4   : > { %v3373_v47 = vadd.f32 %v3372_v61, %v6838_v14  ;;  %v3374_v1 = vpop.f32.mrb[114].mxu0  ;;  %v6929_v14 = vadd.f32 %v3320_v13, %v3001_v52  ;;  %v6936_v61 = vadd.f32 %v3324_v17, %v3006_v24  ;;  %v6947_v52 = vadd.f32 %v3334_v2, %v6890_v12 }
 0xbe5   : > { %v3481_v53 = vmul.f32 0.044715, %v6905_v56  ;;  %v3375_v42 = vadd.f32 %v3374_v1, %v6840_v45  ;;  %v3376_v62 = vpop.f32.mrb[115].mxu0  ;;  %v6938_v1 = vadd.f32 %v3326_v39, %v3006_v24  ;;  %v6961_v2 = vadd.f32 %v3350_v38, %v6934_v63 }
 0xbe6   : > { %v3482_v5 = vmul.f32 0.044715, %v3373_v47  ;;  %v6927_v46 = vadd.f32 %v3376_v62, %v6840_v45  ;;  %7511 = vst [vmem:[#allocation29_spill] sm:$0xff] %v6936_v61  ;;  %v6943_v45 = vadd.f32 %v3332_v48, %v3011_v7  ;;  %7515 = vst [vmem:[#allocation7_spill] sm:$0xff] %v6947_v52  ;;  %v6954_v62 = vadd.f32 %v3344_v28, %v6920_v29 }
 0xbe7   : > { %v3513_v41 = vmul.f32 %v3481_v53, %v6905_v56  ;;  %v3483_v26 = vmul.f32 0.044715, %v3375_v42  ;;  %7512 = vst [vmem:[#allocation32_spill] sm:$0xff] %v6938_v1  ;;  %v6950_v53 = vadd.f32 %v3340_v27, %v6892_v60  ;;  %7519 = vst [vmem:[#allocation9_spill] sm:$0xff] %v6961_v2  ;;  %v6969_v60 = vpop.permute.xlu1 %3040  ;;  %v6979_v58 = vmul.f32 0.5, %v6905_v56 }
 0xbe8   : > { %v3514_v51 = vmul.f32 %v3482_v5, %v3373_v47  ;;  %v3484_v6 = vmul.f32 0.044715, %v6927_v46  ;;  %7514 = vst [vmem:[#allocation35_spill] sm:$0xff] %v6943_v45  ;;  %7517 = vst [vmem:[#allocation3_spill] sm:$0xff] %v6954_v62  ;;  %v6981_v12 = vmul.f32 0.5, %v3373_v47  ;;  %v6983_v49 = vmul.f32 0.5, %v3375_v42 }
 0xbe9   : > { %v3545_v13 = vmul.f32 %v3513_v41, %v6905_v56  ;;  %v3515_v44 = vmul.f32 %v3483_v26, %v3375_v42  ;;  %7516 = vst [vmem:[#allocation6_spill] sm:$0xff] %v6950_v53  ;;  %v6958_v41 = vpop.permute.xlu0 %3035  ;;  %7521 = vst [vmem:[#allocation5_spill] sm:$0xff] %v6969_v60 }
 0xbea   : > { %v3546_v17 = vmul.f32 %v3514_v51, %v3373_v47  ;;  %v3516_v39 = vmul.f32 %v3484_v6, %v6927_v46  ;;  %v3380_v24 = vpop.f32.mrb[116].mxu0  ;;  %7518 = vst [vmem:[#allocation2_spill] sm:$0xff] %v6958_v41  ;;  %v6967_v28 = vadd.f32 %v6878_v9, %v6958_v41 }
 0xbeb   : > { %v3577_v33 = vadd.f32 %v3545_v13, %v6905_v56  ;;  %v3547_v48 = vmul.f32 %v3515_v44, %v3375_v42  ;;  %v3381_v7 = vadd.f32 %v3380_v24, %v6842_v16  ;;  %v3382_v5 = vpop.f32.mrb[117].mxu0 }
 0xbec   : > { %v3578_v27 = vadd.f32 %v3546_v17, %v3373_v47  ;;  %v3548_v26 = vmul.f32 %v3516_v39, %v6927_v46  ;;  %v3383_v51 = vadd.f32 %v3382_v5, %v6842_v16  ;;  %v3384_v6 = vpop.f32.mrb[118].mxu0  ;;  %7520 = vst [vmem:[#allocation8_spill] sm:$0xff] %v6967_v28  ;;  %v6976_v16 = vadd.f32 %v6882_v31, %v6969_v60 }
 0xbed   : > { %v3609_v13 = vmul.f32 0.7978846, %v3577_v33  ;;  %v3579_v44 = vadd.f32 %v3547_v48, %v3375_v42  ;;  %v3485_v29 = vmul.f32 0.044715, %v3381_v7  ;;  %v3386_v24 = vpop.f32.mrb[119].mxu0  ;;  %v3385_v17 = vadd.f32 %v3384_v6, %v6844_v4 }
 0xbee   : > { %v3580_v45 = vadd.f32 %v3548_v26, %v6927_v46  ;;  %v3486_v38 = vmul.f32 0.044715, %v3383_v51  ;;  %v3387_v39 = vadd.f32 %v3386_v24, %v6844_v4  ;;  %7522 = vst [vmem:[#allocation4_spill] sm:$0xff] %v6976_v16  ;;  %v3610_v41 = vmul.f32 0.7978846, %v3578_v27 }
 0xbef   : > { %v3611_v5 = vmul.f32 0.7978846, %v3579_v44  ;;  %v3517_v9 = vmul.f32 %v3485_v29, %v3381_v7  ;;  %4740 = vtanh.f32 %v3609_v13  ;;  %v3487_v48 = vmul.f32 0.044715, %v3385_v17 }
 0xbf0   : > { %v3518_v33 = vmul.f32 %v3486_v38, %v3383_v51  ;;  %v3488_v63 = vmul.f32 0.044715, %v3387_v39  ;;  %v3612_v6 = vmul.f32 0.7978846, %v3580_v45  ;;  %4742 = vtanh.f32 %v3610_v41 }
 0xbf1   : > { %v3549_v26 = vmul.f32 %v3517_v9, %v3381_v7  ;;  %v3519_v4 = vmul.f32 %v3487_v48, %v3385_v17  ;;  %4744 = vtanh.f32 %v3611_v5  ;;  %v6987_v47 = vmul.f32 0.5, %v3381_v7 }
 0xbf2   : > { %v3520_v24 = vmul.f32 %v3488_v63, %v3387_v39  ;;  %v3390_v31 = vpop.f32.mrb[120].mxu0  ;;  %v3550_v27 = vmul.f32 %v3518_v33, %v3383_v51  ;;  %4746 = vtanh.f32 %v3612_v6  ;;  %v6991_v41 = vmul.f32 0.5, %v6927_v46 }
 0xbf3   : > { %v3581_v29 = vadd.f32 %v3549_v26, %v3381_v7  ;;  %v3391_v13 = vadd.f32 %v3390_v31, %v6846_v19  ;;  %v3392_v44 = vpop.f32.mrb[121].mxu0  ;;  %v3551_v38 = vmul.f32 %v3519_v4, %v3385_v17 }
 0xbf4   : > { %v3552_v60 = vmul.f32 %v3520_v24, %v3387_v39  ;;  %v3393_v56 = vadd.f32 %v3392_v44, %v6846_v19  ;;  %v3394_v9 = vpop.f32.mrb[122].mxu0  ;;  %v3582_v4 = vadd.f32 %v3550_v27, %v3383_v51  ;;  %v6996_v24 = vmul.f32 0.5, %v3385_v17 }
 0xbf5   : > { %v3489_v42 = vmul.f32 0.044715, %v3391_v13  ;;  %v3395_v45 = vadd.f32 %v3394_v9, %v6848_v36  ;;  %v3396_v63 = vpop.f32.mrb[123].mxu0  ;;  %v3613_v5 = vmul.f32 0.7978846, %v3581_v29  ;;  %v3583_v33 = vadd.f32 %v3551_v38, %v3385_v17 }
 0xbf6   : > { %v3490_v48 = vmul.f32 0.044715, %v3393_v56  ;;  %v6994_v26 = vadd.f32 %v3396_v63, %v6848_v36  ;;  %v3584_v7 = vadd.f32 %v3552_v60, %v3387_v39  ;;  %v6999_v9 = vmul.f32 0.5, %v3383_v51 }
 0xbf7   : > { %v3521_v19 = vmul.f32 %v3489_v42, %v3391_v13  ;;  %v3491_v6 = vmul.f32 0.044715, %v3395_v45  ;;  %v3615_v16 = vmul.f32 0.7978846, %v3583_v33  ;;  %v7001_v29 = vmul.f32 0.5, %v3387_v39 }
 0xbf8   : > { %v3522_v31 = vmul.f32 %v3490_v48, %v3393_v56  ;;  %v3492_v44 = vmul.f32 0.044715, %v6994_v26  ;;  %4748 = vtanh.f32 %v3613_v5  ;;  %v7003_v36 = vmul.f32 0.5, %v3391_v13 }
 0xbf9   : > { %v3553_v46 = vmul.f32 %v3521_v19, %v3391_v13  ;;  %v3523_v28 = vmul.f32 %v3491_v6, %v3395_v45  ;;  %v4741_v38 = vpop.eup %4740  ;;  %v7005_v27 = vmul.f32 0.5, %v3395_v45  ;;  %v3614_v2 = vmul.f32 0.7978846, %v3582_v4 }
 0xbfa   : > { %v3524_v17 = vmul.f32 %v3492_v44, %v6994_v26  ;;  %v3400_v42 = vpop.f32.mrb[124].mxu0  ;;  %v4743_v33 = vpop.eup %4742  ;;  %v3554_v19 = vmul.f32 %v3522_v31, %v3393_v56  ;;  %v7012_v5 = vmul.f32 0.7978846, %v3584_v7  ;;  %v7014_v1 = vmul.f32 0.5, %v3393_v56 }
 0xbfb   : > { %v3585_v60 = vadd.f32 %v3553_v46, %v3391_v13  ;;  %v3555_v63 = vmul.f32 %v3523_v28, %v3395_v45  ;;  %v3401_v48 = vadd.f32 %v3400_v42, %v6850_v43  ;;  %v3402_v51 = vpop.f32.mrb[125].mxu0  ;;  %v4745_v23 = vpop.eup %4744  ;;  %4750 = vtanh.f32 %v3615_v16 }
 0xbfc   : > { %v7010_v39 = vadd.f32 %v3402_v51, %v6850_v43  ;;  %v3404_v6 = vpop.f32.mrb[126].mxu0  ;;  %v3556_v44 = vmul.f32 %v3524_v17, %v6994_v26  ;;  %v3673_v46 = vadd.f32 1.0, %v4741_v38  ;;  %v4747_v42 = vpop.eup %4746  ;;  %v3674_v53 = vadd.f32 1.0, %v4743_v33 }
 0xbfd   : > { %v3493_v13 = vmul.f32 0.044715, %v3401_v48  ;;  %v3406_v28 = vpop.f32.mrb[127].mxu0  ;;  %v3617_v62 = vmul.f32 0.7978846, %v3585_v60  ;;  %v3405_v31 = vadd.f32 %v3404_v6, %v6852_v3  ;;  %v3587_v7 = vadd.f32 %v3555_v63, %v3395_v45 }
 0xbfe   : > { %v3494_v4 = vmul.f32 0.044715, %v7010_v39  ;;  %v7020_v43 = vadd.f32 %v3406_v28, %v6852_v3  ;;  %4752 = vtanh.f32 %v3614_v2  ;;  %v7022_v52 = vadd.f32 %v3554_v19, %v3393_v56 }
 0xbff   : > { %v3525_v51 = vmul.f32 %v3493_v13, %v3401_v48  ;;  %v3495_v16 = vmul.f32 0.044715, %v3405_v31  ;;  %v3675_v22 = vadd.f32 1.0, %v4745_v23  ;;  %v7025_v38 = vmul.f32 0.5, %v3401_v48 }
 0xc00   : > { %v3496_v17 = vmul.f32 0.044715, %v7020_v43  ;;  %v3676_v25 = vadd.f32 1.0, %v4747_v42  ;;  %v3706_v61 = vmul.f32 %v3674_v53, %v6981_v12  ;;  %4754 = vtanh.f32 %v3617_v62 }
 0xc01   : > { %v3557_v60 = vmul.f32 %v3525_v51, %v3401_v48  ;;  %v7029_v3 = vadd.f32 %v3556_v44, %v6994_v26  ;;  %v3526_v45 = vmul.f32 %v3494_v4, %v7010_v39  ;;  %v3527_v63 = vmul.f32 %v3495_v16, %v3405_v31 }
 0xc02   : > { %v3410_v2 = vpop.f32.mrb[128].mxu0  ;;  %v3619_v56 = vmul.f32 0.7978846, %v3587_v7  ;;  %v3528_v33 = vmul.f32 %v3496_v17, %v7020_v43  ;;  %v3738_v6 = vmul.f32 %v3706_v61, %v6896_v20  ;;  %v7035_v13 = vpop.eup %4748  ;;  %v3708_v44 = vmul.f32 %v3676_v25, %v6991_v41 }
 0xc03   : > { %v3411_v19 = vadd.f32 %v3410_v2, %v6854_v32  ;;  %v3412_v23 = vpop.f32.mrb[129].mxu0  ;;  %v3589_v28 = vadd.f32 %v3557_v60, %v3401_v48  ;;  %v3559_v12 = vmul.f32 %v3527_v63, %v3405_v31  ;;  %v7041_v42 = vmul.f32 0.5, %v3405_v31 }
 0xc04   : > { %v7038_v53 = vadd.f32 %v3412_v23, %v6854_v32  ;;  %v3414_v62 = vpop.f32.mrb[130].mxu0  ;;  %v3705_v16 = vmul.f32 %v3673_v46, %v6979_v58  ;;  %v3558_v20 = vmul.f32 %v3526_v45, %v7010_v39  ;;  %4756 = vtanh.f32 %v3619_v56 }
 0xc05   : > { %v3497_v4 = vmul.f32 0.044715, %v3411_v19  ;;  %v3415_v7 = vadd.f32 %v3414_v62, %v6856_v10  ;;  %v3416_v51 = vpop.f32.mrb[131].mxu0  ;;  %v3591_v61 = vadd.f32 %v3559_v12, %v3405_v31  ;;  %v4751_v32 = vpop.eup %4750  ;;  %v3560_v25 = vmul.f32 %v3528_v33, %v7020_v43 }
 0xc06   : > { %v3498_v48 = vmul.f32 0.044715, %v7038_v53  ;;  %v7048_v17 = vadd.f32 %v3416_v51, %v6856_v10  ;;  %v3621_v63 = vmul.f32 0.7978846, %v3589_v28  ;;  %v3740_v58 = vmul.f32 %v3708_v44, %v6900_v15 }
 0xc07   : > { %v3529_v41 = vmul.f32 %v3497_v4, %v3411_v19  ;;  %v3499_v60 = vmul.f32 0.044715, %v3415_v7  ;;  %v3707_v12 = vmul.f32 %v3675_v22, %v6983_v49  ;;  %v3737_v10 = vmul.f32 %v3705_v16, %v6894_v21 }
 0xc08   : > { %v3530_v2 = vmul.f32 %v3498_v48, %v7038_v53  ;;  %v3500_v23 = vmul.f32 0.044715, %v7048_v17  ;;  %v4753_v46 = vpop.eup %4752  ;;  %v7057_v56 = vadd.f32 %v3558_v20, %v7010_v39  ;;  %v3623_v33 = vmul.f32 0.7978846, %v3591_v61 }
 0xc09   : > { %v3561_v31 = vmul.f32 %v3529_v41, %v3411_v19  ;;  %v3531_v45 = vmul.f32 %v3499_v60, %v3415_v7  ;;  %v7059_v62 = vmul.f32 0.5, %v3411_v19  ;;  %v3770_v28 = vpack.c.bf16 %v3740_v58, %v3738_v6 }
 0xc0a   : > { %v3420_v4 = vpop.f32.mrb[132].mxu0  ;;  %v3562_v51 = vmul.f32 %v3530_v2, %v7038_v53  ;;  %v3739_v15 = vmul.f32 %v3707_v12, %v6898_v8  ;;  %v7064_v60 = vpop.eup %4754  ;;  %v7067_v21 = vadd.f32 %v3560_v25, %v7020_v43  ;;  %v3532_v49 = vmul.f32 %v3500_v23, %v7048_v17 }
 0xc0b   : > { %v3563_v48 = vmul.f32 %v3531_v45, %v3415_v7  ;;  %v3421_v44 = vadd.f32 %v3420_v4, %v6858_v40  ;;  %v3422_v41 = vpop.f32.mrb[133].mxu0  ;;  %3825 = vmatprep.subr.bf16.mxu1 %v3770_v28  ;;  %4758 = vtanh.f32 %v7012_v5  ;;  %v3593_v16 = vadd.f32 %v3561_v31, %v3411_v19 }
 0xc0c   : > { %v7071_v22 = vadd.f32 %v3422_v41, %v6858_v40  ;;  %v3424_v6 = vpop.f32.mrb[134].mxu0  ;;  %4760 = vtanh.f32 %v3621_v63  ;;  %v7074_v8 = vmul.f32 0.5, %v3415_v7  ;;  %v3769_v20 = vpack.c.bf16 %v3739_v15, %v3737_v10 }
 0xc0d   : > { %v3426_v61 = vpop.f32.mrb[135].mxu0  ;;  %4762 = vtanh.f32 %v3623_v33  ;;  %v3501_v2 = vmul.f32 0.044715, %v3421_v44  ;;  %v3425_v58 = vadd.f32 %v3424_v6, %v6860_v35  ;;  %v7079_v23 = vadd.f32 %v3562_v51, %v7038_v53 }
 0xc0e   : > { %v3502_v25 = vmul.f32 0.044715, %v7071_v22  ;;  %v3595_v40 = vadd.f32 %v3563_v48, %v3415_v7  ;;  %3826 = vmatpush1.bf16.msra.mxu1 %v3769_v20  ;;  %v7082_v45 = vadd.f32 %v3426_v61, %v6860_v35  ;;  %v3678_v5 = vadd.f32 1.0, %v4753_v46  ;;  %v7086_v10 = vpop.eup %4756 }
 0xc0f   : > { %v3564_v19 = vmul.f32 %v3532_v49, %v7048_v17  ;;  %v3533_v63 = vmul.f32 %v3501_v2, %v3421_v44  ;;  %v3503_v12 = vmul.f32 0.044715, %v3425_v58  ;;  %v3625_v33 = vmul.f32 0.7978846, %v3593_v16 }
 0xc10   : > { %v3534_v31 = vmul.f32 %v3502_v25, %v7071_v22  ;;  %v3504_v28 = vmul.f32 0.044715, %v7082_v45  ;;  %v3710_v4 = vmul.f32 %v3678_v5, %v6999_v9  ;;  %v3677_v7 = vadd.f32 1.0, %v7035_v13 }
 0xc11   : > { %v7091_v51 = vmul.f32 0.5, %v3421_v44  ;;  %v3565_v35 = vmul.f32 %v3533_v63, %v3421_v44  ;;  %v3535_v48 = vmul.f32 %v3503_v12, %v3425_v58  ;;  %v3679_v46 = vadd.f32 1.0, %v4751_v32 }
 0xc12   : > { %v3430_v15 = vpop.f32.mrb[136].mxu0  ;;  %v3627_v41 = vmul.f32 0.7978846, %v3595_v40  ;;  %v3742_v49 = vmul.f32 %v3710_v4, %v6907_v30  ;;  %v3709_v6 = vmul.f32 %v3677_v7, %v6987_v47  ;;  %v7097_v61 = vadd.f32 %v3564_v19, %v7048_v17 }
 0xc13   : > { %v3431_v20 = vadd.f32 %v3430_v15, %v6862_v34  ;;  %v3432_v16 = vpop.f32.mrb[137].mxu0  ;;  %v3566_v9 = vmul.f32 %v3534_v31, %v7071_v22  ;;  %v3536_v13 = vmul.f32 %v3504_v28, %v7082_v45  ;;  %v3711_v2 = vmul.f32 %v3679_v46, %v6996_v24 }
 0xc14   : > { %v3434_v25 = vpop.f32.mrb[138].mxu0  ;;  %4764 = vtanh.f32 %v3625_v33  ;;  %v3567_v32 = vmul.f32 %v3535_v48, %v3425_v58  ;;  %v3741_v40 = vmul.f32 %v3709_v6, %v6902_v57  ;;  %v3597_v63 = vadd.f32 %v3565_v35, %v3421_v44 }
 0xc15   : > { %v3505_v30 = vmul.f32 0.044715, %v3431_v20  ;;  %v3436_v5 = vpop.f32.mrb[139].mxu0  ;;  %v4759_v47 = vpop.eup %4758  ;;  %v7103_v12 = vmul.f32 0.5, %v3425_v58  ;;  %v3743_v19 = vmul.f32 %v3711_v2, %v6909_v37  ;;  %v7107_v4 = vadd.f32 %v3432_v16, %v6862_v34 }
 0xc16   : > { %v7109_v31 = vpop.eup %4760  ;;  %4766 = vtanh.f32 %v3627_v41  ;;  %v3680_v24 = vadd.f32 1.0, %v4759_v47  ;;  %v3435_v33 = vadd.f32 %v3434_v25, %v6864_v50  ;;  %v7115_v57 = vadd.f32 %v3566_v9, %v7071_v22 }
 0xc17   : > { %v3537_v28 = vmul.f32 %v3505_v30, %v3431_v20  ;;  %v7112_v7 = vpop.eup %4762  ;;  %v3568_v44 = vmul.f32 %v3536_v13, %v7082_v45  ;;  %v3771_v35 = vpack.c.bf16 %v3743_v19, %v3741_v40  ;;  %v3506_v37 = vmul.f32 0.044715, %v7107_v4 }
 0xc18   : > { %v3599_v48 = vadd.f32 %v3567_v32, %v3425_v58  ;;  %v3712_v34 = vmul.f32 %v3680_v24, %v7001_v29  ;;  %v3507_v15 = vmul.f32 0.044715, %v3435_v33  ;;  %v3629_v41 = vmul.f32 0.7978846, %v3597_v63 }
 0xc19   : > { %v3569_v46 = vmul.f32 %v3537_v28, %v3431_v20  ;;  %v7120_v6 = vmul.f32 0.5, %v3431_v20  ;;  %v3538_v16 = vmul.f32 %v3506_v37, %v7107_v4  ;;  %v7124_v2 = vadd.f32 %v3436_v5, %v6864_v50 }
 0xc1a   : > { %v3440_v9 = vpop.f32.mrb[140].mxu0  ;;  %v3744_v25 = vmul.f32 %v3712_v34, %v6911_v55  ;;  %v3539_v40 = vmul.f32 %v3507_v15, %v3435_v33  ;;  %v3618_v30 = vmul.f32 0.7978846, %v7022_v52  ;;  %v7129_v29 = vadd.f32 %v3568_v44, %v7082_v45 }
 0xc1b   : > { %v3601_v13 = vadd.f32 %v3569_v46, %v3431_v20  ;;  %v3442_v58 = vpop.f32.mrb[141].mxu0  ;;  %v3508_v32 = vmul.f32 0.044715, %v7124_v2  ;;  %v3620_v47 = vmul.f32 0.7978846, %v7029_v3  ;;  %v3681_v63 = vadd.f32 1.0, %v7064_v60 }
 0xc1c   : > { %v3444_v19 = vpop.f32.mrb[142].mxu0  ;;  %v3631_v50 = vmul.f32 0.7978846, %v3599_v48  ;;  %v3772_v5 = vpack.c.bf16 %v3744_v25, %v3742_v49  ;;  %v3571_v24 = vmul.f32 %v3539_v40, %v3435_v33  ;;  %4768 = vtanh.f32 %v3618_v30 }
 0xc1d   : > { %v3446_v55 = vpop.f32.mrb[143].mxu0  ;;  %v3570_v20 = vmul.f32 %v3538_v16, %v7107_v4  ;;  %v3540_v52 = vmul.f32 %v3508_v32, %v7124_v2  ;;  %4770 = vtanh.f32 %v3620_v47  ;;  %v3683_v28 = vadd.f32 1.0, %v7086_v10 }
 0xc1e   : > { %v7137_v44 = vpop.eup %4764  ;;  %4772 = vtanh.f32 %v3629_v41  ;;  %3827 = vmatprep.subr.bf16.mxu1 %v3772_v5  ;;  %v3633_v3 = vmul.f32 0.7978846, %v3601_v13  ;;  %v3713_v60 = vmul.f32 %v3681_v63, %v7003_v36  ;;  %v3441_v37 = vadd.f32 %v3440_v9, %v6866_v18 }
 0xc1f   : > { %3828 = vmatpush1.bf16.msra.mxu1 %v3771_v35  ;;  %v3603_v49 = vadd.f32 %v3571_v24, %v3435_v33  ;;  %v3715_v48 = vmul.f32 %v3683_v28, %v7005_v27  ;;  %v7143_v34 = vadd.f32 %v3442_v58, %v6866_v18  ;;  %v3445_v46 = vadd.f32 %v3444_v19, %v6870_v11 }
 0xc20   : > { %v4767_v15 = vpop.eup %4766  ;;  %4774 = vtanh.f32 %v3631_v50  ;;  %v7146_v10 = vmul.f32 0.5, %v3435_v33  ;;  %v7149_v41 = vmul.f32 %v3713_v60, %v6914_v59  ;;  %v3509_v16 = vmul.f32 0.044715, %v3441_v37 }
 0xc21   : > { %v7152_v36 = vadd.f32 %v3570_v20, %v7107_v4  ;;  %v3572_v35 = vmul.f32 %v3540_v52, %v7124_v2  ;;  %v3460_v27 = vmul.f32 0.5, %v6994_v26  ;;  %v7157_v18 = vmul.f32 %v3715_v48, %v6922_v0 }
 0xc22   : > { %v3541_v9 = vmul.f32 %v3509_v16, %v3441_v37  ;;  %v3510_v25 = vmul.f32 0.044715, %v7143_v34  ;;  %v3511_v13 = vmul.f32 0.044715, %v3445_v46  ;;  %v7161_v33 = vadd.f32 %v3446_v55, %v6870_v11 }
 0xc23   : > { %4776 = vtanh.f32 %v3633_v3  ;;  %v3635_v59 = vmul.f32 0.7978846, %v3603_v49  ;;  %v3773_v40 = vpack.c.bf16 %v7157_v18, %v7149_v41  ;;  %v7165_v30 = vmul.f32 0.5, %v3441_v37 }
 0xc24   : > { %v3573_v58 = vmul.f32 %v3541_v9, %v3441_v37  ;;  %v3543_v32 = vmul.f32 %v3511_v13, %v3445_v46  ;;  %v3512_v26 = vmul.f32 0.044715, %v7161_v33  ;;  %v3622_v0 = vmul.f32 0.7978846, %v7057_v56 }
 0xc25   : > { %v7170_v47 = vadd.f32 %v3572_v35, %v7124_v2  ;;  %v3624_v63 = vmul.f32 0.7978846, %v7067_v21  ;;  %v3685_v11 = vadd.f32 1.0, %v7109_v31  ;;  %v3687_v19 = vadd.f32 1.0, %v7112_v7 }
 0xc26   : > { %v4769_v50 = vpop.eup %4768  ;;  %v3605_v5 = vadd.f32 %v3573_v58, %v3441_v37  ;;  %v3542_v24 = vmul.f32 %v3510_v25, %v7143_v34  ;;  %v3575_v55 = vmul.f32 %v3543_v32, %v3445_v46  ;;  %4778 = vtanh.f32 %v3622_v0  ;;  %v7523_v25 = vld [vmem:[#allocation29_spill] sm:$0xff] }
 0xc27   : > { %v4771_v20 = vpop.eup %4770  ;;  %v3682_v52 = vadd.f32 1.0, %v4769_v50  ;;  %v3544_v28 = vmul.f32 %v3512_v26, %v7161_v33  ;;  %4780 = vtanh.f32 %v3624_v63  ;;  %v3717_v56 = vmul.f32 %v3685_v11, %v7025_v38 }
 0xc28   : > { %v4773_v3 = vpop.eup %4772  ;;  %4782 = vtanh.f32 %v3635_v59  ;;  %v3684_v21 = vadd.f32 1.0, %v4771_v20  ;;  %v3637_v60 = vmul.f32 0.7978846, %v3605_v5  ;;  %v3607_v31 = vadd.f32 %v3575_v55, %v3445_v46  ;;  %v7526_v55 = vld [vmem:[#allocation7_spill] sm:$0xff] }
 0xc29   : > { %v3714_v7 = vmul.f32 %v3682_v52, %v7014_v1  ;;  %v7179_v49 = vmul.f32 0.5, %v3445_v46  ;;  %v3719_v37 = vmul.f32 %v3687_v19, %v7041_v42  ;;  %v7183_v48 = vmul.f32 %v3717_v56, %v6929_v14  ;;  %v7524_v46 = vld [vmem:[#allocation27_spill] sm:$0xff] }
 0xc2a   : > { %v4775_v41 = vpop.eup %4774  ;;  %v3716_v16 = vmul.f32 %v3684_v21, %v3460_v27  ;;  %4784 = vtanh.f32 %v3637_v60  ;;  %v3574_v35 = vmul.f32 %v3542_v24, %v7143_v34  ;;  %v3639_v38 = vmul.f32 0.7978846, %v3607_v31  ;;  %v7527_v21 = vld [vmem:[#allocation6_spill] sm:$0xff] }
 0xc2b   : > { %v3746_v18 = vmul.f32 %v3714_v7, %v6916_v54  ;;  %v3576_v9 = vmul.f32 %v3544_v28, %v7161_v33  ;;  %v7189_v13 = vmul.f32 %v3719_v37, %v7523_v25  ;;  %v3626_v1 = vmul.f32 0.7978846, %v7079_v23  ;;  %v7528_v37 = vld [vmem:[#allocation3_spill] sm:$0xff] }
 0xc2c   : > { %v3748_v42 = vmul.f32 %v3716_v16, %v7524_v46  ;;  %4786 = vtanh.f32 %v3639_v38  ;;  %v3628_v14 = vmul.f32 0.7978846, %v7097_v61  ;;  %v3689_v27 = vadd.f32 1.0, %v7137_v44  ;;  %v7529_v16 = vld [vmem:[#allocation17_spill] sm:$0xff] }
 0xc2d   : > { %v4777_v59 = vpop.eup %4776  ;;  %v3462_v58 = vmul.f32 0.5, %v7010_v39  ;;  %v3775_v54 = vpack.c.bf16 %v7189_v13, %v7183_v48  ;;  %4788 = vtanh.f32 %v3626_v1  ;;  %v3691_v32 = vadd.f32 1.0, %v4767_v15  ;;  %v7525_v15 = vld [vmem:[#allocation33_spill] sm:$0xff]  ;;  %v7539_v48 = vld [vmem:[#allocation22_spill] sm:$0xff] }
 0xc2e   : > { %v3774_v26 = vpack.c.bf16 %v3748_v42, %v3746_v18  ;;  %v3464_v0 = vmul.f32 0.5, %v7020_v43  ;;  %4790 = vtanh.f32 %v3628_v14  ;;  %v3721_v23 = vmul.f32 %v3689_v27, %v7059_v62  ;;  %v7530_v18 = vld [vmem:[#allocation32_spill] sm:$0xff] }
 0xc2f   : > { %v3723_v63 = vmul.f32 %v3691_v32, %v7074_v8  ;;  %v3630_v61 = vmul.f32 0.7978846, %v7115_v57  ;;  %v3632_v44 = vmul.f32 0.7978846, %v7129_v29  ;;  %v3693_v11 = vadd.f32 1.0, %v4773_v3 }
 0xc30   : > { %v4779_v19 = vpop.eup %4778  ;;  %3829 = vmatprep.subr.bf16.mxu1 %v3774_v26  ;;  %v3606_v39 = vadd.f32 %v3574_v35, %v7143_v34  ;;  %v3608_v50 = vadd.f32 %v3576_v9, %v7161_v33  ;;  %v7206_v5 = vmul.f32 %v3721_v23, %v7525_v15  ;;  %v3695_v43 = vadd.f32 1.0, %v4775_v41  ;;  %v7531_v26 = vld [vmem:[#allocation9_spill] sm:$0xff] }
 0xc31   : > { %v4781_v24 = vpop.eup %4780  ;;  %3830 = vmatpush1.bf16.msra.mxu1 %v3773_v40  ;;  %v3686_v62 = vadd.f32 1.0, %v4779_v19  ;;  %v7209_v8 = vmul.f32 %v3723_v63, %v7526_v55  ;;  %4792 = vtanh.f32 %v3630_v61  ;;  %v3725_v57 = vmul.f32 %v3693_v11, %v7091_v51  ;;  %v3046_v63 = vpop.permute.xlu0 %3045  ;;  %v7532_v61 = vld [vmem:[#allocation8_spill] sm:$0xff]  ;;  %v7533_v11 = vld [vmem:[#allocation31_spill] sm:$0xff]  ;;  %v7534_v15 = vld [vmem:[#allocation21_spill] sm:$0xff] }
 0xc32   : > { %v4783_v29 = vpop.eup %4782  ;;  %v3688_v20 = vadd.f32 1.0, %v4781_v24  ;;  %4794 = vtanh.f32 %v3632_v44  ;;  %v3727_v52 = vmul.f32 %v3695_v43, %v7103_v12  ;;  %v3634_v28 = vmul.f32 0.7978846, %v7152_v36  ;;  %v7535_v43 = vld [vmem:[#allocation20_spill] sm:$0xff] }
 0xc33   : > { %v3718_v56 = vmul.f32 %v3686_v62, %v3462_v58  ;;  %v3777_v3 = vpack.c.bf16 %v7209_v8, %v7206_v5  ;;  %v7217_v40 = vmul.f32 %v3725_v57, %v7527_v21  ;;  %v3636_v60 = vmul.f32 0.7978846, %v7170_v47  ;;  %v7536_v57 = vld [vmem:[#allocation4_spill] sm:$0xff] }
 0xc34   : > { %v4785_v31 = vpop.eup %4784  ;;  %v3720_v7 = vmul.f32 %v3688_v20, %v3464_v0  ;;  %v7221_v51 = vmul.f32 %v3727_v52, %v7528_v37  ;;  %4796 = vtanh.f32 %v3634_v28  ;;  %v3697_v41 = vadd.f32 1.0, %v4777_v59  ;;  %v7537_v20 = vld [vmem:[#allocation35_spill] sm:$0xff] }
 0xc35   : > { %v3750_v12 = vmul.f32 %v3718_v56, %v7529_v16  ;;  %v3466_v36 = vmul.f32 0.5, %v7038_v53  ;;  %4798 = vtanh.f32 %v3636_v60  ;;  %v3699_v35 = vadd.f32 1.0, %v4783_v29  ;;  %v7538_v37 = vld [vmem:[#allocation23_spill] sm:$0xff] }
 0xc36   : > { %v4787_v38 = vpop.eup %4786  ;;  %v3752_v9 = vmul.f32 %v3720_v7, %v7530_v18  ;;  %v3468_v25 = vmul.f32 0.5, %v7048_v17  ;;  %v3779_v47 = vpack.c.bf16 %v7221_v51, %v7217_v40  ;;  %v3729_v1 = vmul.f32 %v3697_v41, %v7120_v6  ;;  %v7541_v41 = vld [vmem:[#allocation24_spill] sm:$0xff]  ;;  %v4463_v51 = vld [vmem:[%s7309_s7 + $0x8] sm:$0xff]  }
 0xc37   : > { %v4789_v46 = vpop.eup %4788  ;;  %v3731_v42 = vmul.f32 %v3699_v35, %v7146_v10  ;;  %v3638_v14 = vmul.f32 0.7978846, %v3606_v39  ;;  %v3640_v27 = vmul.f32 0.7978846, %v3608_v50  ;;  %v3701_v59 = vadd.f32 1.0, %v4785_v31 }
 0xc38   : > { %v4791_v58 = vpop.eup %4790  ;;  %v3776_v53 = vpack.c.bf16 %v3752_v9, %v3750_v12  ;;  %v3690_v32 = vadd.f32 1.0, %v4789_v46  ;;  %v7232_v0 = vmul.f32 %v3729_v1, %v7531_v26  ;;  %v3703_v23 = vadd.f32 1.0, %v4787_v38  ;;  %v7542_v46 = vld [vmem:[#allocation19_spill] sm:$0xff] }
 0xc39   : > { %v3692_v17 = vadd.f32 1.0, %v4791_v58  ;;  %v3763_v44 = vmul.f32 %v3731_v42, %v7532_v61  ;;  %4800 = vtanh.f32 %v3638_v14  ;;  %v3733_v6 = vmul.f32 %v3701_v59, %v7165_v30  ;;  %v7543_v42 = vld [vmem:[#allocation26_spill] sm:$0xff] }
 0xc3a   : > { %v3365_v19 = vadd.f32 %v7533_v11, %v3046_v63  ;;  %3831 = vmatprep.subr.bf16.mxu1 %v3776_v53  ;;  %v3722_v10 = vmul.f32 %v3690_v32, %v3466_v36  ;;  %4802 = vtanh.f32 %v3640_v27  ;;  %v3735_v39 = vmul.f32 %v3703_v23, %v7179_v49  ;;  %v7544_v58 = vld [vmem:[#allocation2_spill] sm:$0xff]  ;;  %v7545_v53 = vld [vmem:[#allocation28_spill] sm:$0xff] }
 0xc3b   : > { %v4793_v50 = vpop.eup %4792  ;;  %v3337_v24 = vadd.f32 %v7535_v43, %v7534_v15  ;;  %3832 = vmatpush1.bf16.msra.mxu1 %v3775_v54  ;;  %v3724_v62 = vmul.f32 %v3692_v17, %v3468_v25  ;;  %v3781_v55 = vpack.c.bf16 %v3763_v44, %v7232_v0  ;;  %v3765_v30 = vmul.f32 %v3733_v6, %v7536_v57  ;;  %v7540_v54 = vld [vmem:[#allocation25_spill] sm:$0xff] }
 0xc3c   : > { %v4795_v29 = vpop.eup %4794  ;;  %v3754_v52 = vmul.f32 %v3722_v10, %v7537_v20  ;;  %v3470_v28 = vmul.f32 0.5, %v7071_v22  ;;  %v3694_v56 = vadd.f32 1.0, %v4793_v50  ;;  %v3767_v49 = vmul.f32 %v3735_v39, %v3365_v19  ;;  %v7546_v19 = vld [vmem:[#allocation5_spill] sm:$0xff]  ;;  %v7547_v10 = vld [vmem:[#allocation30_spill] sm:$0xff]  ;;  %v7550_v20 = vld [vmem:[#allocation12_spill] sm:$0xff] }
 0xc3d   : > { %v3756_v21 = vmul.f32 %v3724_v62, %v3337_v24  ;;  %v3472_v60 = vmul.f32 0.5, %v7082_v45  ;;  %v3696_v31 = vadd.f32 1.0, %v4795_v29  ;;  %v3343_v13 = vadd.f32 %v7539_v48, %v7538_v37  ;;  %v7553_v37 = vld [vmem:[#allocation11_spill] sm:$0xff] }
 0xc3e   : > { %v4797_v7 = vpop.eup %4796  ;;  %v3347_v16 = vadd.f32 %v7541_v41, %v7540_v54  ;;  %v3726_v12 = vmul.f32 %v3694_v56, %v3470_v28  ;;  %v3783_v36 = vpack.c.bf16 %v3767_v49, %v3765_v30  ;;  %v3474_v22 = vmul.f32 0.5, %v7107_v4  ;;  %v7551_v49 = vld [vmem:[#allocation13_spill] sm:$0xff] }
 0xc3f   : > { %v4799_v35 = vpop.eup %4798  ;;  %v3778_v38 = vpack.c.bf16 %v3756_v21, %v3754_v52  ;;  %v3728_v18 = vmul.f32 %v3696_v31, %v3472_v60  ;;  %v3698_v9 = vadd.f32 1.0, %v4797_v7  ;;  %v3476_v1 = vmul.f32 0.5, %v7124_v2  ;;  %v7552_v31 = vld [vmem:[#allocation10_spill] sm:$0xff] }
 0xc40   : > { %v3758_v25 = vmul.f32 %v3726_v12, %v3343_v13  ;;  %v3700_v45 = vadd.f32 1.0, %v4799_v35  ;;  %v3353_v14 = vadd.f32 %v7543_v42, %v7542_v46  ;;  %v3357_v32 = vadd.f32 %v7545_v53, %v7544_v58  ;;  %v7556_v46 = vld [vmem:[#allocation16_spill] sm:$0xff] }
 0xc41   : > { %3833 = vmatprep.subr.bf16.mxu1 %v3778_v38  ;;  %v3760_v27 = vmul.f32 %v3728_v18, %v3347_v16  ;;  %v3730_v59 = vmul.f32 %v3698_v9, %v3474_v22  ;;  %v3478_v61 = vmul.f32 0.5, %v7143_v34  ;;  %v3480_v6 = vmul.f32 0.5, %v7161_v33  ;;  %v4462_v33 = vld [vmem:[%s7309_s7] sm:$0xff]  }
 0xc42   : > { %3834 = vmatpush1.bf16.msra.mxu1 %v3777_v3  ;;  %v3732_v26 = vmul.f32 %v3700_v45, %v3476_v1  ;;  %v3363_v39 = vadd.f32 %v7547_v10, %v7546_v19  ;;  %v7548_v3 = vld [vmem:[#allocation34_spill] sm:$0xff]  ;;  %v7549_v40 = vmov 0  }
 0xc43   : > { %v4801_v4 = vpop.eup %4800  ;;  %v3780_v0 = vpack.c.bf16 %v3760_v27, %v3758_v25  ;;  %v3762_v23 = vmul.f32 %v3730_v59, %v3353_v14  ;;  %v3367_v50 = vadd.f32 %v7548_v3, %v3046_v63  ;;  %v7554_v38 = vld [vmem:[#allocation14_spill] sm:$0xff]  ;;  %v7555_v25 = vld [vmem:[#allocation15_spill] sm:$0xff] }
 0xc44   : > { %v4803_v17 = vpop.eup %4802  ;;  %v3764_v2 = vmul.f32 %v3732_v26, %v3357_v32  ;;  %v3702_v44 = vadd.f32 1.0, %v4801_v4  ;;  %v7557_v14 = vld [vmem:[#allocation18_spill] sm:$0xff] }
 0xc45   : > { %3835 = vmatprep.subr.bf16.mxu1 %v3780_v0  ;;  %v3704_v11 = vadd.f32 1.0, %v4803_v17 }
 0xc46   : > { %3836 = vmatpush1.bf16.msra.mxu1 %v3779_v47  ;;  %v3782_v5 = vpack.c.bf16 %v3764_v2, %v3762_v23  ;;  %v3734_v8 = vmul.f32 %v3702_v44, %v3478_v61  ;;  %v3796_v47 = vpop.permute.xlu1 %3795 }
 0xc47   : > { %v3736_v15 = vmul.f32 %v3704_v11, %v3480_v6 }
 0xc48   : > { %3837 = vmatprep.subr.bf16.mxu1 %v3782_v5  ;;  %v3766_v34 = vmul.f32 %v3734_v8, %v3363_v39 }
 0xc49   : > { %v3768_v43 = vmul.f32 %v3736_v15, %v3367_v50 }
 0xc4a   : > { %3838 = vmatpush1.bf16.msra.mxu1 %v3781_v55  ;;  %v3801_v55 = vpop.permute.xlu0 %3800  ;;  %v3806_v13 = vpop.permute.xlu1 %3805 }
 0xc4b   : > { %v3784_v24 = vpack.c.bf16 %v3768_v43, %v3766_v34 }
 0xc4d   : > { %3839 = vmatprep.subr.bf16.mxu1 %v3784_v24 }
 0xc4e   : > { %3840 = vmatpush1.bf16.msra.mxu1 %v3783_v36  ;;  %v3811_v12 = vpop.permute.xlu0 %3810 }
 0xc51   : > { %3858 = vmatmul.mubr.bf16.vlgmr.msra.gmra.mrb[136].mxu1 %v4462_v33 }
 0xc52   : > { %3867 = vmatprep.mubr.bf16.mxu1 %v7549_v40 }
 0xc59   : > { %3868 = vmatmul.mubr.bf16.gmra.mrb[140].mxu1 %v4463_v51 }
 0xd24   : > { %v3859_v63 = vpop.f32.mrb[136].mxu1 }
 0xd25   : > { %v3860_v62 = vadd.f32 %v3859_v63, %v3796_v47  ;;  %v3861_v57 = vpop.f32.mrb[137].mxu1 }
 0xd26   : > { %v3862_v30 = vadd.f32 %v3861_v57, %v3796_v47  ;;  %v3863_v29 = vpop.f32.mrb[138].mxu1 }
 0xd27   : > { %v3878_v52 = vadd.f32 %v3860_v62, %v7550_v20  ;;  %v3864_v28 = vadd.f32 %v3863_v29, %v3801_v55  ;;  %v3865_v56 = vpop.f32.mrb[139].mxu1 }
 0xd28   : > { %v3879_v21 = vadd.f32 %v3862_v30, %v7551_v49  ;;  %v3866_v60 = vadd.f32 %v3865_v56, %v3801_v55 }
 0xd29   : > { %3886 = vst [vmem:[%s7281_s19] sm:$0xff] %v3878_v52  ;;  %v3880_v7 = vadd.f32 %v3864_v28, %v7552_v31 }
 0xd2a   : > { %3887 = vst [vmem:[%s7281_s19 + $0x8] sm:$0xff] %v3879_v21  ;;  %v3881_v48 = vadd.f32 %v3866_v60, %v7553_v37 }
 0xd2b   : > { %3888 = vst [vmem:[%s7281_s19 + $0x10] sm:$0xff] %v3880_v7 }
 0xd2c   : > { %3889 = vst [vmem:[%s7281_s19 + $0x18] sm:$0xff] %v3881_v48  ;;  %v3869_v54 = vpop.f32.mrb[140].mxu1 }
 0xd2d   : > { %v3870_v41 = vadd.f32 %v3869_v54, %v3806_v13  ;;  %v3871_v16 = vpop.f32.mrb[141].mxu1 }
 0xd2e   : > { %v3872_v36 = vadd.f32 %v3871_v16, %v3806_v13  ;;  %v3873_v35 = vpop.f32.mrb[142].mxu1 }
 0xd2f   : > { %v3882_v18 = vadd.f32 %v3870_v41, %v7554_v38  ;;  %v3874_v22 = vadd.f32 %v3873_v35, %v3811_v12  ;;  %v3875_v9 = vpop.f32.mrb[143].mxu1 }
 0xd30   : > { %v3883_v1 = vadd.f32 %v3872_v36, %v7555_v25  ;;  %v3876_v45 = vadd.f32 %v3875_v9, %v3811_v12 }
 0xd31   : > { %3890 = vst [vmem:[%s7281_s19 + $0x20] sm:$0xff] %v3882_v18  ;;  %v3884_v42 = vadd.f32 %v3874_v22, %v7556_v46 }
 0xd32   : > { %3891 = vst [vmem:[%s7281_s19 + $0x28] sm:$0xff] %v3883_v1  ;;  %v3885_v27 = vadd.f32 %v3876_v45, %v7557_v14 }
 0xd33   : > { %3892 = vst [vmem:[%s7281_s19 + $0x30] sm:$0xff] %v3884_v42 }
 0xd34   : > { %3893 = vst [vmem:[%s7281_s19 + $0x38] sm:$0xff] %v3885_v27 }
 0xd35 PF: > { %s19_s30 = sadd.s32 1, %s4818_s30  }
 0xd36   : > { %p16_p4 = scmp.ge.s32.totalorder %s19_s30, 4  }
 0xd38   :  { %18 = sbr.rel (!%p16_p4) target bundleno = 1 (0x1), region = 86 }

</bundles_post_ra>
